<compile_context>
chip_gen: v6e
topology: v6e:2x2x1
jax: 0.10.0
libtpu: 0.0.40
codegen_flags: <defaults>
</compile_context>

<pallas_src>
import functools
import math

import jax
import jax.numpy as jnp
from jax.experimental import pallas as pl
from jax.experimental.pallas import tpu as pltpu


# ----------------------------------------------------------------------------
# Fused encoder kernel: embed (layer 0) + full post-norm encoder layer
# ----------------------------------------------------------------------------

def _encoder_kernel(xp_ref, we_ref, epe_ref,
                    wqkv_ref, bqkv_ref, wo_ref, bo_ref,
                    ln1g_ref, ln1b_ref, w1_ref, b1_ref, w2_ref, b2_ref,
                    ln2g_ref, ln2b_ref,
                    o_ref, x_scr,
                    *, n_head, eps, n_layers, Bb, S):
    D = o_ref.shape[1]
    dh = D // n_head
    scale = 1.0 / math.sqrt(dh)
    layer = pl.program_id(1)

    # ---- layer 0 only: patch embedding + positional encoding -> f32 scratch
    @pl.when(layer == 0)
    def _():
        y = jnp.dot(xp_ref[...], we_ref[...],
                    preferred_element_type=jnp.float32)          # (Bb*S, D)
        y = y.reshape(Bb, S, D) + epe_ref[...]                    # + (bias + PE)
        x_scr[...] = y.reshape(Bb * S, D)

    x = x_scr[...]                                                # (Bb*S, D) f32
    x_bf = x.astype(jnp.bfloat16)

    # ---- fused QKV projection: one (Bb*S, D) x (D, 3D) MXU pass ----
    qkv = jnp.dot(x_bf, wqkv_ref[0],
                  preferred_element_type=jnp.float32) + bqkv_ref[0]   # (Bb*S, 3D)
    qkv3 = qkv.reshape(Bb, S, 3 * D)
    wo = wo_ref[0]                                                # (D, D) bf16

    # ---- multi-head attention, batched over the Bb samples; output projection
    #      folded per head: attn @ Wo == sum_h oh @ Wo[h*dh:(h+1)*dh] ----
    o_acc = jnp.zeros((Bb, S, D), jnp.float32)
    for h in range(n_head):
        qh = qkv3[:, :, h * dh:(h + 1) * dh].astype(jnp.bfloat16)
        kh = qkv3[:, :, D + h * dh:D + (h + 1) * dh].astype(jnp.bfloat16)
        vh = qkv3[:, :, 2 * D + h * dh:2 * D + (h + 1) * dh].astype(jnp.bfloat16)
        s = jnp.einsum('bqd,bkd->bqk', qh, kh,
                       preferred_element_type=jnp.float32) * scale       # (Bb,S,S)
        s = s - jnp.max(s, axis=-1, keepdims=True)
        p = jnp.exp(s)
        p = p * pl.reciprocal(jnp.sum(p, axis=-1, keepdims=True), approx=True)
        oh = jnp.einsum('bqk,bkd->bqd', p.astype(jnp.bfloat16), vh,
                        preferred_element_type=jnp.float32)              # (Bb,S,dh)
        o_acc = o_acc + jnp.einsum('bqd,de->bqe',
                                   oh.astype(jnp.bfloat16),
                                   wo[h * dh:(h + 1) * dh, :],
                                   preferred_element_type=jnp.float32)   # (Bb,S,D)
    o = o_acc.reshape(Bb * S, D) + bo_ref[0]

    # ---- residual + LayerNorm 1 (f32) ----
    h1 = o + x
    m1 = jnp.mean(h1, axis=-1, keepdims=True)
    v1 = jnp.mean(jnp.square(h1 - m1), axis=-1, keepdims=True)
    x1 = (h1 - m1) * jax.lax.rsqrt(v1 + eps) * ln1g_ref[0] + ln1b_ref[0]

    # ---- FFN: Linear -> ReLU -> Linear ----
    f = jnp.dot(x1.astype(jnp.bfloat16), w1_ref[0],
                preferred_element_type=jnp.float32) + b1_ref[0]
    f = jnp.maximum(f, 0.0)
    f = jnp.dot(f.astype(jnp.bfloat16), w2_ref[0],
                preferred_element_type=jnp.float32) + b2_ref[0]

    # ---- residual + LayerNorm 2 (f32) ----
    h2 = f + x1
    m2 = jnp.mean(h2, axis=-1, keepdims=True)
    v2 = jnp.mean(jnp.square(h2 - m2), axis=-1, keepdims=True)
    x2 = (h2 - m2) * jax.lax.rsqrt(v2 + eps) * ln2g_ref[0] + ln2b_ref[0]

    # activation stays resident in VMEM across the layer axis
    x_scr[...] = x2

    @pl.when(layer == n_layers - 1)
    def _():
        o_ref[...] = x2.astype(o_ref.dtype)


def encoder_forward(xp, params, *, B, S, D, n_head, n_layers, Bb, eps=1e-5):
    """xp: (B*S, Cp) bf16 patches. Returns (B*S, D) bf16 encoder output."""
    Cp = xp.shape[1]
    F = params["w1"].shape[2]
    rows = Bb * S
    wmap = lambda b, l: (l, 0, 0)       # per-layer stacked weights
    cmap = lambda b, l: (0, 0)          # constants
    bmap = lambda b, l: (b, 0)          # batch-block slabs

    kernel = functools.partial(_encoder_kernel, n_head=n_head, eps=eps,
                               n_layers=n_layers, Bb=Bb, S=S)
    return pl.pallas_call(
        kernel,
        out_shape=jax.ShapeDtypeStruct((B * S, D), jnp.bfloat16),
        grid=(B // Bb, n_layers),
        in_specs=[
            pl.BlockSpec((rows, Cp), bmap),            # patches (bf16)
            pl.BlockSpec((Cp, D), cmap),               # embed_w (bf16)
            pl.BlockSpec((S, D), cmap),                # embed bias + pos enc (f32)
            pl.BlockSpec((1, D, 3 * D), wmap),         # wqkv (bf16)
            pl.BlockSpec((1, 1, 3 * D), wmap),         # bqkv
            pl.BlockSpec((1, D, D), wmap),             # wo (bf16)
            pl.BlockSpec((1, 1, D), wmap),             # bo
            pl.BlockSpec((1, 1, D), wmap),             # ln1_g
            pl.BlockSpec((1, 1, D), wmap),             # ln1_b
            pl.BlockSpec((1, D, F), wmap),             # w1 (bf16)
            pl.BlockSpec((1, 1, F), wmap),             # b1
            pl.BlockSpec((1, F, D), wmap),             # w2 (bf16)
            pl.BlockSpec((1, 1, D), wmap),             # b2
            pl.BlockSpec((1, 1, D), wmap),             # ln2_g
            pl.BlockSpec((1, 1, D), wmap),             # ln2_b
        ],
        out_specs=pl.BlockSpec((rows, D), bmap),
        scratch_shapes=[pltpu.VMEM((rows, D), jnp.float32)],
        compiler_params=pltpu.CompilerParams(
            dimension_semantics=("parallel", "arbitrary"),
            vmem_limit_bytes=64 * 1024 * 1024),
    )(xp, params["embed_w"], params["embed_pe"],
      params["wqkv"], params["bqkv"], params["wo"], params["bo"],
      params["ln1_g"], params["ln1_b"], params["w1"], params["b1"],
      params["w2"], params["b2"], params["ln2_g"], params["ln2_b"])


# ----------------------------------------------------------------------------
# Fused classifier kernel: Linear -> ReLU -> Linear (hidden & output padded)
# ----------------------------------------------------------------------------

def _classifier_kernel(x_ref, w1_ref, b1_ref, w2_ref, b2_ref, o_ref):
    h = jnp.dot(x_ref[...], w1_ref[...],
                preferred_element_type=jnp.float32) + b1_ref[...]
    h = jnp.maximum(h, 0.0)
    o = jnp.dot(h.astype(jnp.bfloat16), w2_ref[...],
                preferred_element_type=jnp.float32) + b2_ref[...]
    o_ref[...] = o


def classifier(feats, w1, b1, w2, b2):
    B, K = feats.shape
    H = w1.shape[1]
    N = w2.shape[1]          # lane-padded output width (multiple of 128)
    full = lambda i: (0, 0)
    return pl.pallas_call(
        _classifier_kernel,
        out_shape=jax.ShapeDtypeStruct((B, N), jnp.float32),
        grid=(1,),
        in_specs=[
            pl.BlockSpec((B, K), full),
            pl.BlockSpec((K, H), full),
            pl.BlockSpec((1, H), full),
            pl.BlockSpec((H, N), full),
            pl.BlockSpec((1, N), full),
        ],
        out_specs=pl.BlockSpec((B, N), full),
    )(feats, w1, b1, w2, b2)


# ----------------------------------------------------------------------------
# Parameter initialization (mirrors nn.Linear default init; QKV concatenated,
# per-layer weights stacked; matmul weights stored bf16; classifier hidden
# padded 1000 -> 1024 and output padded to a multiple of 128 — numerically exact)
# ----------------------------------------------------------------------------

def _dense_init(key, fan_in, fan_out):
    k1, k2 = jax.random.split(key)
    lim = 1.0 / math.sqrt(fan_in)
    w = jax.random.uniform(k1, (fan_in, fan_out), jnp.float32, -lim, lim)
    b = jax.random.uniform(k2, (fan_out,), jnp.float32, -lim, lim)
    return w, b


def _sinusoidal_pos(seq_len, d_model):
    pos = jnp.arange(seq_len, dtype=jnp.float32)[:, None]
    i = jnp.arange(0, d_model, 2, dtype=jnp.float32)
    angle = pos / jnp.power(10000.0, i / d_model)
    pe = jnp.zeros((seq_len, d_model), jnp.float32)
    pe = pe.at[:, 0::2].set(jnp.sin(angle))
    pe = pe.at[:, 1::2].set(jnp.cos(angle))
    return pe


def init_params(key, *, d_model, n_head, ffn_hidden, n_layers,
                in_channels, patchnum, signallength, classnum,
                cls_hidden=1000, cls_hidden_pad=1024):
    D, F, S = d_model, ffn_hidden, patchnum
    patch_len = signallength // patchnum
    Cp = in_channels * patch_len
    keys = jax.random.split(key, 3 + n_layers)
    params = {}

    ew, eb = _dense_init(keys[0], Cp, D)
    params["embed_w"] = ew.astype(jnp.bfloat16)
    # fold embed bias into the (S, D) positional-encoding table (f32, exact add)
    params["embed_pe"] = _sinusoidal_pos(S, D) + eb[None, :]

    wqkv, bqkv, wo, bo = [], [], [], []
    w1, b1, w2, b2 = [], [], [], []
    ln1g, ln1b, ln2g, ln2b = [], [], [], []
    for li in range(n_layers):
        lk = jax.random.split(keys[1 + li], 6)
        wq, bq_ = _dense_init(lk[0], D, D)
        wk, bk_ = _dense_init(lk[1], D, D)
        wv, bv_ = _dense_init(lk[2], D, D)
        wo_, bo_ = _dense_init(lk[3], D, D)
        w1_, b1_ = _dense_init(lk[4], D, F)
        w2_, b2_ = _dense_init(lk[5], F, D)
        wqkv.append(jnp.concatenate([wq, wk, wv], axis=1))          # (D, 3D)
        bqkv.append(jnp.concatenate([bq_, bk_, bv_]).reshape(1, 3 * D))
        wo.append(wo_); bo.append(bo_.reshape(1, D))
        w1.append(w1_); b1.append(b1_.reshape(1, F))
        w2.append(w2_); b2.append(b2_.reshape(1, D))
        ln1g.append(jnp.ones((1, D), jnp.float32))
        ln1b.append(jnp.zeros((1, D), jnp.float32))
        ln2g.append(jnp.ones((1, D), jnp.float32))
        ln2b.append(jnp.zeros((1, D), jnp.float32))

    params["wqkv"] = jnp.stack(wqkv).astype(jnp.bfloat16)   # (L, D, 3D)
    params["bqkv"] = jnp.stack(bqkv)                        # (L, 1, 3D) f32
    params["wo"] = jnp.stack(wo).astype(jnp.bfloat16)
    params["bo"] = jnp.stack(bo)
    params["w1"] = jnp.stack(w1).astype(jnp.bfloat16)
    params["b1"] = jnp.stack(b1)
    params["w2"] = jnp.stack(w2).astype(jnp.bfloat16)
    params["b2"] = jnp.stack(b2)
    params["ln1_g"] = jnp.stack(ln1g); params["ln1_b"] = jnp.stack(ln1b)
    params["ln2_g"] = jnp.stack(ln2g); params["ln2_b"] = jnp.stack(ln2b)

    feat_dim = D * S
    cls_out_pad = ((classnum + 127) // 128) * 128
    cw1, cb1 = _dense_init(keys[1 + n_layers], feat_dim, cls_hidden)
    cw2, cb2 = _dense_init(keys[2 + n_layers], cls_hidden, classnum)
    w1p = jnp.zeros((feat_dim, cls_hidden_pad), jnp.float32).at[:, :cls_hidden].set(cw1)
    b1p = jnp.zeros((1, cls_hidden_pad), jnp.float32).at[:, :cls_hidden].set(cb1)
    w2p = jnp.zeros((cls_hidden_pad, cls_out_pad), jnp.float32).at[:cls_hidden, :classnum].set(cw2)
    b2p = jnp.zeros((1, cls_out_pad), jnp.float32).at[:, :classnum].set(cb2)
    params["cls_w1"] = w1p.astype(jnp.bfloat16)
    params["cls_b1"] = b1p
    params["cls_w2"] = w2p.astype(jnp.bfloat16)
    params["cls_b2"] = b2p
    return params


# ----------------------------------------------------------------------------
# Forward pass
# ----------------------------------------------------------------------------

def _pick_batch_block(B, S, target_rows=512):
    """Largest Bb dividing B with Bb*S rows (multiple of 8 unless Bb==B)."""
    best = B
    upper = min(B, max(1, target_rows // max(S, 1)))
    for bb in range(upper, 0, -1):
        if B % bb == 0 and ((bb * S) % 8 == 0 or bb == B):
            best = bb
            break
    return best


def transformer_forward(params, src, *, n_head, patchnum, classnum):
    B, C, L = src.shape
    S = patchnum
    patch_len = L // S
    D = params["embed_w"].shape[1]
    n_layers = params["wqkv"].shape[0]

    # (B, C, L) -> (B*S, C*patch_len) patches (single host-side rearrange), bf16
    xp = (src.reshape(B, C, S, patch_len)
             .transpose(0, 2, 1, 3)
             .reshape(B * S, C * patch_len)
             .astype(jnp.bfloat16))

    Bb = _pick_batch_block(B, S)
    enc = encoder_forward(xp, params, B=B, S=S, D=D, n_head=n_head,
                          n_layers=n_layers, Bb=Bb)        # (B*S, D) bf16

    feats = enc.reshape(B, S * D)
    logits_pad = classifier(feats, params["cls_w1"], params["cls_b1"],
                            params["cls_w2"], params["cls_b2"])
    return logits_pad[:, :classnum]


# ----------------------------------------------------------------------------
if __name__ == "__main__":
    # small deterministic config
    B = 2
    in_channels = 4
    signallength = 64
    patchnum = 16
    d_model = 32
    n_head = 4
    ffn_hidden = 64
    n_layers = 2
    classnum = 10

    key = jax.random.PRNGKey(0)
    pkey, xkey = jax.random.split(key)

    params = init_params(
        pkey, d_model=d_model, n_head=n_head, ffn_hidden=ffn_hidden,
        n_layers=n_layers, in_channels=in_channels, patchnum=patchnum,
        signallength=signallength, classnum=classnum)

    src = jax.random.normal(xkey, (B, in_channels, signallength), jnp.float32)

    fwd = jax.jit(functools.partial(transformer_forward, n_head=n_head,
                                    patchnum=patchnum, classnum=classnum))
    logits = jax.block_until_ready(fwd(params, src))
    assert logits.shape == (B, classnum)
    assert bool(jnp.all(jnp.isfinite(logits)))
    print("KERNEL_OK")
</pallas_src>

<mosaic_0001>
module attributes {stable_mosaic.version = 11 : i64} {
  func.func @_encoder_kernel(%arg0: i32, %arg1: i32, %arg2: memref<32x16xbf16, #tpu.memory_space<vmem>>, %arg3: memref<16x32xbf16, #tpu.memory_space<vmem>>, %arg4: memref<16x32xf32, #tpu.memory_space<vmem>>, %arg5: memref<1x32x96xbf16, #tpu.memory_space<vmem>>, %arg6: memref<1x1x96xf32, #tpu.memory_space<vmem>>, %arg7: memref<1x32x32xbf16, #tpu.memory_space<vmem>>, %arg8: memref<1x1x32xf32, #tpu.memory_space<vmem>>, %arg9: memref<1x1x32xf32, #tpu.memory_space<vmem>>, %arg10: memref<1x1x32xf32, #tpu.memory_space<vmem>>, %arg11: memref<1x32x64xbf16, #tpu.memory_space<vmem>>, %arg12: memref<1x1x64xf32, #tpu.memory_space<vmem>>, %arg13: memref<1x64x32xbf16, #tpu.memory_space<vmem>>, %arg14: memref<1x1x32xf32, #tpu.memory_space<vmem>>, %arg15: memref<1x1x32xf32, #tpu.memory_space<vmem>>, %arg16: memref<1x1x32xf32, #tpu.memory_space<vmem>>, %arg17: memref<32x32xbf16, #tpu.memory_space<vmem>>, %arg18: memref<32x32xf32, #tpu.memory_space<vmem>>) attributes {dimension_semantics = [#tpu.dimension_semantics<parallel>, #tpu.dimension_semantics<arbitrary>], iteration_bounds = array<i64: 1, 2>, scalar_prefetch = 0 : i64, scratch_operands = 1 : i64, tpu.core_type = #tpu.core_type<tc>, window_params = [{transform_indices = @transform_0, window_bounds = array<i64: 32, 16>}, {pipeline_mode = #tpu.pipeline_mode<synchronous>, transform_indices = @transform_1, window_bounds = array<i64: 16, 32>}, {pipeline_mode = #tpu.pipeline_mode<synchronous>, transform_indices = @transform_2, window_bounds = array<i64: 16, 32>}, {transform_indices = @transform_3, window_bounds = array<i64: 1, 32, 96>}, {transform_indices = @transform_4, window_bounds = array<i64: 1, 1, 96>}, {transform_indices = @transform_5, window_bounds = array<i64: 1, 32, 32>}, {transform_indices = @transform_6, window_bounds = array<i64: 1, 1, 32>}, {transform_indices = @transform_7, window_bounds = array<i64: 1, 1, 32>}, {transform_indices = @transform_8, window_bounds = array<i64: 1, 1, 32>}, {transform_indices = @transform_9, window_bounds = array<i64: 1, 32, 64>}, {transform_indices = @transform_10, window_bounds = array<i64: 1, 1, 64>}, {transform_indices = @transform_11, window_bounds = array<i64: 1, 64, 32>}, {transform_indices = @transform_12, window_bounds = array<i64: 1, 1, 32>}, {transform_indices = @transform_13, window_bounds = array<i64: 1, 1, 32>}, {transform_indices = @transform_14, window_bounds = array<i64: 1, 1, 32>}, {transform_indices = @transform_15, window_bounds = array<i64: 32, 32>}]} {
    %c0_i32 = arith.constant 0 : i32
    %0 = arith.cmpi eq, %arg1, %c0_i32 : i32
    %1 = arith.extui %0 : i1 to i32
    %c0_i32_0 = arith.constant 0 : i32
    %2 = arith.cmpi ne, %1, %c0_i32_0 : i32
    scf.if %2 {
      %c0_79 = arith.constant 0 : index
      %c0_80 = arith.constant 0 : index
      %197 = vector.load %arg2[%c0_79, %c0_80] : memref<32x16xbf16, #tpu.memory_space<vmem>>, vector<32x16xbf16>
      %c0_81 = arith.constant 0 : index
      %c0_82 = arith.constant 0 : index
      %198 = vector.load %arg3[%c0_81, %c0_82] : memref<16x32xbf16, #tpu.memory_space<vmem>>, vector<16x32xbf16>
      %cst_83 = arith.constant dense<0.000000e+00> : vector<32x32xf32>
      %199 = tpu.matmul %197, %198, %cst_83 {dimension_numbers = #tpu.dot_dimension_numbers<[1], [0], [0], [1], [0, 0, 1, 1], [], []>} : vector<32x16xbf16>, vector<16x32xbf16>, vector<32x32xf32> -> vector<32x32xf32>
      %200 = vector.shape_cast %199 : vector<32x32xf32> to vector<2x16x32xf32>
      %c0_84 = arith.constant 0 : index
      %c0_85 = arith.constant 0 : index
      %201 = vector.load %arg4[%c0_84, %c0_85] : memref<16x32xf32, #tpu.memory_space<vmem>>, vector<16x32xf32>
      %202 = vector.shape_cast %201 : vector<16x32xf32> to vector<1x16x32xf32>
      %203 = vector.broadcast %202 : vector<1x16x32xf32> to vector<2x16x32xf32>
      %204 = arith.addf %200, %203 : vector<2x16x32xf32>
      %205 = vector.shape_cast %204 : vector<2x16x32xf32> to vector<32x32xf32>
      %c0_86 = arith.constant 0 : index
      %c0_87 = arith.constant 0 : index
      %206 = vector.load %arg18[%c0_86, %c0_87] : memref<32x32xf32, #tpu.memory_space<vmem>>, vector<32x32xf32>
      tpu.vector_store %arg18[%c0_86, %c0_87], %205 {strides = array<i32>} : memref<32x32xf32, #tpu.memory_space<vmem>>, vector<32x32xf32>,
    } else {
    }
    %c0 = arith.constant 0 : index
    %c0_1 = arith.constant 0 : index
    %3 = vector.load %arg18[%c0, %c0_1] : memref<32x32xf32, #tpu.memory_space<vmem>>, vector<32x32xf32>
    %4 = arith.truncf %3 : vector<32x32xf32> to vector<32x32xbf16>
    %c0_2 = arith.constant 0 : index
    %c0_3 = arith.constant 0 : index
    %c0_4 = arith.constant 0 : index
    %5 = vector.load %arg5[%c0_2, %c0_3, %c0_4] : memref<1x32x96xbf16, #tpu.memory_space<vmem>>, vector<1x32x96xbf16>
    %6 = vector.shape_cast %5 : vector<1x32x96xbf16> to vector<32x96xbf16>
    %cst = arith.constant dense<0.000000e+00> : vector<32x96xf32>
    %7 = tpu.matmul %4, %6, %cst {dimension_numbers = #tpu.dot_dimension_numbers<[1], [0], [0], [1], [0, 0, 1, 1], [], []>} : vector<32x32xbf16>, vector<32x96xbf16>, vector<32x96xf32> -> vector<32x96xf32>
    %c0_5 = arith.constant 0 : index
    %c0_6 = arith.constant 0 : index
    %c0_7 = arith.constant 0 : index
    %8 = vector.load %arg6[%c0_5, %c0_6, %c0_7] : memref<1x1x96xf32, #tpu.memory_space<vmem>>, vector<1x1x96xf32>
    %9 = vector.shape_cast %8 : vector<1x1x96xf32> to vector<1x96xf32>
    %10 = vector.broadcast %9 : vector<1x96xf32> to vector<32x96xf32>
    %11 = arith.addf %7, %10 : vector<32x96xf32>
    %12 = vector.shape_cast %11 : vector<32x96xf32> to vector<2x16x96xf32>
    %c0_8 = arith.constant 0 : index
    %c0_9 = arith.constant 0 : index
    %c0_10 = arith.constant 0 : index
    %13 = vector.load %arg7[%c0_8, %c0_9, %c0_10] : memref<1x32x32xbf16, #tpu.memory_space<vmem>>, vector<1x32x32xbf16>
    %14 = vector.shape_cast %13 : vector<1x32x32xbf16> to vector<32x32xbf16>
    %cst_11 = arith.constant 0.000000e+00 : f32
    %15 = vector.broadcast %cst_11 : f32 to vector<2x16x32xf32>
    %16 = vector.extract_strided_slice %12 {offsets = [0, 0, 0], sizes = [2, 16, 8], strides = [1, 1, 1]} : vector<2x16x96xf32> to vector<2x16x8xf32>
    %17 = arith.truncf %16 : vector<2x16x8xf32> to vector<2x16x8xbf16>
    %18 = vector.extract_strided_slice %12 {offsets = [0, 0, 32], sizes = [2, 16, 8], strides = [1, 1, 1]} : vector<2x16x96xf32> to vector<2x16x8xf32>
    %19 = arith.truncf %18 : vector<2x16x8xf32> to vector<2x16x8xbf16>
    %20 = vector.extract_strided_slice %12 {offsets = [0, 0, 64], sizes = [2, 16, 8], strides = [1, 1, 1]} : vector<2x16x96xf32> to vector<2x16x8xf32>
    %21 = arith.truncf %20 : vector<2x16x8xf32> to vector<2x16x8xbf16>
    "tpu.trace_start"() <{level = 10 : i32, message = "bqd,bkd->bqk"}> : () -> ()
    %cst_12 = arith.constant dense<0.000000e+00> : vector<2x16x16xf32>
    %22 = tpu.matmul %17, %19, %cst_12 {dimension_numbers = #tpu.dot_dimension_numbers<[2], [2], [1], [1], [0, 0, 0, 1, 1, 1], [0], [0]>} : vector<2x16x8xbf16>, vector<2x16x8xbf16>, vector<2x16x16xf32> -> vector<2x16x16xf32>
    "tpu.trace_stop"() : () -> ()
    %cst_13 = arith.constant 0.353553385 : f32
    %23 = vector.broadcast %cst_13 : f32 to vector<2x16x16xf32>
    %24 = arith.mulf %22, %23 : vector<2x16x16xf32>
    %cst_14 = arith.constant dense<0xFF800000> : vector<2x16xf32>
    %25 = vector.multi_reduction <maximumf>, %24, %cst_14 [2] : vector<2x16x16xf32> to vector<2x16xf32>
    %26 = vector.shape_cast %25 : vector<2x16xf32> to vector<2x16x1xf32>
    %27 = vector.broadcast %26 : vector<2x16x1xf32> to vector<2x16x16xf32>
    %28 = arith.subf %24, %27 : vector<2x16x16xf32>
    %29 = math.exp %28 : vector<2x16x16xf32>
    %cst_15 = arith.constant dense<0.000000e+00> : vector<2x16xf32>
    %30 = vector.multi_reduction <add>, %29, %cst_15 [2] : vector<2x16x16xf32> to vector<2x16xf32>
    %31 = vector.shape_cast %30 : vector<2x16xf32> to vector<2x16x1xf32>
    %32 = tpu.reciprocal %31 {approx = true} : vector<2x16x1xf32> -> vector<2x16x1xf32>
    %33 = vector.broadcast %32 : vector<2x16x1xf32> to vector<2x16x16xf32>
    %34 = arith.mulf %29, %33 : vector<2x16x16xf32>
    %35 = arith.truncf %34 : vector<2x16x16xf32> to vector<2x16x16xbf16>
    "tpu.trace_start"() <{level = 10 : i32, message = "bqk,bkd->bqd"}> : () -> ()
    %cst_16 = arith.constant dense<0.000000e+00> : vector<2x16x8xf32>
    %36 = tpu.matmul %35, %21, %cst_16 {dimension_numbers = #tpu.dot_dimension_numbers<[2], [1], [1], [2], [0, 0, 0, 1, 1, 2], [0], [0]>} : vector<2x16x16xbf16>, vector<2x16x8xbf16>, vector<2x16x8xf32> -> vector<2x16x8xf32>
    "tpu.trace_stop"() : () -> ()
    %37 = arith.truncf %36 : vector<2x16x8xf32> to vector<2x16x8xbf16>
    %38 = vector.extract_strided_slice %14 {offsets = [0, 0], sizes = [8, 32], strides = [1, 1]} : vector<32x32xbf16> to vector<8x32xbf16>
    "tpu.trace_start"() <{level = 10 : i32, message = "bqd,de->bqe"}> : () -> ()
    %cst_17 = arith.constant dense<0.000000e+00> : vector<2x16x32xf32>
    %39 = tpu.matmul %37, %38, %cst_17 {dimension_numbers = #tpu.dot_dimension_numbers<[2], [0], [0, 1], [1], [0, 0, 0, 1, 1, 1], [], []>} : vector<2x16x8xbf16>, vector<8x32xbf16>, vector<2x16x32xf32> -> vector<2x16x32xf32>
    "tpu.trace_stop"() : () -> ()
    %40 = arith.addf %15, %39 : vector<2x16x32xf32>
    %41 = vector.extract_strided_slice %12 {offsets = [0, 0, 8], sizes = [2, 16, 8], strides = [1, 1, 1]} : vector<2x16x96xf32> to vector<2x16x8xf32>
    %42 = arith.truncf %41 : vector<2x16x8xf32> to vector<2x16x8xbf16>
    %43 = vector.extract_strided_slice %12 {offsets = [0, 0, 40], sizes = [2, 16, 8], strides = [1, 1, 1]} : vector<2x16x96xf32> to vector<2x16x8xf32>
    %44 = arith.truncf %43 : vector<2x16x8xf32> to vector<2x16x8xbf16>
    %45 = vector.extract_strided_slice %12 {offsets = [0, 0, 72], sizes = [2, 16, 8], strides = [1, 1, 1]} : vector<2x16x96xf32> to vector<2x16x8xf32>
    %46 = arith.truncf %45 : vector<2x16x8xf32> to vector<2x16x8xbf16>
    "tpu.trace_start"() <{level = 10 : i32, message = "bqd,bkd->bqk"}> : () -> ()
    %cst_18 = arith.constant dense<0.000000e+00> : vector<2x16x16xf32>
    %47 = tpu.matmul %42, %44, %cst_18 {dimension_numbers = #tpu.dot_dimension_numbers<[2], [2], [1], [1], [0, 0, 0, 1, 1, 1], [0], [0]>} : vector<2x16x8xbf16>, vector<2x16x8xbf16>, vector<2x16x16xf32> -> vector<2x16x16xf32>
    "tpu.trace_stop"() : () -> ()
    %cst_19 = arith.constant 0.353553385 : f32
    %48 = vector.broadcast %cst_19 : f32 to vector<2x16x16xf32>
    %49 = arith.mulf %47, %48 : vector<2x16x16xf32>
    %cst_20 = arith.constant dense<0xFF800000> : vector<2x16xf32>
    %50 = vector.multi_reduction <maximumf>, %49, %cst_20 [2] : vector<2x16x16xf32> to vector<2x16xf32>
    %51 = vector.shape_cast %50 : vector<2x16xf32> to vector<2x16x1xf32>
    %52 = vector.broadcast %51 : vector<2x16x1xf32> to vector<2x16x16xf32>
    %53 = arith.subf %49, %52 : vector<2x16x16xf32>
    %54 = math.exp %53 : vector<2x16x16xf32>
    %cst_21 = arith.constant dense<0.000000e+00> : vector<2x16xf32>
    %55 = vector.multi_reduction <add>, %54, %cst_21 [2] : vector<2x16x16xf32> to vector<2x16xf32>
    %56 = vector.shape_cast %55 : vector<2x16xf32> to vector<2x16x1xf32>
    %57 = tpu.reciprocal %56 {approx = true} : vector<2x16x1xf32> -> vector<2x16x1xf32>
    %58 = vector.broadcast %57 : vector<2x16x1xf32> to vector<2x16x16xf32>
    %59 = arith.mulf %54, %58 : vector<2x16x16xf32>
    %60 = arith.truncf %59 : vector<2x16x16xf32> to vector<2x16x16xbf16>
    "tpu.trace_start"() <{level = 10 : i32, message = "bqk,bkd->bqd"}> : () -> ()
    %cst_22 = arith.constant dense<0.000000e+00> : vector<2x16x8xf32>
    %61 = tpu.matmul %60, %46, %cst_22 {dimension_numbers = #tpu.dot_dimension_numbers<[2], [1], [1], [2], [0, 0, 0, 1, 1, 2], [0], [0]>} : vector<2x16x16xbf16>, vector<2x16x8xbf16>, vector<2x16x8xf32> -> vector<2x16x8xf32>
    "tpu.trace_stop"() : () -> ()
    %62 = arith.truncf %61 : vector<2x16x8xf32> to vector<2x16x8xbf16>
    %63 = vector.extract_strided_slice %14 {offsets = [8, 0], sizes = [8, 32], strides = [1, 1]} : vector<32x32xbf16> to vector<8x32xbf16>
    "tpu.trace_start"() <{level = 10 : i32, message = "bqd,de->bqe"}> : () -> ()
    %cst_23 = arith.constant dense<0.000000e+00> : vector<2x16x32xf32>
    %64 = tpu.matmul %62, %63, %cst_23 {dimension_numbers = #tpu.dot_dimension_numbers<[2], [0], [0, 1], [1], [0, 0, 0, 1, 1, 1], [], []>} : vector<2x16x8xbf16>, vector<8x32xbf16>, vector<2x16x32xf32> -> vector<2x16x32xf32>
    "tpu.trace_stop"() : () -> ()
    %65 = arith.addf %40, %64 : vector<2x16x32xf32>
    %66 = vector.extract_strided_slice %12 {offsets = [0, 0, 16], sizes = [2, 16, 8], strides = [1, 1, 1]} : vector<2x16x96xf32> to vector<2x16x8xf32>
    %67 = arith.truncf %66 : vector<2x16x8xf32> to vector<2x16x8xbf16>
    %68 = vector.extract_strided_slice %12 {offsets = [0, 0, 48], sizes = [2, 16, 8], strides = [1, 1, 1]} : vector<2x16x96xf32> to vector<2x16x8xf32>
    %69 = arith.truncf %68 : vector<2x16x8xf32> to vector<2x16x8xbf16>
    %70 = vector.extract_strided_slice %12 {offsets = [0, 0, 80], sizes = [2, 16, 8], strides = [1, 1, 1]} : vector<2x16x96xf32> to vector<2x16x8xf32>
    %71 = arith.truncf %70 : vector<2x16x8xf32> to vector<2x16x8xbf16>
    "tpu.trace_start"() <{level = 10 : i32, message = "bqd,bkd->bqk"}> : () -> ()
    %cst_24 = arith.constant dense<0.000000e+00> : vector<2x16x16xf32>
    %72 = tpu.matmul %67, %69, %cst_24 {dimension_numbers = #tpu.dot_dimension_numbers<[2], [2], [1], [1], [0, 0, 0, 1, 1, 1], [0], [0]>} : vector<2x16x8xbf16>, vector<2x16x8xbf16>, vector<2x16x16xf32> -> vector<2x16x16xf32>
    "tpu.trace_stop"() : () -> ()
    %cst_25 = arith.constant 0.353553385 : f32
    %73 = vector.broadcast %cst_25 : f32 to vector<2x16x16xf32>
    %74 = arith.mulf %72, %73 : vector<2x16x16xf32>
    %cst_26 = arith.constant dense<0xFF800000> : vector<2x16xf32>
    %75 = vector.multi_reduction <maximumf>, %74, %cst_26 [2] : vector<2x16x16xf32> to vector<2x16xf32>
    %76 = vector.shape_cast %75 : vector<2x16xf32> to vector<2x16x1xf32>
    %77 = vector.broadcast %76 : vector<2x16x1xf32> to vector<2x16x16xf32>
    %78 = arith.subf %74, %77 : vector<2x16x16xf32>
    %79 = math.exp %78 : vector<2x16x16xf32>
    %cst_27 = arith.constant dense<0.000000e+00> : vector<2x16xf32>
    %80 = vector.multi_reduction <add>, %79, %cst_27 [2] : vector<2x16x16xf32> to vector<2x16xf32>
    %81 = vector.shape_cast %80 : vector<2x16xf32> to vector<2x16x1xf32>
    %82 = tpu.reciprocal %81 {approx = true} : vector<2x16x1xf32> -> vector<2x16x1xf32>
    %83 = vector.broadcast %82 : vector<2x16x1xf32> to vector<2x16x16xf32>
    %84 = arith.mulf %79, %83 : vector<2x16x16xf32>
    %85 = arith.truncf %84 : vector<2x16x16xf32> to vector<2x16x16xbf16>
    "tpu.trace_start"() <{level = 10 : i32, message = "bqk,bkd->bqd"}> : () -> ()
    %cst_28 = arith.constant dense<0.000000e+00> : vector<2x16x8xf32>
    %86 = tpu.matmul %85, %71, %cst_28 {dimension_numbers = #tpu.dot_dimension_numbers<[2], [1], [1], [2], [0, 0, 0, 1, 1, 2], [0], [0]>} : vector<2x16x16xbf16>, vector<2x16x8xbf16>, vector<2x16x8xf32> -> vector<2x16x8xf32>
    "tpu.trace_stop"() : () -> ()
    %87 = arith.truncf %86 : vector<2x16x8xf32> to vector<2x16x8xbf16>
    %88 = vector.extract_strided_slice %14 {offsets = [16, 0], sizes = [8, 32], strides = [1, 1]} : vector<32x32xbf16> to vector<8x32xbf16>
    "tpu.trace_start"() <{level = 10 : i32, message = "bqd,de->bqe"}> : () -> ()
    %cst_29 = arith.constant dense<0.000000e+00> : vector<2x16x32xf32>
    %89 = tpu.matmul %87, %88, %cst_29 {dimension_numbers = #tpu.dot_dimension_numbers<[2], [0], [0, 1], [1], [0, 0, 0, 1, 1, 1], [], []>} : vector<2x16x8xbf16>, vector<8x32xbf16>, vector<2x16x32xf32> -> vector<2x16x32xf32>
    "tpu.trace_stop"() : () -> ()
    %90 = arith.addf %65, %89 : vector<2x16x32xf32>
    %91 = vector.extract_strided_slice %12 {offsets = [0, 0, 24], sizes = [2, 16, 8], strides = [1, 1, 1]} : vector<2x16x96xf32> to vector<2x16x8xf32>
    %92 = arith.truncf %91 : vector<2x16x8xf32> to vector<2x16x8xbf16>
    %93 = vector.extract_strided_slice %12 {offsets = [0, 0, 56], sizes = [2, 16, 8], strides = [1, 1, 1]} : vector<2x16x96xf32> to vector<2x16x8xf32>
    %94 = arith.truncf %93 : vector<2x16x8xf32> to vector<2x16x8xbf16>
    %95 = vector.extract_strided_slice %12 {offsets = [0, 0, 88], sizes = [2, 16, 8], strides = [1, 1, 1]} : vector<2x16x96xf32> to vector<2x16x8xf32>
    %96 = arith.truncf %95 : vector<2x16x8xf32> to vector<2x16x8xbf16>
    "tpu.trace_start"() <{level = 10 : i32, message = "bqd,bkd->bqk"}> : () -> ()
    %cst_30 = arith.constant dense<0.000000e+00> : vector<2x16x16xf32>
    %97 = tpu.matmul %92, %94, %cst_30 {dimension_numbers = #tpu.dot_dimension_numbers<[2], [2], [1], [1], [0, 0, 0, 1, 1, 1], [0], [0]>} : vector<2x16x8xbf16>, vector<2x16x8xbf16>, vector<2x16x16xf32> -> vector<2x16x16xf32>
    "tpu.trace_stop"() : () -> ()
    %cst_31 = arith.constant 0.353553385 : f32
    %98 = vector.broadcast %cst_31 : f32 to vector<2x16x16xf32>
    %99 = arith.mulf %97, %98 : vector<2x16x16xf32>
    %cst_32 = arith.constant dense<0xFF800000> : vector<2x16xf32>
    %100 = vector.multi_reduction <maximumf>, %99, %cst_32 [2] : vector<2x16x16xf32> to vector<2x16xf32>
    %101 = vector.shape_cast %100 : vector<2x16xf32> to vector<2x16x1xf32>
    %102 = vector.broadcast %101 : vector<2x16x1xf32> to vector<2x16x16xf32>
    %103 = arith.subf %99, %102 : vector<2x16x16xf32>
    %104 = math.exp %103 : vector<2x16x16xf32>
    %cst_33 = arith.constant dense<0.000000e+00> : vector<2x16xf32>
    %105 = vector.multi_reduction <add>, %104, %cst_33 [2] : vector<2x16x16xf32> to vector<2x16xf32>
    %106 = vector.shape_cast %105 : vector<2x16xf32> to vector<2x16x1xf32>
    %107 = tpu.reciprocal %106 {approx = true} : vector<2x16x1xf32> -> vector<2x16x1xf32>
    %108 = vector.broadcast %107 : vector<2x16x1xf32> to vector<2x16x16xf32>
    %109 = arith.mulf %104, %108 : vector<2x16x16xf32>
    %110 = arith.truncf %109 : vector<2x16x16xf32> to vector<2x16x16xbf16>
    "tpu.trace_start"() <{level = 10 : i32, message = "bqk,bkd->bqd"}> : () -> ()
    %cst_34 = arith.constant dense<0.000000e+00> : vector<2x16x8xf32>
    %111 = tpu.matmul %110, %96, %cst_34 {dimension_numbers = #tpu.dot_dimension_numbers<[2], [1], [1], [2], [0, 0, 0, 1, 1, 2], [0], [0]>} : vector<2x16x16xbf16>, vector<2x16x8xbf16>, vector<2x16x8xf32> -> vector<2x16x8xf32>
    "tpu.trace_stop"() : () -> ()
    %112 = arith.truncf %111 : vector<2x16x8xf32> to vector<2x16x8xbf16>
    %113 = vector.extract_strided_slice %14 {offsets = [24, 0], sizes = [8, 32], strides = [1, 1]} : vector<32x32xbf16> to vector<8x32xbf16>
    "tpu.trace_start"() <{level = 10 : i32, message = "bqd,de->bqe"}> : () -> ()
    %cst_35 = arith.constant dense<0.000000e+00> : vector<2x16x32xf32>
    %114 = tpu.matmul %112, %113, %cst_35 {dimension_numbers = #tpu.dot_dimension_numbers<[2], [0], [0, 1], [1], [0, 0, 0, 1, 1, 1], [], []>} : vector<2x16x8xbf16>, vector<8x32xbf16>, vector<2x16x32xf32> -> vector<2x16x32xf32>
    "tpu.trace_stop"() : () -> ()
    %115 = arith.addf %90, %114 : vector<2x16x32xf32>
    %116 = vector.shape_cast %115 : vector<2x16x32xf32> to vector<32x32xf32>
    %c0_36 = arith.constant 0 : index
    %c0_37 = arith.constant 0 : index
    %c0_38 = arith.constant 0 : index
    %117 = vector.load %arg8[%c0_36, %c0_37, %c0_38] : memref<1x1x32xf32, #tpu.memory_space<vmem>>, vector<1x1x32xf32>
    %118 = vector.shape_cast %117 : vector<1x1x32xf32> to vector<1x32xf32>
    %119 = vector.broadcast %118 : vector<1x32xf32> to vector<32x32xf32>
    %120 = arith.addf %116, %119 : vector<32x32xf32>
    %121 = arith.addf %120, %3 : vector<32x32xf32>
    %cst_39 = arith.constant dense<0.000000e+00> : vector<32xf32>
    %122 = vector.multi_reduction <add>, %121, %cst_39 [1] : vector<32x32xf32> to vector<32xf32>
    %123 = vector.shape_cast %122 : vector<32xf32> to vector<32x1xf32>
    %cst_40 = arith.constant 3.200000e+01 : f32
    %124 = vector.broadcast %cst_40 : f32 to vector<32x1xf32>
    %125 = arith.divf %123, %124 : vector<32x1xf32>
    %126 = vector.broadcast %125 : vector<32x1xf32> to vector<32x32xf32>
    %127 = arith.subf %121, %126 : vector<32x32xf32>
    %128 = arith.mulf %127, %127 : vector<32x32xf32>
    %cst_41 = arith.constant dense<0.000000e+00> : vector<32xf32>
    %129 = vector.multi_reduction <add>, %128, %cst_41 [1] : vector<32x32xf32> to vector<32xf32>
    %130 = vector.shape_cast %129 : vector<32xf32> to vector<32x1xf32>
    %cst_42 = arith.constant 3.200000e+01 : f32
    %131 = vector.broadcast %cst_42 : f32 to vector<32x1xf32>
    %132 = arith.divf %130, %131 : vector<32x1xf32>
    %133 = vector.broadcast %125 : vector<32x1xf32> to vector<32x32xf32>
    %134 = arith.subf %121, %133 : vector<32x32xf32>
    %cst_43 = arith.constant 9.99999974E-6 : f32
    %135 = vector.broadcast %cst_43 : f32 to vector<32x1xf32>
    %136 = arith.addf %132, %135 : vector<32x1xf32>
    %137 = math.rsqrt %136 : vector<32x1xf32>
    %138 = vector.broadcast %137 : vector<32x1xf32> to vector<32x32xf32>
    %139 = arith.mulf %134, %138 : vector<32x32xf32>
    %c0_44 = arith.constant 0 : index
    %c0_45 = arith.constant 0 : index
    %c0_46 = arith.constant 0 : index
    %140 = vector.load %arg9[%c0_44, %c0_45, %c0_46] : memref<1x1x32xf32, #tpu.memory_space<vmem>>, vector<1x1x32xf32>
    %141 = vector.shape_cast %140 : vector<1x1x32xf32> to vector<1x32xf32>
    %142 = vector.broadcast %141 : vector<1x32xf32> to vector<32x32xf32>
    %143 = arith.mulf %139, %142 : vector<32x32xf32>
    %c0_47 = arith.constant 0 : index
    %c0_48 = arith.constant 0 : index
    %c0_49 = arith.constant 0 : index
    %144 = vector.load %arg10[%c0_47, %c0_48, %c0_49] : memref<1x1x32xf32, #tpu.memory_space<vmem>>, vector<1x1x32xf32>
    %145 = vector.shape_cast %144 : vector<1x1x32xf32> to vector<1x32xf32>
    %146 = vector.broadcast %145 : vector<1x32xf32> to vector<32x32xf32>
    %147 = arith.addf %143, %146 : vector<32x32xf32>
    %148 = arith.truncf %147 : vector<32x32xf32> to vector<32x32xbf16>
    %c0_50 = arith.constant 0 : index
    %c0_51 = arith.constant 0 : index
    %c0_52 = arith.constant 0 : index
    %149 = vector.load %arg11[%c0_50, %c0_51, %c0_52] : memref<1x32x64xbf16, #tpu.memory_space<vmem>>, vector<1x32x64xbf16>
    %150 = vector.shape_cast %149 : vector<1x32x64xbf16> to vector<32x64xbf16>
    %cst_53 = arith.constant dense<0.000000e+00> : vector<32x64xf32>
    %151 = tpu.matmul %148, %150, %cst_53 {dimension_numbers = #tpu.dot_dimension_numbers<[1], [0], [0], [1], [0, 0, 1, 1], [], []>} : vector<32x32xbf16>, vector<32x64xbf16>, vector<32x64xf32> -> vector<32x64xf32>
    %c0_54 = arith.constant 0 : index
    %c0_55 = arith.constant 0 : index
    %c0_56 = arith.constant 0 : index
    %152 = vector.load %arg12[%c0_54, %c0_55, %c0_56] : memref<1x1x64xf32, #tpu.memory_space<vmem>>, vector<1x1x64xf32>
    %153 = vector.shape_cast %152 : vector<1x1x64xf32> to vector<1x64xf32>
    %154 = vector.broadcast %153 : vector<1x64xf32> to vector<32x64xf32>
    %155 = arith.addf %151, %154 : vector<32x64xf32>
    %cst_57 = arith.constant 0.000000e+00 : f32
    %156 = vector.broadcast %cst_57 : f32 to vector<32x64xf32>
    %157 = arith.maximumf %155, %156 : vector<32x64xf32>
    %158 = arith.truncf %157 : vector<32x64xf32> to vector<32x64xbf16>
    %c0_58 = arith.constant 0 : index
    %c0_59 = arith.constant 0 : index
    %c0_60 = arith.constant 0 : index
    %159 = vector.load %arg13[%c0_58, %c0_59, %c0_60] : memref<1x64x32xbf16, #tpu.memory_space<vmem>>, vector<1x64x32xbf16>
    %160 = vector.shape_cast %159 : vector<1x64x32xbf16> to vector<64x32xbf16>
    %cst_61 = arith.constant dense<0.000000e+00> : vector<32x32xf32>
    %161 = tpu.matmul %158, %160, %cst_61 {dimension_numbers = #tpu.dot_dimension_numbers<[1], [0], [0], [1], [0, 0, 1, 1], [], []>} : vector<32x64xbf16>, vector<64x32xbf16>, vector<32x32xf32> -> vector<32x32xf32>
    %c0_62 = arith.constant 0 : index
    %c0_63 = arith.constant 0 : index
    %c0_64 = arith.constant 0 : index
    %162 = vector.load %arg14[%c0_62, %c0_63, %c0_64] : memref<1x1x32xf32, #tpu.memory_space<vmem>>, vector<1x1x32xf32>
    %163 = vector.shape_cast %162 : vector<1x1x32xf32> to vector<1x32xf32>
    %164 = vector.broadcast %163 : vector<1x32xf32> to vector<32x32xf32>
    %165 = arith.addf %161, %164 : vector<32x32xf32>
    %166 = arith.addf %165, %147 : vector<32x32xf32>
    %cst_65 = arith.constant dense<0.000000e+00> : vector<32xf32>
    %167 = vector.multi_reduction <add>, %166, %cst_65 [1] : vector<32x32xf32> to vector<32xf32>
    %168 = vector.shape_cast %167 : vector<32xf32> to vector<32x1xf32>
    %cst_66 = arith.constant 3.200000e+01 : f32
    %169 = vector.broadcast %cst_66 : f32 to vector<32x1xf32>
    %170 = arith.divf %168, %169 : vector<32x1xf32>
    %171 = vector.broadcast %170 : vector<32x1xf32> to vector<32x32xf32>
    %172 = arith.subf %166, %171 : vector<32x32xf32>
    %173 = arith.mulf %172, %172 : vector<32x32xf32>
    %cst_67 = arith.constant dense<0.000000e+00> : vector<32xf32>
    %174 = vector.multi_reduction <add>, %173, %cst_67 [1] : vector<32x32xf32> to vector<32xf32>
    %175 = vector.shape_cast %174 : vector<32xf32> to vector<32x1xf32>
    %cst_68 = arith.constant 3.200000e+01 : f32
    %176 = vector.broadcast %cst_68 : f32 to vector<32x1xf32>
    %177 = arith.divf %175, %176 : vector<32x1xf32>
    %178 = vector.broadcast %170 : vector<32x1xf32> to vector<32x32xf32>
    %179 = arith.subf %166, %178 : vector<32x32xf32>
    %cst_69 = arith.constant 9.99999974E-6 : f32
    %180 = vector.broadcast %cst_69 : f32 to vector<32x1xf32>
    %181 = arith.addf %177, %180 : vector<32x1xf32>
    %182 = math.rsqrt %181 : vector<32x1xf32>
    %183 = vector.broadcast %182 : vector<32x1xf32> to vector<32x32xf32>
    %184 = arith.mulf %179, %183 : vector<32x32xf32>
    %c0_70 = arith.constant 0 : index
    %c0_71 = arith.constant 0 : index
    %c0_72 = arith.constant 0 : index
    %185 = vector.load %arg15[%c0_70, %c0_71, %c0_72] : memref<1x1x32xf32, #tpu.memory_space<vmem>>, vector<1x1x32xf32>
    %186 = vector.shape_cast %185 : vector<1x1x32xf32> to vector<1x32xf32>
    %187 = vector.broadcast %186 : vector<1x32xf32> to vector<32x32xf32>
    %188 = arith.mulf %184, %187 : vector<32x32xf32>
    %c0_73 = arith.constant 0 : index
    %c0_74 = arith.constant 0 : index
    %c0_75 = arith.constant 0 : index
    %189 = vector.load %arg16[%c0_73, %c0_74, %c0_75] : memref<1x1x32xf32, #tpu.memory_space<vmem>>, vector<1x1x32xf32>
    %190 = vector.shape_cast %189 : vector<1x1x32xf32> to vector<1x32xf32>
    %191 = vector.broadcast %190 : vector<1x32xf32> to vector<32x32xf32>
    %192 = arith.addf %188, %191 : vector<32x32xf32>
    %c0_76 = arith.constant 0 : index
    %c0_77 = arith.constant 0 : index
    %193 = vector.load %arg18[%c0_76, %c0_77] : memref<32x32xf32, #tpu.memory_space<vmem>>, vector<32x32xf32>
    tpu.vector_store %arg18[%c0_76, %c0_77], %192 {strides = array<i32>} : memref<32x32xf32, #tpu.memory_space<vmem>>, vector<32x32xf32>,
    %c1_i32 = arith.constant 1 : i32
    %194 = arith.cmpi eq, %arg1, %c1_i32 : i32
    %195 = arith.extui %194 : i1 to i32
    %c0_i32_78 = arith.constant 0 : i32
    %196 = arith.cmpi ne, %195, %c0_i32_78 : i32
    scf.if %196 {
      %197 = arith.truncf %192 : vector<32x32xf32> to vector<32x32xbf16>
      %c0_79 = arith.constant 0 : index
      %c0_80 = arith.constant 0 : index
      %198 = vector.load %arg17[%c0_79, %c0_80] : memref<32x32xbf16, #tpu.memory_space<vmem>>, vector<32x32xbf16>
      tpu.vector_store %arg17[%c0_79, %c0_80], %197 {strides = array<i32>} : memref<32x32xbf16, #tpu.memory_space<vmem>>, vector<32x32xbf16>,
    } else {
    }
    return
  }
  func.func @transform_0(%arg0: i32, %arg1: i32) -> (i32, i32) {
    %c0_i32 = arith.constant 0 : i32
    %c0_i32_0 = arith.constant 0 : i32
    return %arg0, %c0_i32 : i32, i32
  }
  func.func @transform_1(%arg0: i32, %arg1: i32) -> (i32, i32) {
    %c0_i32 = arith.constant 0 : i32
    %c0_i32_0 = arith.constant 0 : i32
    %c0_i32_1 = arith.constant 0 : i32
    return %c0_i32, %c0_i32_0 : i32, i32
  }
  func.func @transform_2(%arg0: i32, %arg1: i32) -> (i32, i32) {
    %c0_i32 = arith.constant 0 : i32
    %c0_i32_0 = arith.constant 0 : i32
    %c0_i32_1 = arith.constant 0 : i32
    return %c0_i32, %c0_i32_0 : i32, i32
  }
  func.func @transform_3(%arg0: i32, %arg1: i32) -> (i32, i32, i32) {
    %c0_i32 = arith.constant 0 : i32
    %c0_i32_0 = arith.constant 0 : i32
    %c0_i32_1 = arith.constant 0 : i32
    return %arg1, %c0_i32, %c0_i32_0 : i32, i32, i32
  }
  func.func @transform_4(%arg0: i32, %arg1: i32) -> (i32, i32, i32) {
    %c0_i32 = arith.constant 0 : i32
    %c0_i32_0 = arith.constant 0 : i32
    %c0_i32_1 = arith.constant 0 : i32
    return %arg1, %c0_i32, %c0_i32_0 : i32, i32, i32
  }
  func.func @transform_5(%arg0: i32, %arg1: i32) -> (i32, i32, i32) {
    %c0_i32 = arith.constant 0 : i32
    %c0_i32_0 = arith.constant 0 : i32
    %c0_i32_1 = arith.constant 0 : i32
    return %arg1, %c0_i32, %c0_i32_0 : i32, i32, i32
  }
  func.func @transform_6(%arg0: i32, %arg1: i32) -> (i32, i32, i32) {
    %c0_i32 = arith.constant 0 : i32
    %c0_i32_0 = arith.constant 0 : i32
    %c0_i32_1 = arith.constant 0 : i32
    return %arg1, %c0_i32, %c0_i32_0 : i32, i32, i32
  }
  func.func @transform_7(%arg0: i32, %arg1: i32) -> (i32, i32, i32) {
    %c0_i32 = arith.constant 0 : i32
    %c0_i32_0 = arith.constant 0 : i32
    %c0_i32_1 = arith.constant 0 : i32
    return %arg1, %c0_i32, %c0_i32_0 : i32, i32, i32
  }
  func.func @transform_8(%arg0: i32, %arg1: i32) -> (i32, i32, i32) {
    %c0_i32 = arith.constant 0 : i32
    %c0_i32_0 = arith.constant 0 : i32
    %c0_i32_1 = arith.constant 0 : i32
    return %arg1, %c0_i32, %c0_i32_0 : i32, i32, i32
  }
  func.func @transform_9(%arg0: i32, %arg1: i32) -> (i32, i32, i32) {
    %c0_i32 = arith.constant 0 : i32
    %c0_i32_0 = arith.constant 0 : i32
    %c0_i32_1 = arith.constant 0 : i32
    return %arg1, %c0_i32, %c0_i32_0 : i32, i32, i32
  }
  func.func @transform_10(%arg0: i32, %arg1: i32) -> (i32, i32, i32) {
    %c0_i32 = arith.constant 0 : i32
    %c0_i32_0 = arith.constant 0 : i32
    %c0_i32_1 = arith.constant 0 : i32
    return %arg1, %c0_i32, %c0_i32_0 : i32, i32, i32
  }
  func.func @transform_11(%arg0: i32, %arg1: i32) -> (i32, i32, i32) {
    %c0_i32 = arith.constant 0 : i32
    %c0_i32_0 = arith.constant 0 : i32
    %c0_i32_1 = arith.constant 0 : i32
    return %arg1, %c0_i32, %c0_i32_0 : i32, i32, i32
  }
  func.func @transform_12(%arg0: i32, %arg1: i32) -> (i32, i32, i32) {
    %c0_i32 = arith.constant 0 : i32
    %c0_i32_0 = arith.constant 0 : i32
    %c0_i32_1 = arith.constant 0 : i32
    return %arg1, %c0_i32, %c0_i32_0 : i32, i32, i32
  }
  func.func @transform_13(%arg0: i32, %arg1: i32) -> (i32, i32, i32) {
    %c0_i32 = arith.constant 0 : i32
    %c0_i32_0 = arith.constant 0 : i32
    %c0_i32_1 = arith.constant 0 : i32
    return %arg1, %c0_i32, %c0_i32_0 : i32, i32, i32
  }
  func.func @transform_14(%arg0: i32, %arg1: i32) -> (i32, i32, i32) {
    %c0_i32 = arith.constant 0 : i32
    %c0_i32_0 = arith.constant 0 : i32
    %c0_i32_1 = arith.constant 0 : i32
    return %arg1, %c0_i32, %c0_i32_0 : i32, i32, i32
  }
  func.func @transform_15(%arg0: i32, %arg1: i32) -> (i32, i32) {
    %c0_i32 = arith.constant 0 : i32
    %c0_i32_0 = arith.constant 0 : i32
    return %arg0, %c0_i32 : i32, i32
  }
}

module attributes {stable_mosaic.version = 11 : i64} {
  func.func @_classifier_kernel(%arg0: i32, %arg1: memref<2x512xbf16, #tpu.memory_space<vmem>>, %arg2: memref<512x1024xbf16, #tpu.memory_space<vmem>>, %arg3: memref<1x1024xf32, #tpu.memory_space<vmem>>, %arg4: memref<1024x128xbf16, #tpu.memory_space<vmem>>, %arg5: memref<1x128xf32, #tpu.memory_space<vmem>>, %arg6: memref<2x128xf32, #tpu.memory_space<vmem>>) attributes {dimension_semantics = [#tpu.dimension_semantics<arbitrary>], iteration_bounds = array<i64: 1>, scalar_prefetch = 0 : i64, scratch_operands = 0 : i64, tpu.core_type = #tpu.core_type<tc>, window_params = [{pipeline_mode = #tpu.pipeline_mode<synchronous>, transform_indices = @transform_0, window_bounds = array<i64: 2, 512>}, {pipeline_mode = #tpu.pipeline_mode<synchronous>, transform_indices = @transform_1, window_bounds = array<i64: 512, 1024>}, {pipeline_mode = #tpu.pipeline_mode<synchronous>, transform_indices = @transform_2, window_bounds = array<i64: 1, 1024>}, {pipeline_mode = #tpu.pipeline_mode<synchronous>, transform_indices = @transform_3, window_bounds = array<i64: 1024, 128>}, {pipeline_mode = #tpu.pipeline_mode<synchronous>, transform_indices = @transform_4, window_bounds = array<i64: 1, 128>}, {pipeline_mode = #tpu.pipeline_mode<synchronous>, transform_indices = @transform_5, window_bounds = array<i64: 2, 128>}]} {
    %c0 = arith.constant 0 : index
    %c0_0 = arith.constant 0 : index
    %0 = vector.load %arg1[%c0, %c0_0] : memref<2x512xbf16, #tpu.memory_space<vmem>>, vector<2x512xbf16>
    %c0_1 = arith.constant 0 : index
    %c0_2 = arith.constant 0 : index
    %1 = vector.load %arg2[%c0_1, %c0_2] : memref<512x1024xbf16, #tpu.memory_space<vmem>>, vector<512x1024xbf16>
    %cst = arith.constant dense<0.000000e+00> : vector<2x1024xf32>
    %2 = tpu.matmul %0, %1, %cst {dimension_numbers = #tpu.dot_dimension_numbers<[1], [0], [0], [1], [0, 0, 1, 1], [], []>} : vector<2x512xbf16>, vector<512x1024xbf16>, vector<2x1024xf32> -> vector<2x1024xf32>
    %c0_3 = arith.constant 0 : index
    %c0_4 = arith.constant 0 : index
    %3 = vector.load %arg3[%c0_3, %c0_4] : memref<1x1024xf32, #tpu.memory_space<vmem>>, vector<1x1024xf32>
    %4 = vector.broadcast %3 : vector<1x1024xf32> to vector<2x1024xf32>
    %5 = arith.addf %2, %4 : vector<2x1024xf32>
    %cst_5 = arith.constant 0.000000e+00 : f32
    %6 = vector.broadcast %cst_5 : f32 to vector<2x1024xf32>
    %7 = arith.maximumf %5, %6 : vector<2x1024xf32>
    %8 = arith.truncf %7 : vector<2x1024xf32> to vector<2x1024xbf16>
    %c0_6 = arith.constant 0 : index
    %c0_7 = arith.constant 0 : index
    %9 = vector.load %arg4[%c0_6, %c0_7] : memref<1024x128xbf16, #tpu.memory_space<vmem>>, vector<1024x128xbf16>
    %cst_8 = arith.constant dense<0.000000e+00> : vector<2x128xf32>
    %10 = tpu.matmul %8, %9, %cst_8 {dimension_numbers = #tpu.dot_dimension_numbers<[1], [0], [0], [1], [0, 0, 1, 1], [], []>} : vector<2x1024xbf16>, vector<1024x128xbf16>, vector<2x128xf32> -> vector<2x128xf32>
    %c0_9 = arith.constant 0 : index
    %c0_10 = arith.constant 0 : index
    %11 = vector.load %arg5[%c0_9, %c0_10] : memref<1x128xf32, #tpu.memory_space<vmem>>, vector<1x128xf32>
    %12 = vector.broadcast %11 : vector<1x128xf32> to vector<2x128xf32>
    %13 = arith.addf %10, %12 : vector<2x128xf32>
    %c0_11 = arith.constant 0 : index
    %c0_12 = arith.constant 0 : index
    %14 = vector.load %arg6[%c0_11, %c0_12] : memref<2x128xf32, #tpu.memory_space<vmem>>, vector<2x128xf32>
    tpu.vector_store %arg6[%c0_11, %c0_12], %13 {strides = array<i32>} : memref<2x128xf32, #tpu.memory_space<vmem>>, vector<2x128xf32>,
    return
  }
  func.func @transform_0(%arg0: i32) -> (i32, i32) {
    %c0_i32 = arith.constant 0 : i32
    %c0_i32_0 = arith.constant 0 : i32
    %c0_i32_1 = arith.constant 0 : i32
    return %c0_i32, %c0_i32_0 : i32, i32
  }
  func.func @transform_1(%arg0: i32) -> (i32, i32) {
    %c0_i32 = arith.constant 0 : i32
    %c0_i32_0 = arith.constant 0 : i32
    %c0_i32_1 = arith.constant 0 : i32
    return %c0_i32, %c0_i32_0 : i32, i32
  }
  func.func @transform_2(%arg0: i32) -> (i32, i32) {
    %c0_i32 = arith.constant 0 : i32
    %c0_i32_0 = arith.constant 0 : i32
    %c0_i32_1 = arith.constant 0 : i32
    return %c0_i32, %c0_i32_0 : i32, i32
  }
  func.func @transform_3(%arg0: i32) -> (i32, i32) {
    %c0_i32 = arith.constant 0 : i32
    %c0_i32_0 = arith.constant 0 : i32
    %c0_i32_1 = arith.constant 0 : i32
    return %c0_i32, %c0_i32_0 : i32, i32
  }
  func.func @transform_4(%arg0: i32) -> (i32, i32) {
    %c0_i32 = arith.constant 0 : i32
    %c0_i32_0 = arith.constant 0 : i32
    %c0_i32_1 = arith.constant 0 : i32
    return %c0_i32, %c0_i32_0 : i32, i32
  }
  func.func @transform_5(%arg0: i32) -> (i32, i32) {
    %c0_i32 = arith.constant 0 : i32
    %c0_i32_0 = arith.constant 0 : i32
    %c0_i32_1 = arith.constant 0 : i32
    return %c0_i32, %c0_i32_0 : i32, i32
  }
}

</mosaic_0001>

<bundles_post_ra>
// kernel: transformer_forward.2
= control target key start
LH: loop header
LB: loop body
LE: loop exit
PB: predicated region body
PF: predicated region fallthrough
CT: control target
= control target key end

     0   :  { %s4549_s0 = inlined_call_operand.vmem [shape: bf16[32,16], index: 0, kind: input, shape index: {}]   ;;  %s4550_s1 = inlined_call_operand.hbm [shape: bf16[16,32], index: 1, kind: input, shape index: {}]   ;;  %s4551_s2 = inlined_call_operand.hbm [shape: f32[16,32], index: 2, kind: input, shape index: {}]   ;;  %s4552_s3 = inlined_call_operand.vmem [shape: bf16[2,32,96], index: 3, kind: input, shape index: {}]   ;;  %s4553_s4 = inlined_call_operand.hbm [shape: f32[2,1,96], index: 4, kind: input, shape index: {}]   ;;  %s4554_s5 = inlined_call_operand.vmem [shape: bf16[2,32,32], index: 5, kind: input, shape index: {}]   ;;  %s4555_s6 = inlined_call_operand.hbm [shape: f32[2,1,32], index: 6, kind: input, shape index: {}]   ;;  %s4556_s7 = inlined_call_operand.hbm [shape: f32[2,1,32], index: 7, kind: input, shape index: {}]   ;;  %s4557_s8 = inlined_call_operand.hbm [shape: f32[2,1,32], index: 8, kind: input, shape index: {}]   ;;  %s4558_s9 = inlined_call_operand.hbm [shape: bf16[2,32,64], index: 9, kind: input, shape index: {}]   ;;  %s4559_s10 = inlined_call_operand.hbm [shape: f32[2,1,64], index: 10, kind: input, shape index: {}]   ;;  %s4560_s11 = inlined_call_operand.vmem [shape: bf16[2,64,32], index: 11, kind: input, shape index: {}]   ;;  %s4561_s12 = inlined_call_operand.hbm [shape: f32[2,1,32], index: 12, kind: input, shape index: {}]   ;;  %s4562_s13 = inlined_call_operand.hbm [shape: f32[2,1,32], index: 13, kind: input, shape index: {}]   ;;  %s4563_s14 = inlined_call_operand.hbm [shape: f32[2,1,32], index: 14, kind: input, shape index: {}]   ;;  %s4564_s15 = inlined_call_operand.vmem [shape: bf16[32,32], index: 15, kind: output, shape index: {}]  }
   0x1   :  { %4577 = sst [smem:[#allocation25_spill]] %s4549_s0 }
   0x2   :  { %4578 = sst [smem:[#allocation26_spill]] %s4550_s1 }
   0x3   :  { %4579 = sst [smem:[#allocation27_spill]] %s4552_s3 }
   0x4   :  { %4580 = sst [smem:[#allocation28_spill]] %s4553_s4 }
   0x5   :  { %4581 = sst [smem:[#allocation29_spill]] %s4554_s5 }
   0x6   :  { %4582 = sst [smem:[#allocation30_spill]] %s4555_s6 }
   0x7   :  { %4583 = sst [smem:[#allocation31_spill]] %s4556_s7 }
   0x8   :  { %4584 = sst [smem:[#allocation32_spill]] %s4557_s8 }
   0x9   :  { %4585 = sst [smem:[#allocation33_spill]] %s4560_s11 }
   0xa   :  { %4586 = sst [smem:[#allocation34_spill]] %s4564_s15 }
   0xb   :  { %20 = vsyncpa [#allocation4], 0 }
   0xc   :  { %21 = vsyncpa [#allocation6], 0  ;;  %s3975_s18 = smov 0   ;;  %s3977_s19 = smov 0  }
   0xd   :  { %s3979_s20 = smov 0   ;;  %s3981_s21 = smov 0  }
   0xe   :  { %s3983_s22 = smov 0   ;;  %s3985_s23 = smov 0  }
   0xf LB: > { %4587 = sst [smem:[#allocation19_spill]] %s3849_s19  ;;  %s4565_s24 = sadd.s32 4294967295, %s3865_s23   ;;  %s3865_s23 = sphi %s3985_s23, %s27_s23   ;;  %s3861_s22 = sphi %s3983_s22, %s4628_s22   ;;  %s3857_s21 = sphi %s3981_s21, %s4627_s21   ;;  %s3853_s20 = sphi %s3979_s20, %s4625_s20   ;;  %s3849_s19 = sphi %s3977_s19, %s4624_s19   ;;  %s3845_s18 = sphi %s3975_s18, %s4623_s18  }
  0x10   : > { %4588 = sst [smem:[#allocation20_spill]] %s3853_s20  ;;  %s36_s25 = sadd.s32 1, %s3861_s22 }
  0x11   : > { %4589 = sst [smem:[#allocation21_spill]] %s3857_s21  ;;  %p37_p0 = scmp.ge.s32.totalorder %s36_s25, 2 }
  0x12   : > { %s140_s26 = sadd.s32 1, %s3853_s20  ;;  %p147_p1 = scmp.ne.s32.totalorder %s3853_s20, %s3849_s19 }
  0x13   : > { %p148_p2 = scmp.eq.s32.totalorder %s3865_s23, 0  ;;  %s4630_s25 = smov (%p37_p0, %s36_s25), 0 }
  0x14   : > { %4590 = sst [smem:[#allocation22_spill]] %s4630_s25  ;;  %p153_p4 = scmp.ne.s32.totalorder %s3849_s19, %s3845_s18 }
  0x15   : > { %p4011_p3 = por %p148_p2, %p147_p1  ;;  %s137_s28 = ssub.s32 %s3861_s22, %s4630_s25 }
  0x16   : > { %p4020_p5 = scmp.eq.s32.totalorder %s4565_s24, 0  ;;  %p138_p6 = scmp.eq.s32.totalorder %s137_s28, 0 }
  0x17   : > { %p2961_p7 = scmp.ge.s32.totalorder %s3865_s23, 1  ;;  %p450_p9 = scmp.lt.s32.totalorder %s3865_s23, 3 }
  0x18   : > { %p4027_p8 = por %p4020_p5, %p153_p4  ;;  %s3867_s18 = smov [#allocation3]  }
  0x19   : > { %s4033_s16 = scalar_select %p138_p6, %s3853_s20, %s140_s26  }
  0x1a   : > { %s4593_s30 = scalar_select %p4027_p8, 1, 0 }
  0x1b   : > { %4595 = sst [smem:[#allocation24_spill]] %s4033_s16  ;;  %p4035_p10 = pnand %p2961_p7, %p450_p9 }
  0x1c   : > { %4594 = sst [smem:[#allocation23_spill]] %s4593_s30  ;;  %s471_s24 = sshll.u32 %s3867_s18, 4  ;;  %s472_s24 = int_to_ptr.vmem [resolvable:$true] %s471_s24 }
  0x1d   : > { %p3301_p11 = pneg %p4035_p10  ;;  %p3338_p13 = scmp.lt.s32.totalorder %s3865_s23, 2 }
  0x1e   : > { %s4049_s26 = sand.u32 1, %s3853_s20   ;;  %s506_s25 = sand.u32 1, %s3865_s23  }
  0x1f   : > { %p4043_p12 = pnand %p3301_p11, %p4020_p5  ;;  %s3514_s16 = scalar_lea.vmem %s472_s24, 128 }
  0x20   : > { %p3515_p1 = scmp.ne.s32.totalorder %s472_s24, %s3514_s16  ;;  %p3522_p6 = scmp.lt.s32.totalorder %s472_s24, %s472_s24 }
  0x21   : > { %p3505_p0 = pneg %p4043_p12  ;;  %p3523_p7 = scmp.lt.s32.totalorder %s3514_s16, %s3514_s16 }
  0x23   : > { %p3517_p2 = pnand %p3515_p1, %p3505_p0  ;;  %p3524_p9 = por %p3523_p7, %p3522_p6 }
  0x25   : > { %p3518_p4 = pneg %p3517_p2 }
  0x27   : > { %p3525_p11 = pnand %p3524_p9, %p3518_p4 }
  0x29   : > { %3528 = shalt.err (!%p3525_p11)
}
  0x2a   : > { %s4574_s18 = smov 64   ;;  %s4575_s20 = smov 4  }
  0x2b   : > { %s4598_s1 = sld [smem:[#allocation26_spill]]  ;;  %p4069_p1 = pnand %p3338_p13, %p4011_p3 }
  0x2c   : > { %s4074_s11 = sshll.u32 %s3861_s22, 4  ;;  %s4600_s4 = sld [smem:[#allocation28_spill]] }
  0x2d   : > { %s509_s30 = scalar_lea.vmem [#allocation7], %s4049_s26  ;;  %s4601_s6 = sld [smem:[#allocation30_spill]] }
  0x2e   : > { %s516_s19 = sshll.u32 %s509_s30, 4  ;;  %s4085_s27 = scalar_lea.sflag [#allocation4], %s506_s25  ;;  %s517_s19 = int_to_ptr.vmem [resolvable:$true] %s516_s19 }
  0x2f   : > { %p4089_p3 = pneg %p4069_p1  ;;  %s3870_s3 = smov [#allocation7]  }
  0x30   : > { %s3547_s5 = sshll.u32 %s3870_s3, 4  ;;  %s3548_s5 = int_to_ptr.vmem [resolvable:$false] %s3547_s5 }
  0x31   : > { %3304 = dma.hbm_to_vmem [thread:$0]  (!%p4043_p12), %s4598_s1, 128, %s472_s24, [#allocation4], %s4574_s18, %s4574_s18, %s4575_s20  }
  0x32   : > { %s514_s21 = scalar_lea.hbm %s4600_s4, %s4074_s11  ;;  %s3542_s20 = scalar_lea.vmem %s517_s19, 16 }
  0x33   : > { %p3543_p13 = scmp.ne.s32.totalorder %s517_s19, %s3542_s20  ;;  %s3549_s30 = scalar_lea.vmem %s3548_s5, 32 }
  0x34   : > { %p3550_p6 = scmp.lt.s32.totalorder %s517_s19, %s3548_s5  ;;  %p3551_p7 = scmp.lt.s32.totalorder %s3549_s30, %s3542_s20 }
  0x35   : > { %p3545_p2 = pnand %p3543_p13, %p4089_p3 }
  0x36   : > { %p3552_p9 = por %p3551_p7, %p3550_p6 }
  0x37   : > { %p3546_p4 = pneg %p3545_p2 }
  0x39   : > { %p3553_p11 = pnand %p3552_p9, %p3546_p4 }
  0x3b   : > { %3556 = shalt.err (!%p3553_p11)
}
  0x3c   : > { %3311 = dma.hbm_to_vmem [thread:$0]  (!%p4069_p1), %s514_s21, 16, %s517_s19, %s4085_s27  }
  0x3d   : > { %s534_s25 = scalar_lea.vmem [#allocation8], %s4049_s26  ;;  %s4603_s7 = sld [smem:[#allocation31_spill]] }
  0x3e   : > { %s541_s0 = sshll.u32 %s534_s25, 4  ;;  %s3871_s20 = smov [#allocation8]   ;;  %s542_s0 = int_to_ptr.vmem [resolvable:$true] %s541_s0 }
  0x3f   : > { %s3570_s1 = scalar_lea.vmem %s542_s0, 16  ;;  %s3575_s5 = sshll.u32 %s3871_s20, 4  ;;  %s3576_s5 = int_to_ptr.vmem [resolvable:$false] %s3575_s5 }
  0x40   : > { %p3571_p13 = scmp.ne.s32.totalorder %s542_s0, %s3570_s1  ;;  %s3577_s30 = scalar_lea.vmem %s3576_s5, 32 }
  0x41   : > { %p3578_p6 = scmp.lt.s32.totalorder %s542_s0, %s3576_s5  ;;  %p3579_p7 = scmp.lt.s32.totalorder %s3577_s30, %s3570_s1 }
  0x42   : > { %p3573_p2 = pnand %p3571_p13, %p4089_p3 }
  0x43   : > { %p3580_p9 = por %p3579_p7, %p3578_p6 }
  0x44   : > { %p3574_p4 = pneg %p3573_p2 }
  0x46   : > { %p3581_p11 = pnand %p3580_p9, %p3574_p4 }
  0x48   : > { %3584 = shalt.err (!%p3581_p11)
}
  0x49   : > { %s4604_s24 = scalar_lea.hbm %s4601_s6, %s4074_s11  ;;  %s551_s25 = scalar_lea.vmem [#allocation9], %s4049_s26 }
  0x4a   : > { %3314 = dma.hbm_to_vmem [thread:$0]  (!%p4069_p1), %s4604_s24, 16, %s542_s0, %s4085_s27  }
  0x4b   : > { %s558_s15 = sshll.u32 %s551_s25, 4  ;;  %s4605_s8 = sld [smem:[#allocation32_spill]]  ;;  %s559_s15 = int_to_ptr.vmem [resolvable:$true] %s558_s15 }
  0x4c   : > { %s3598_s30 = scalar_lea.vmem %s559_s15, 16  ;;  %s3872_s3 = smov [#allocation9]  }
  0x4d   : > { %p3599_p13 = scmp.ne.s32.totalorder %s559_s15, %s3598_s30  ;;  %s3603_s19 = sshll.u32 %s3872_s3, 4  ;;  %s3604_s19 = int_to_ptr.vmem [resolvable:$false] %s3603_s19 }
  0x4e   : > { %s3605_s21 = scalar_lea.vmem %s3604_s19, 32  ;;  %p3606_p6 = scmp.lt.s32.totalorder %s559_s15, %s3604_s19 }
  0x4f   : > { %p3601_p2 = pnand %p3599_p13, %p4089_p3  ;;  %p3607_p7 = scmp.lt.s32.totalorder %s3605_s21, %s3598_s30 }
  0x51   : > { %p3602_p4 = pneg %p3601_p2  ;;  %p3608_p9 = por %p3607_p7, %p3606_p6 }
  0x53   : > { %p3609_p11 = pnand %p3608_p9, %p3602_p4 }
  0x55   : > { %3612 = shalt.err (!%p3609_p11)
}
  0x56   : > { %s4606_s25 = scalar_lea.hbm %s4603_s7, %s4074_s11  ;;  %s568_s3 = scalar_lea.vmem [#allocation10], %s4049_s26 }
  0x57   : > { %3317 = dma.hbm_to_vmem [thread:$0]  (!%p4069_p1), %s4606_s25, 16, %s559_s15, %s4085_s27  }
  0x58   : > { %s575_s20 = sshll.u32 %s568_s3, 4  ;;  %s2970_s1 = sshll.u32 %s4049_s26, 4  ;;  %s576_s20 = int_to_ptr.vmem [resolvable:$true] %s575_s20 }
  0x59   : > { %s3626_s30 = scalar_lea.vmem %s576_s20, 16  ;;  %s3873_s19 = smov [#allocation10]  }
  0x5a   : > { %p3627_p13 = scmp.ne.s32.totalorder %s576_s20, %s3626_s30  ;;  %s3631_s21 = sshll.u32 %s3873_s19, 4  ;;  %s3632_s21 = int_to_ptr.vmem [resolvable:$false] %s3631_s21 }
  0x5b   : > { %s3633_s5 = scalar_lea.vmem %s3632_s21, 32  ;;  %p3634_p6 = scmp.lt.s32.totalorder %s576_s20, %s3632_s21 }
  0x5c   : > { %p3629_p2 = pnand %p3627_p13, %p4089_p3  ;;  %p3635_p7 = scmp.lt.s32.totalorder %s3633_s5, %s3626_s30 }
  0x5e   : > { %p3630_p4 = pneg %p3629_p2  ;;  %p3636_p9 = por %p3635_p7, %p3634_p6 }
  0x60   : > { %p3637_p11 = pnand %p3636_p9, %p3630_p4 }
  0x62   : > { %3640 = shalt.err (!%p3637_p11)
}
  0x63   : > { %s4607_s24 = scalar_lea.hbm %s4605_s8, %s4074_s11  ;;  %s3048_s25 = sshll.u32 %s3861_s22, 8 }
  0x64   : > { %3320 = dma.hbm_to_vmem [thread:$0]  (!%p4069_p1), %s4607_s24, 16, %s576_s20, %s4085_s27  }
  0x65   : > { %s586_s3 = scalar_lea.vmem [#allocation11], %s2970_s1  ;;  %s592_s5 = scalar_lea.hbm %s4558_s9, %s3048_s25 }
  0x66   : > { %s593_s19 = sshll.u32 %s586_s3, 4  ;;  %s3874_s6 = smov [#allocation11]   ;;  %s594_s19 = int_to_ptr.vmem [resolvable:$true] %s593_s19 }
  0x67   : > { %s3654_s30 = scalar_lea.vmem %s594_s19, 256  ;;  %s3659_s15 = sshll.u32 %s3874_s6, 4  ;;  %s3660_s15 = int_to_ptr.vmem [resolvable:$false] %s3659_s15 }
  0x68   : > { %p3655_p13 = scmp.ne.s32.totalorder %s594_s19, %s3654_s30  ;;  %s3661_s0 = scalar_lea.vmem %s3660_s15, 512 }
  0x69   : > { %p3662_p6 = scmp.lt.s32.totalorder %s594_s19, %s3660_s15  ;;  %p3663_p7 = scmp.lt.s32.totalorder %s3661_s0, %s3654_s30 }
  0x6a   : > { %p3657_p2 = pnand %p3655_p13, %p4089_p3 }
  0x6b   : > { %p3664_p9 = por %p3663_p7, %p3662_p6 }
  0x6c   : > { %p3658_p4 = pneg %p3657_p2 }
  0x6e   : > { %p3665_p11 = pnand %p3664_p9, %p3658_p4 }
  0x70   : > { %3668 = shalt.err (!%p3665_p11)
}
  0x71   : > { %s4608_s20 = smov 4   ;;  %s4609_s4 = smov 64  }
  0x72   : > { %3323 = dma.hbm_to_vmem [thread:$0]  (!%p4069_p1), %s592_s5, 256, %s594_s19, %s4085_s27, %s4609_s4, %s4609_s4, %s4608_s20  }
  0x73   : > { %s611_s24 = scalar_lea.hbm %s4559_s10, %s4074_s11  ;;  %s606_s25 = scalar_lea.vmem [#allocation12], %s4049_s26 }
  0x74   : > { %s613_s3 = sshll.u32 %s606_s25, 4  ;;  %s636_s15 = scalar_lea.hbm %s4561_s12, %s4074_s11  ;;  %s614_s3 = int_to_ptr.vmem [resolvable:$true] %s613_s3 }
  0x75   : > { %s3682_s0 = scalar_lea.vmem %s614_s3, 16  ;;  %s3875_s7 = smov [#allocation12]  }
  0x76   : > { %p3683_p13 = scmp.ne.s32.totalorder %s614_s3, %s3682_s0  ;;  %s3687_s8 = sshll.u32 %s3875_s7, 4  ;;  %s3688_s8 = int_to_ptr.vmem [resolvable:$false] %s3687_s8 }
  0x77   : > { %s3689_s19 = scalar_lea.vmem %s3688_s8, 32  ;;  %p3690_p6 = scmp.lt.s32.totalorder %s614_s3, %s3688_s8 }
  0x78   : > { %p3685_p2 = pnand %p3683_p13, %p4089_p3  ;;  %p3691_p7 = scmp.lt.s32.totalorder %s3689_s19, %s3682_s0 }
  0x7a   : > { %p3686_p4 = pneg %p3685_p2  ;;  %p3692_p9 = por %p3691_p7, %p3690_p6 }
  0x7c   : > { %p3693_p11 = pnand %p3692_p9, %p3686_p4 }
  0x7e   : > { %3696 = shalt.err (!%p3693_p11)
}
  0x7f   : > { %3326 = dma.hbm_to_vmem [thread:$0]  (!%p4069_p1), %s611_s24, 16, %s614_s3, %s4085_s27  }
  0x80   : > { %s631_s5 = scalar_lea.vmem [#allocation13], %s4049_s26  ;;  %s653_s7 = scalar_lea.hbm %s4562_s13, %s4074_s11 }
  0x81   : > { %s638_s20 = sshll.u32 %s631_s5, 4  ;;  %s3876_s8 = smov [#allocation13]   ;;  %s639_s20 = int_to_ptr.vmem [resolvable:$true] %s638_s20 }
  0x82   : > { %s3710_s6 = scalar_lea.vmem %s639_s20, 16  ;;  %s3715_s25 = sshll.u32 %s3876_s8, 4  ;;  %s3716_s25 = int_to_ptr.vmem [resolvable:$false] %s3715_s25 }
  0x83   : > { %p3711_p13 = scmp.ne.s32.totalorder %s639_s20, %s3710_s6  ;;  %s3717_s21 = scalar_lea.vmem %s3716_s25, 32 }
  0x84   : > { %p3718_p6 = scmp.lt.s32.totalorder %s639_s20, %s3716_s25  ;;  %p3719_p7 = scmp.lt.s32.totalorder %s3717_s21, %s3710_s6 }
  0x85   : > { %p3713_p2 = pnand %p3711_p13, %p4089_p3 }
  0x86   : > { %p3720_p9 = por %p3719_p7, %p3718_p6 }
  0x87   : > { %p3714_p4 = pneg %p3713_p2 }
  0x89   : > { %p3721_p11 = pnand %p3720_p9, %p3714_p4 }
  0x8b   : > { %3724 = shalt.err (!%p3721_p11)
}
  0x8c   : > { %3329 = dma.hbm_to_vmem [thread:$0]  (!%p4069_p1), %s636_s15, 16, %s639_s20, %s4085_s27  }
  0x8d   : > { %s648_s30 = scalar_lea.vmem [#allocation14], %s4049_s26  ;;  %s3877_s19 = smov [#allocation5]  }
  0x8e   : > { %s655_s0 = sshll.u32 %s648_s30, 4  ;;  %s484_s5 = sshll.u32 %s3877_s19, 4  ;;  %s656_s0 = int_to_ptr.vmem [resolvable:$true] %s655_s0  ;;  %s485_s5 = int_to_ptr.vmem [resolvable:$true] %s484_s5 }
  0x8f   : > { %s3738_s4 = scalar_lea.vmem %s656_s0, 16  ;;  %s3878_s1 = smov [#allocation14]  }
  0x90   : > { %p3739_p13 = scmp.ne.s32.totalorder %s656_s0, %s3738_s4  ;;  %s3743_s6 = sshll.u32 %s3878_s1, 4  ;;  %s3744_s6 = int_to_ptr.vmem [resolvable:$false] %s3743_s6 }
  0x91   : > { %s3745_s8 = scalar_lea.vmem %s3744_s6, 32  ;;  %p3746_p6 = scmp.lt.s32.totalorder %s656_s0, %s3744_s6 }
  0x92   : > { %p3741_p2 = pnand %p3739_p13, %p4089_p3  ;;  %p3747_p7 = scmp.lt.s32.totalorder %s3745_s8, %s3738_s4 }
  0x94   : > { %p3742_p4 = pneg %p3741_p2  ;;  %p3748_p9 = por %p3747_p7, %p3746_p6 }
  0x96   : > { %p3749_p11 = pnand %p3748_p9, %p3742_p4 }
  0x98   : > { %3752 = shalt.err (!%p3749_p11)
}
  0x99   : > { %3332 = dma.hbm_to_vmem [thread:$0]  (!%p4069_p1), %s653_s7, 16, %s656_s0, %s4085_s27  }
  0x9a   : > { %s3764_s25 = scalar_lea.vmem %s485_s5, 256  ;;  %p3772_p6 = scmp.lt.s32.totalorder %s485_s5, %s485_s5 }
  0x9b   : > { %p3765_p13 = scmp.ne.s32.totalorder %s485_s5, %s3764_s25  ;;  %p3773_p4 = scmp.lt.s32.totalorder %s3764_s25, %s3764_s25 }
  0x9d   : > { %p3767_p2 = pnand %p3765_p13, %p3505_p0  ;;  %p3774_p7 = por %p3773_p4, %p3772_p6 }
  0x9f   : > { %p3768_p8 = pneg %p3767_p2 }
  0xa1   : > { %p3775_p9 = pnand %p3774_p7, %p3768_p8 }
  0xa3   : > { %3778 = shalt.err (!%p3775_p9)
}
  0xa4   : > { %s3879_s21 = smov 128   ;;  %s3880_s24 = smov 8  }
  0xa5   : > { %3307 = dma.hbm_to_vmem [thread:$0]  (!%p4043_p12), %s4551_s2, 256, %s485_s5, [#allocation6], %s3879_s21, %s3879_s21, %s3880_s24  }
  0xa6   : > { %s670_s19 = scalar_lea.hbm %s4563_s14, %s4074_s11  ;;  %s665_s4 = scalar_lea.vmem [#allocation15], %s4049_s26 }
  0xa7   : > { %s672_s1 = sshll.u32 %s665_s4, 4  ;;  %s3881_s8 = smov [#allocation15]   ;;  %s673_s1 = int_to_ptr.vmem [resolvable:$true] %s672_s1 }
  0xa8   : > { %s3792_s6 = scalar_lea.vmem %s673_s1, 16  ;;  %s3797_s15 = sshll.u32 %s3881_s8, 4  ;;  %s3798_s15 = int_to_ptr.vmem [resolvable:$false] %s3797_s15 }
  0xa9   : > { %p3793_p8 = scmp.ne.s32.totalorder %s673_s1, %s3792_s6  ;;  %s3799_s28 = scalar_lea.vmem %s3798_s15, 32 }
  0xaa   : > { %p3800_p13 = scmp.lt.s32.totalorder %s673_s1, %s3798_s15  ;;  %p3801_p2 = scmp.lt.s32.totalorder %s3799_s28, %s3792_s6 }
  0xab   : > { %p3795_p0 = pnand %p3793_p8, %p4089_p3 }
  0xac   : > { %p3802_p6 = por %p3801_p2, %p3800_p13 }
  0xad   : > { %p3796_p11 = pneg %p3795_p0 }
  0xaf   : > { %p3803_p12 = pnand %p3802_p6, %p3796_p11 }
  0xb1   : > { %3806 = shalt.err (!%p3803_p12)
}
  0xb2   : > { %3335 = dma.hbm_to_vmem [thread:$0]  (!%p4069_p1), %s670_s19, 16, %s673_s1, %s4085_s27  }
  0xb3   : > { %681 = sbr.rel (%p4035_p10) target bundleno = 4702 (0x125e), region = 80 }
  0xb8   : > { %3832 = dma.done.wait (%p4020_p5), [#allocation4], 128  }
  0xb9   : > { %3834 = vsyncadd (%p4020_p5), [#allocation4], 4294967168 }
  0xba   : > { %3836 = dma.done.wait (%p4020_p5), [#allocation6], 256  }
  0xbb   : > { %3838 = vsyncadd (%p4020_p5), [#allocation6], 4294967040  ;;  %s4610_s11 = sadd.s32 4294967295, %s3865_s23   ;;  %s4611_s26 = sld [smem:[#allocation19_spill]] }
  0xbc   : > { %s4612_s18 = sld [smem:[#allocation23_spill]]  ;;  %s691_s16 = sand.u32 1, %s4610_s11  }
  0xbd   : > { %s692_s17 = scalar_lea.sflag [#allocation4], %s691_s16 }
  0xc1   : > { %s4223_s27 = sand.u32 1, %s4611_s26  }
  0xc2   : > { %p4613_p10 = scmp.ne.s32.totalorder %s4612_s18, 0 }
  0xc4   : > { %3840 = dma.done.wait (%p4613_p10), %s692_s17, 384  }
  0xc5   : > { %3842 = vsyncadd (%p4613_p10), %s692_s17, 4294966912  ;;  %s4614_s20 = sld [smem:[#allocation21_spill]]  ;;  %s2980_s29 = sshll.u32 %s4223_s27, 4 }
  0xc6   : > { %s4615_s30 = sld [smem:[#allocation27_spill]]  ;;  %s702_s26 = scalar_lea.vmem [#allocation8], %s4223_s27 }
  0xc7   : > { %s4616_s1 = sld [smem:[#allocation29_spill]]  ;;  %s710_s18 = scalar_lea.vmem [#allocation9], %s4223_s27 }
  0xc8   : > { %s4617_s28 = sld [smem:[#allocation33_spill]]  ;;  %s718_s16 = scalar_lea.vmem [#allocation10], %s4223_s27 }
  0xc9   : > { %s4251_s17 = scalar_lea.vmem [#allocation11], %s2980_s29  ;;  %s743_s5 = scalar_lea.vmem [#allocation13], %s4223_s27 }
  0xca   : > { %s751_s7 = scalar_lea.vmem [#allocation14], %s4223_s27  ;;  %s759_s3 = scalar_lea.vmem [#allocation15], %s4223_s27 }
  0xcb   : > { %p864_p5 = scmp.lt.s32.totalorder %s4614_s20, 1  ;;  %p2987_p1 = scmp.ne.s32.totalorder %s4614_s20, 0 }
  0xcc   : > { %s4618_s19 = sld [smem:[#allocation25_spill]] (!%p2987_p1) }
  0xcd   : > { %s865_s25 = scalar_select %p864_p5, %s4614_s20, 1 }
  0xce   : > { %889 = sbr.rel (%p2987_p1) target bundleno = 418 (0x1a2), region = 128 }
  0xcf   : > { %s3049_s21 = sshll.u32 %s865_s25, 4  ;;  %s3051_s24 = sshll.u32 %s865_s25, 5 }
  0xd0   : > { %s4236_s0 = scalar_lea.vmem %s4615_s30, %s3049_s21  ;;  %s4241_s6 = scalar_lea.vmem %s4616_s1, %s3049_s21 }
  0xd1   : > { %s4246_s11 = scalar_lea.vmem %s4617_s28, %s3051_s24  ;;  %s735_s25 = scalar_lea.vmem [#allocation12], %s4223_s27 }
  0xd2   : > { %s4619_s4 = smov (!%p2987_p1), %s4618_s19 }
  0xd3   : > { %v3408_v0 = vld [vmem:[#allocation3] sm:$0xff]   ;;  %vm912_vm0 = vcmask 130048   ;;  %v3410_v2 = vld [vmem:[%s4619_s4 + $0x8] sm:$0xff]   ;;  %vm974_vm1 = vcmask 261120   ;;  %v969_v7 = vld [vmem:[#allocation5 + $0x8] sm:$0xff] }
  0xd4   : > { %v3409_v1 = vld [vmem:[%s4618_s19] sm:$0xff]   ;;  %3117 = vmatprep.subr.bf16.mxu0 %v3408_v0  ;;  %v968_v3 = vld [vmem:[#allocation5] sm:$0xff] }
  0xd5   : > { %3118 = vmatpush3.bf16.msra.mxu0 %v3408_v0  ;;  %3119 = vmatprep.mubr.msk.bf16.mxu0 %vm912_vm0, %v3409_v1 }
  0xd8   : > { %3120 = vmatmul.mubr.msk.bf16.vlgmr.msra.gmra.mxu0 %vm912_vm0, %v3410_v2 }
 0x198   : > { %v3121_v4 = vpop.f32.mrf.mxu0 }
 0x199   : > { %v972_v5 = vadd.f32 %v3121_v4, %v968_v3 }
 0x19a   : > { %v953_v6 = vpop.f32.mrf.mxu0 }
 0x19b   : > { %977 = vst.msk [vmem:[#allocation2 + $0x10] sm:$0xff] %vm974_vm1, %v972_v5  ;;  %v970_v8 = vadd.f32 %v968_v3, %v953_v6 }
 0x19c   : > { %v3122_v9 = vpop.f32.mrf.mxu0 }
 0x19d   : > { %975 = vst.msk [vmem:[#allocation2] sm:$0xff] %vm974_vm1, %v970_v8  ;;  %v973_v10 = vadd.f32 %v3122_v9, %v969_v7 }
 0x19e   : > { %v956_v11 = vpop.f32.mrf.mxu0 }
 0x19f   : > { %978 = vst.msk [vmem:[#allocation2 + $0x18] sm:$0xff] %vm974_vm1, %v973_v10  ;;  %v971_v12 = vadd.f32 %v969_v7, %v956_v11 }
 0x1a1   : > { %976 = vst.msk [vmem:[#allocation2 + $0x8] sm:$0xff] %vm974_vm1, %v971_v12 }
 0x1a2 PF: > { %v3411_v13 = vld [vmem:[%s4236_s0 + $0x8] sm:$0xff]   ;;  %v3412_v14 = vld [vmem:[%s4236_s0] sm:$0xff]   ;;  %vm1008_vm2 = vcmask 261120   ;;  %v981_v17 = vld [vmem:[#allocation2 + $0x10] sm:$0xff]  ;;  %v3882_v21 = vmov 0.0   ;;  %vm3883_vm3 = vmmov 0  }
 0x1a3   : > { %3123 = vmatprep.subr.bf16.mxu1 %v3411_v13  ;;  %3137 = vmatprep.subr.bf16.mxu0 %v3882_v21  ;;  %s4620_s20 = scalar_lea.vmem [#allocation7], %s4223_s27  ;;  %s3884_s29 = smov 96   ;;  %vm1073_vm4 = vcmask 64512   ;;  %vm1175_vm5 = vcmask 130048   ;;  %vm1572_vm6 = vcmask 1043456   ;;  %vm2518_vm7 = vcmask 523264  }
 0x1a4   : > { %v979_v15 = vld [vmem:[#allocation2] sm:$0xff]  ;;  %3124 = vmatpush3.bf16.msra.mxu1 %v3411_v13  ;;  %3139 = vmatprep.mubr.msk.bf16.mxu0 %vm3883_vm3, %v3882_v21  ;;  %s3885_s0 = smov 64   ;;  %s3886_s8 = smov 88  }
 0x1a5   : > { %3125 = vmatprep.subr.bf16.mxu1 %v3412_v14  ;;  %v2993_v25 = vld [vmem:[%s4620_s20] ss:$0 sm:$0xff]  ;;  %s3887_s15 = smov 120   ;;  %s3888_s28 = smov 56  }
 0x1a6   : > { %v982_v19 = vld [vmem:[#allocation2 + $0x18] sm:$0xff]  ;;  %s3889_s21 = smov 80   ;;  %s3890_s30 = smov 112  }
 0x1a7   : > { %v984_v20 = vpack.c.bf16 %v982_v19, %v981_v17  ;;  %s3891_s19 = smov 48   ;;  %s3892_s24 = smov 72  }
 0x1a8   : > { %v980_v16 = vld [vmem:[#allocation2 + $0x8] sm:$0xff]  ;;  %3126 = vmatpush3.bf16.msra.mxu1 %v3412_v14  ;;  %s3893_s1 = smov 104   ;;  %s3894_s20 = smov 40  }
 0x1a9   : > { %v983_v18 = vpack.c.bf16 %v980_v16, %v979_v15  ;;  %3131 = vmatprep.subr.bf16.mxu1 %v3882_v21  ;;  %s4621_s27 = sld [smem:[#allocation21_spill]] }
 0x1ab   : > { %3127 = vmatprep.mubr.msk.bf16.mxu1 %vm1008_vm2, %v983_v18 }
 0x1ac   : > { %3128 = vmatmul.mubr.msk.bf16.vlgmr.msra.gmra.mxu1 %vm1008_vm2, %v984_v20 }
 0x1ad   : > { %3133 = vmatprep.mubr.msk.bf16.mxu1 %vm3883_vm3, %v3882_v21 }
 0x1af   : > { %p3039_p3 = scmp.ne.s32.totalorder %s4621_s27, 1 }
 0x26c   : > { %v3129_v22 = vpop.f32.mrf.mxu1 }
 0x26d   : > { %v1058_v31 = vadd.f32 %v3129_v22, %v2993_v25 }
 0x26e   : > { %v1049_v23 = vpop.f32.mrf.mxu1 }
 0x26f   : > { %v1050_v27 = vadd.f32 %v2993_v25, %v1049_v23 }
 0x270   : > { %v3130_v24 = vpop.f32.mrf.mxu1 }
 0x271   : > { %v1061_v29 = vadd.f32 %v3130_v24, %v2993_v25 }
 0x272   : > { %v1052_v26 = vpop.f32.mrf.mxu1 }
 0x273   : > { %v1053_v28 = vadd.f32 %v2993_v25, %v1052_v26  ;;  %v4279_v32 = vpack.c.bf16 %v1061_v29, %v1058_v31 }
 0x275   : > { %v4276_v30 = vpack.c.bf16 %v1053_v28, %v1050_v27 }
 0x277   : > { %1071 = vrot.lane.b32.xlu0 %v4276_v30, %s3884_s29 }
 0x27b   : > { %1122 = vrot.lane.b32.xlu0 %v4279_v32, %s3884_s29 }
 0x2e9   : > { %v1072_v33 = vpop.permute.xlu0 %1071 }
 0x2ea   : > { %v1078_v34 = vsel %vm1073_vm4, %v1072_v33, 0 }
 0x2eb   : > { %3132 = vmatpush3.bf16.xpose.msra.mxu1 %v1078_v34 }
 0x2ec   : > { %3143 = vmatprep.subr.bf16.mxu1 %v3882_v21 }
 0x2ed   : > { %v1123_v35 = vpop.permute.xlu0 %1122 }
 0x2ee   : > { %v1128_v36 = vsel %vm1073_vm4, %v1123_v35, 0 }
 0x2ef   : > { %3138 = vmatpush3.bf16.xpose.msra.mxu0 %v1128_v36 }
 0x2f0   : > { %3149 = vmatprep.subr.bf16.mxu0 %v3882_v21 }
 0x2f2   : > { %3134 = vmatmul.mubr.msk.bf16.vlgmr.msra.gmra.mxu1 %vm1073_vm4, %v4276_v30 }
 0x2f3   : > { %3145 = vmatprep.mubr.msk.bf16.mxu1 %vm3883_vm3, %v3882_v21 }
 0x2f6   : > { %3140 = vmatmul.mubr.msk.bf16.vlgmr.msra.gmra.mxu0 %vm1073_vm4, %v4279_v32 }
 0x2f7   : > { %3151 = vmatprep.mubr.msk.bf16.mxu0 %vm3883_vm3, %v3882_v21 }
 0x3b2   : > { %v1114_v37 = vpop.f32.mrf.mxu1 }
 0x3b3   : > { %v1171_v38 = vmul.f32 0.35355338, %v1114_v37 }
 0x3b4   : > { %v3135_v39 = vpop.f32.mrf.mxu1 }
 0x3b5   : > { %v1176_v40 = vsel %vm1175_vm5, %v1171_v38, -inf }
 0x3b6   : > { %1177 = vmax.xlane.f32.xlu1 %v1176_v40  ;;  %v1117_v41 = vpop.f32.mrf.mxu1  ;;  %v1164_v42 = vpop.f32.mrf.mxu0 }
 0x3b7   : > { %v1172_v43 = vmul.f32 0.35355338, %v1117_v41  ;;  %v1173_v44 = vmul.f32 0.35355338, %v1164_v42 }
 0x3b8   : > { %v3136_v45 = vpop.f32.mrf.mxu1  ;;  %v3141_v46 = vpop.f32.mrf.mxu0 }
 0x3b9   : > { %v1179_v47 = vsel %vm1175_vm5, %v1172_v43, -inf  ;;  %v1182_v48 = vsel %vm1175_vm5, %v1173_v44, -inf }
 0x3ba   : > { %1180 = vmax.xlane.f32.xlu1 %v1179_v47  ;;  %1183 = vmax.xlane.f32.xlu0 %v1182_v48  ;;  %v1167_v49 = vpop.f32.mrf.mxu0 }
 0x3bb   : > { %v1174_v50 = vmul.f32 0.35355338, %v1167_v49 }
 0x3bc   : > { %v3142_v51 = vpop.f32.mrf.mxu0 }
 0x3bd   : > { %v1185_v52 = vsel %vm1175_vm5, %v1174_v50, -inf }
 0x3be   : > { %1186 = vmax.xlane.f32.xlu1 %v1185_v52 }
 0x3cf   : > { %1222 = vrot.lane.b32.xlu1 %v4276_v30, %s3885_s0 }
 0x3d0   : > { %1269 = vrot.lane.b32.xlu0 %v4279_v32, %s3885_s0 }
 0x3d3   : > { %1320 = vrot.lane.b32.xlu1 %v4276_v30, %s3886_s8 }
 0x3d7   : > { %1371 = vrot.lane.b32.xlu1 %v4279_v32, %s3886_s8 }
 0x43f   : > { %v1178_v53 = vpop.xlane.xlu1 %1177 }
 0x440   : > { %v1188_v54 = vsub.f32 %v1171_v38, %v1178_v53 }
 0x442   : > { %v1192_v59 = vmul.f32 1.442695, %v1188_v54 }
 0x443   : > { %v1181_v55 = vpop.xlane.xlu1 %1180  ;;  %v1184_v56 = vpop.xlane.xlu0 %1183 }
 0x444   : > { %v1190_v57 = vsub.f32 %v1173_v44, %v1184_v56  ;;  %v1189_v63 = vsub.f32 %v1172_v43, %v1181_v55 }
 0x446   : > { %v1196_v58 = vmul.f32 1.442695, %v1190_v57  ;;  %v1194_v2 = vmul.f32 1.442695, %v1189_v63 }
 0x447   : > { %v1270_v60 = vpop.permute.xlu0 %1269  ;;  %v1187_v61 = vpop.xlane.xlu1 %1186 }
 0x448   : > { %v1191_v62 = vsub.f32 %v1174_v50, %v1187_v61  ;;  %3150 = vmatpush3.bf16.msra.mxu0 %v1270_v60  ;;  %3419 = vpow2.f32 %v1196_v58 }
 0x449   : > { %3161 = vmatprep.subr.bf16.mxu0 %v3882_v21  ;;  %3421 = vpow2.f32 %v1192_v59 }
 0x44a   : > { %v1198_v0 = vmul.f32 1.442695, %v1191_v62 }
 0x44b   : > { %v1223_v1 = vpop.permute.xlu1 %1222 }
 0x44c   : > { %3144 = vmatpush3.bf16.msra.mxu1 %v1223_v1  ;;  %3423 = vpow2.f32 %v1198_v0 }
 0x44d   : > { %3155 = vmatprep.subr.bf16.mxu1 %v3882_v21  ;;  %3425 = vpow2.f32 %v1194_v2 }
 0x44f   : > { %v1321_v11 = vpop.permute.xlu1 %1320 }
 0x450   : > { %v1326_v31 = vsel %vm1073_vm4, %v1321_v11, 0 }
 0x453   : > { %v1372_v12 = vpop.permute.xlu1 %1371 }
 0x454   : > { %v1377_v25 = vsel %vm1073_vm4, %v1372_v12, 0 }
 0x455   : > { %v3420_v3 = vpop.eup %3419 }
 0x456   : > { %v1206_v4 = vsel %vm1175_vm5, %v3420_v3, 0.0  ;;  %v3422_v5 = vpop.eup %3421 }
 0x457   : > { %1207 = vadd.xlane.f32.xlu1 %v1206_v4  ;;  %v1200_v6 = vsel %vm1175_vm5, %v3422_v5, 0.0 }
 0x459   : > { %v3424_v7 = vpop.eup %3423 }
 0x45a   : > { %v1209_v8 = vsel %vm1175_vm5, %v3424_v7, 0.0  ;;  %v3426_v9 = vpop.eup %3425 }
 0x45b   : > { %1201 = vadd.xlane.f32.xlu1 %v1200_v6  ;;  %v1203_v10 = vsel %vm1175_vm5, %v3426_v9, 0.0 }
 0x45f   : > { %1210 = vadd.xlane.f32.xlu1 %v1209_v8 }
 0x463   : > { %1204 = vadd.xlane.f32.xlu1 %v1203_v10 }
 0x474   : > { %1318 = vrot.lane.b32.xlu1 %v4276_v30, %s3887_s15 }
 0x478   : > { %1369 = vrot.lane.b32.xlu1 %v4279_v32, %s3887_s15 }
 0x4e0   : > { %v1208_v13 = vpop.xlane.xlu1 %1207 }
 0x4e1   : > { %3427 = vrcp.f32 %v1208_v13 }
 0x4e4   : > { %v1202_v14 = vpop.xlane.xlu1 %1201 }
 0x4e8   : > { %v1211_v15 = vpop.xlane.xlu1 %1210 }
 0x4e9   : > { %3429 = vrcp.f32 %v1211_v15 }
 0x4ea   : > { %3431 = vrcp.f32 %v1202_v14 }
 0x4ec   : > { %v1205_v16 = vpop.xlane.xlu1 %1204 }
 0x4ed   : > { %3433 = vrcp.f32 %v1205_v16 }
 0x4ee   : > { %v3428_v17 = vpop.eup %3427 }
 0x4ef   : > { %v1218_v19 = vmul.f32 %v3428_v17, %v3420_v3 }
 0x4f0   : > { %v1319_v28 = vpop.permute.xlu1 %1318 }
 0x4f4   : > { %v1370_v33 = vpop.permute.xlu1 %1369 }
 0x4f6   : > { %v3430_v18 = vpop.eup %3429 }
 0x4f7   : > { %v1219_v20 = vmul.f32 %v3430_v18, %v3424_v7  ;;  %v3432_v22 = vpop.eup %3431 }
 0x4f8   : > { %v1216_v26 = vmul.f32 %v3432_v22, %v3422_v5  ;;  %v1064_v22 = vld [vmem:[%s4241_s6] sm:$0xf] }
 0x4f9   : > { %v1221_v23 = vpack.c.bf16 %v1219_v20, %v1218_v19 }
 0x4fa   : > { %v3434_v24 = vpop.eup %3433 }
 0x4fb   : > { %3152 = vmatmul.mubr.msk.bf16.vlgmr.msra.gmra.mxu0 %vm1175_vm5, %v1221_v23  ;;  %v1217_v27 = vmul.f32 %v3434_v24, %v3426_v9 }
 0x4fc   : > { %3162 = vmatpush3.bf16.xpose.msra.mxu0 %v1377_v25  ;;  %3163 = vmatprep.mubr.msk.bf16.mxu0 %vm3883_vm3, %v3882_v21 }
 0x4fd   : > { %v1220_v29 = vpack.c.bf16 %v1217_v27, %v1216_v26  ;;  %3173 = vmatprep.subr.bf16.mxu0 %v3882_v21 }
 0x4ff   : > { %3146 = vmatmul.mubr.msk.bf16.vlgmr.msra.gmra.mxu1 %vm1175_vm5, %v1220_v29 }
 0x500   : > { %3156 = vmatpush3.bf16.xpose.msra.mxu1 %v1326_v31  ;;  %3157 = vmatprep.mubr.msk.bf16.mxu1 %vm3883_vm3, %v3882_v21  ;;  %v1632_v31 = vsel %vm1572_vm6, %v1064_v22, 0 }
 0x501   : > { %3167 = vmatprep.subr.bf16.mxu1 %v3882_v21 }
 0x503   : > { %3164 = vmatmul.mubr.msk.bf16.vlgmr.msra.gmra.mxu0 %vm1073_vm4, %v1370_v33 }
 0x504   : > { %3175 = vmatprep.mubr.msk.bf16.mxu0 %vm3883_vm3, %v3882_v21 }
 0x507   : > { %3158 = vmatmul.mubr.msk.bf16.vlgmr.msra.gmra.mxu1 %vm1073_vm4, %v1319_v28 }
 0x508   : > { %3169 = vmatprep.mubr.msk.bf16.mxu1 %vm3883_vm3, %v3882_v21 }
 0x5bb   : > { %v4326_v34 = vpop.f32.mrf.mxu0 }
 0x5bd   : > { %v3153_v35 = vpop.f32.mrf.mxu0 }
 0x5bf   : > { %v4328_v36 = vpop.f32.mrf.mxu1  ;;  %v4330_v37 = vpop.f32.mrf.mxu0 }
 0x5c0   : > { %v1317_v38 = vpack.c.bf16 %v4330_v37, %v4326_v34 }
 0x5c1   : > { %v3147_v39 = vpop.f32.mrf.mxu1  ;;  %v3154_v40 = vpop.f32.mrf.mxu0 }
 0x5c3   : > { %v4334_v41 = vpop.f32.mrf.mxu1  ;;  %v1413_v42 = vpop.f32.mrf.mxu0 }
 0x5c4   : > { %v1316_v43 = vpack.c.bf16 %v4334_v41, %v4328_v36  ;;  %v1422_v51 = vmul.f32 0.35355338, %v1413_v42  ;;  %v1065_v41 = vld [vmem:[%s4241_s6 + $0x4] sm:$0xf] }
 0x5c5   : > { %v3148_v44 = vpop.f32.mrf.mxu1  ;;  %v3165_v45 = vpop.f32.mrf.mxu0 }
 0x5c6   : > { %v1430_v58 = vsel %vm1175_vm5, %v1422_v51, -inf }
 0x5c7   : > { %v1362_v46 = vpop.f32.mrf.mxu1  ;;  %v1416_v47 = vpop.f32.mrf.mxu0 }
 0x5c8   : > { %v1420_v48 = vmul.f32 0.35355338, %v1362_v46  ;;  %v1423_v56 = vmul.f32 0.35355338, %v1416_v47 }
 0x5c9   : > { %v3159_v49 = vpop.f32.mrf.mxu1  ;;  %v3166_v50 = vpop.f32.mrf.mxu0 }
 0x5ca   : > { %v1424_v52 = vsel %vm1175_vm5, %v1420_v48, -inf  ;;  %v1433_v59 = vsel %vm1175_vm5, %v1423_v56, -inf }
 0x5cb   : > { %1425 = vmax.xlane.f32.xlu0 %v1424_v52  ;;  %v1365_v53 = vpop.f32.mrf.mxu1 }
 0x5cc   : > { %v1421_v54 = vmul.f32 0.35355338, %v1365_v53 }
 0x5cd   : > { %v3160_v55 = vpop.f32.mrf.mxu1 }
 0x5ce   : > { %v1427_v57 = vsel %vm1175_vm5, %v1421_v54, -inf }
 0x5cf   : > { %1428 = vmax.xlane.f32.xlu1 %v1427_v57  ;;  %1431 = vmax.xlane.f32.xlu0 %v1430_v58 }
 0x5d3   : > { %1434 = vmax.xlane.f32.xlu0 %v1433_v59 }
 0x654   : > { %v1426_v60 = vpop.xlane.xlu0 %1425 }
 0x655   : > { %v1436_v61 = vsub.f32 %v1420_v48, %v1426_v60 }
 0x657   : > { %v1440_v3 = vmul.f32 1.442695, %v1436_v61 }
 0x658   : > { %v1429_v62 = vpop.xlane.xlu1 %1428  ;;  %v1432_v63 = vpop.xlane.xlu0 %1431 }
 0x659   : > { %v1438_v0 = vsub.f32 %v1422_v51, %v1432_v63  ;;  %v1437_v1 = vsub.f32 %v1421_v54, %v1429_v62 }
 0x65b   : > { %v1444_v2 = vmul.f32 1.442695, %v1438_v0  ;;  %v1442_v6 = vmul.f32 1.442695, %v1437_v1 }
 0x65c   : > { %v1435_v4 = vpop.xlane.xlu0 %1434 }
 0x65d   : > { %v1439_v5 = vsub.f32 %v1423_v56, %v1435_v4  ;;  %3435 = vpow2.f32 %v1444_v2 }
 0x65e   : > { %3437 = vpow2.f32 %v1440_v3 }
 0x65f   : > { %v1446_v7 = vmul.f32 1.442695, %v1439_v5 }
 0x661   : > { %3439 = vpow2.f32 %v1446_v7 }
 0x662   : > { %3441 = vpow2.f32 %v1442_v6 }
 0x66a   : > { %v3436_v8 = vpop.eup %3435 }
 0x66b   : > { %v1454_v9 = vsel %vm1175_vm5, %v3436_v8, 0.0  ;;  %v3438_v10 = vpop.eup %3437 }
 0x66c   : > { %1455 = vadd.xlane.f32.xlu1 %v1454_v9  ;;  %v1448_v14 = vsel %vm1175_vm5, %v3438_v10, 0.0 }
 0x66e   : > { %v3440_v11 = vpop.eup %3439 }
 0x66f   : > { %v1457_v12 = vsel %vm1175_vm5, %v3440_v11, 0.0  ;;  %v3442_v13 = vpop.eup %3441 }
 0x670   : > { %1458 = vadd.xlane.f32.xlu0 %v1457_v12  ;;  %1449 = vadd.xlane.f32.xlu1 %v1448_v14  ;;  %v1451_v15 = vsel %vm1175_vm5, %v3442_v13, 0.0 }
 0x674   : > { %1452 = vadd.xlane.f32.xlu0 %v1451_v15 }
 0x681   : > { %1470 = vrot.lane.b32.xlu1 %v4276_v30, %s3888_s28 }
 0x685   : > { %1685 = vrot.lane.b32.xlu1 %v4276_v30, %s3889_s21 }
 0x689   : > { %1736 = vrot.lane.b32.xlu1 %v4279_v32, %s3889_s21 }
 0x68a   : > { %1517 = vrot.lane.b32.xlu0 %v4279_v32, %s3888_s28 }
 0x68d   : > { %1734 = vrot.lane.b32.xlu1 %v4279_v32, %s3890_s30 }
 0x68e   : > { %1683 = vrot.lane.b32.xlu0 %v4276_v30, %s3890_s30 }
 0x6f5   : > { %v1456_v16 = vpop.xlane.xlu1 %1455 }
 0x6f6   : > { %3443 = vrcp.f32 %v1456_v16 }
 0x6f9   : > { %v1459_v17 = vpop.xlane.xlu0 %1458  ;;  %v1450_v18 = vpop.xlane.xlu1 %1449 }
 0x6fa   : > { %3445 = vrcp.f32 %v1459_v17 }
 0x6fb   : > { %3447 = vrcp.f32 %v1450_v18 }
 0x6fd   : > { %v1453_v19 = vpop.xlane.xlu0 %1452  ;;  %v1471_v20 = vpop.permute.xlu1 %1470 }
 0x6fe   : > { %3449 = vrcp.f32 %v1453_v19  ;;  %3168 = vmatpush3.bf16.msra.mxu1 %v1471_v20 }
 0x6ff   : > { %3271 = vmatprep.subr.msk.bf16.mxu1 %vm1572_vm6, %v1065_v41 }
 0x701   : > { %v1518_v23 = vpop.permute.xlu0 %1517  ;;  %v1686_v35 = vpop.permute.xlu1 %1685 }
 0x702   : > { %3174 = vmatpush3.bf16.msra.mxu0 %v1518_v23  ;;  %v1691_v55 = vsel %vm1073_vm4, %v1686_v35, 0 }
 0x703   : > { %3272 = vmatprep.subr.msk.bf16.mxu0 %vm1572_vm6, %v1064_v22  ;;  %v3444_v24 = vpop.eup %3443 }
 0x704   : > { %v1466_v26 = vmul.f32 %v3444_v24, %v3436_v8 }
 0x705   : > { %v1737_v44 = vpop.permute.xlu1 %1736  ;;  %v1684_v60 = vpop.permute.xlu0 %1683 }
 0x706   : > { %v1742_v45 = vsel %vm1073_vm4, %v1737_v44, 0 }
 0x707   : > { %v3446_v25 = vpop.eup %3445 }
 0x708   : > { %v1467_v27 = vmul.f32 %v3446_v25, %v3440_v11  ;;  %v3448_v28 = vpop.eup %3447 }
 0x709   : > { %v1464_v39 = vmul.f32 %v3448_v28, %v3438_v10  ;;  %v1735_v36 = vpop.permute.xlu1 %1734 }
 0x70a   : > { %v1469_v29 = vpack.c.bf16 %v1467_v27, %v1466_v26 }
 0x70b   : > { %v3450_v33 = vpop.eup %3449 }
 0x70c   : > { %3176 = vmatmul.mubr.msk.bf16.vlgmr.msra.gmra.mxu0 %vm1175_vm5, %v1469_v29  ;;  %v1465_v40 = vmul.f32 %v3450_v33, %v3442_v13 }
 0x70d   : > { %3187 = vmatprep.mubr.msk.bf16.mxu0 %vm1073_vm4, %v1316_v43  ;;  %3186 = vmatpush3.bf16.msra.mxu0 %v1632_v31  ;;  %v1574_v43 = vsel %vm1572_vm6, %v1065_v41, 0 }
 0x70e   : > { %v1468_v42 = vpack.c.bf16 %v1465_v40, %v1464_v39  ;;  %3197 = vmatprep.subr.bf16.mxu0 %v3882_v21 }
 0x710   : > { %3170 = vmatmul.mubr.msk.bf16.vlgmr.msra.gmra.mxu1 %vm1175_vm5, %v1468_v42 }
 0x711   : > { %3180 = vmatpush3.bf16.msra.mxu1 %v1574_v43 }
 0x712   : > { %3191 = vmatprep.subr.bf16.mxu1 %v3882_v21 }
 0x714   : > { %3188 = vmatmul.mubr.msk.bf16.vlgmr.msra.gmra.mxu0 %vm1073_vm4, %v1317_v38 }
 0x715   : > { %3198 = vmatpush3.bf16.xpose.msra.mxu0 %v1742_v45  ;;  %3199 = vmatprep.mubr.msk.bf16.mxu0 %vm3883_vm3, %v3882_v21 }
 0x716   : > { %3209 = vmatprep.subr.bf16.mxu0 %v3882_v21 }
 0x71c   : > { %3200 = vmatmul.mubr.msk.bf16.vlgmr.msra.gmra.mxu0 %vm1073_vm4, %v1735_v36 }
 0x71d   : > { %3211 = vmatprep.mubr.msk.bf16.mxu0 %vm3883_vm3, %v3882_v21 }
 0x7cc   : > { %v1557_v34 = vpop.f32.mrf.mxu0 }
 0x7ce   : > { %v3177_v37 = vpop.f32.mrf.mxu0 }
 0x7d0   : > { %v1510_v38 = vpop.f32.mrf.mxu1  ;;  %v1560_v46 = vpop.f32.mrf.mxu0 }
 0x7d1   : > { %v1565_v52 = vpack.c.bf16 %v1560_v46, %v1557_v34 }
 0x7d2   : > { %v3171_v47 = vpop.f32.mrf.mxu1  ;;  %v3178_v48 = vpop.f32.mrf.mxu0 }
 0x7d4   : > { %v1513_v49 = vpop.f32.mrf.mxu1  ;;  %v4377_v50 = vpop.f32.mrf.mxu0 }
 0x7d5   : > { %v1564_v51 = vpack.c.bf16 %v1513_v49, %v1510_v38 }
 0x7d6   : > { %v3172_v53 = vpop.f32.mrf.mxu1  ;;  %v4379_v54 = vpop.f32.mrf.mxu0 }
 0x7d7   : > { %3181 = vmatprep.mubr.msk.bf16.mxu1 %vm1073_vm4, %v1564_v51 }
 0x7d8   : > { %3182 = vmatmul.mubr.msk.bf16.vlgmr.msra.gmra.mxu1 %vm1073_vm4, %v1565_v52  ;;  %v4384_v56 = vpop.f32.mrf.mxu0 }
 0x7d9   : > { %3192 = vmatpush3.bf16.xpose.msra.mxu1 %v1691_v55  ;;  %3193 = vmatprep.mubr.msk.bf16.mxu1 %vm3883_vm3, %v3882_v21 }
 0x7da   : > { %v4388_v57 = vpop.f32.mrf.mxu0  ;;  %3203 = vmatprep.subr.bf16.mxu1 %v3882_v21 }
 0x7dc   : > { %v1778_v58 = vpop.f32.mrf.mxu0 }
 0x7dd   : > { %v1787_v6 = vmul.f32 0.35355338, %v1778_v58 }
 0x7de   : > { %v3201_v59 = vpop.f32.mrf.mxu0 }
 0x7df   : > { %v1795_v13 = vsel %vm1175_vm5, %v1787_v6, -inf }
 0x7e0   : > { %3194 = vmatmul.mubr.msk.bf16.vlgmr.msra.gmra.mxu1 %vm1073_vm4, %v1684_v60  ;;  %v1781_v61 = vpop.f32.mrf.mxu0 }
 0x7e1   : > { %3205 = vmatprep.mubr.msk.bf16.mxu1 %vm3883_vm3, %v3882_v21  ;;  %v1788_v11 = vmul.f32 0.35355338, %v1781_v61  ;;  %v1066_v61 = vld [vmem:[%s4241_s6 + $0x8] sm:$0xf] }
 0x7e2   : > { %v3202_v62 = vpop.f32.mrf.mxu0 }
 0x7e3   : > { %v1798_v14 = vsel %vm1175_vm5, %v1788_v11, -inf  ;;  %v1938_v62 = vsel %vm1572_vm6, %v1066_v61, 0 }
 0x898   : > { %v4394_v63 = vpop.f32.mrf.mxu1 }
 0x89a   : > { %v4396_v0 = vpop.f32.mrf.mxu1 }
 0x89c   : > { %v4398_v1 = vpop.f32.mrf.mxu1 }
 0x89e   : > { %v4400_v2 = vpop.f32.mrf.mxu1 }
 0x8a0   : > { %v1727_v3 = vpop.f32.mrf.mxu1 }
 0x8a1   : > { %v1785_v4 = vmul.f32 0.35355338, %v1727_v3 }
 0x8a2   : > { %v3195_v5 = vpop.f32.mrf.mxu1 }
 0x8a3   : > { %v1789_v7 = vsel %vm1175_vm5, %v1785_v4, -inf }
 0x8a4   : > { %1790 = vmax.xlane.f32.xlu0 %v1789_v7  ;;  %v1730_v8 = vpop.f32.mrf.mxu1 }
 0x8a5   : > { %v1786_v9 = vmul.f32 0.35355338, %v1730_v8 }
 0x8a6   : > { %v3196_v10 = vpop.f32.mrf.mxu1 }
 0x8a7   : > { %v1792_v12 = vsel %vm1175_vm5, %v1786_v9, -inf }
 0x8a8   : > { %1793 = vmax.xlane.f32.xlu1 %v1792_v12  ;;  %1796 = vmax.xlane.f32.xlu0 %v1795_v13 }
 0x8ac   : > { %1799 = vmax.xlane.f32.xlu0 %v1798_v14 }
 0x92d   : > { %v1791_v15 = vpop.xlane.xlu0 %1790 }
 0x92e   : > { %v1801_v16 = vsub.f32 %v1785_v4, %v1791_v15 }
 0x930   : > { %v1805_v23 = vmul.f32 1.442695, %v1801_v16 }
 0x931   : > { %v1794_v17 = vpop.xlane.xlu1 %1793  ;;  %v1797_v18 = vpop.xlane.xlu0 %1796 }
 0x932   : > { %v1803_v19 = vsub.f32 %v1787_v6, %v1797_v18  ;;  %v1802_v20 = vsub.f32 %v1786_v9, %v1794_v17 }
 0x934   : > { %v1809_v22 = vmul.f32 1.442695, %v1803_v19  ;;  %v1807_v26 = vmul.f32 1.442695, %v1802_v20 }
 0x935   : > { %v1800_v24 = vpop.xlane.xlu0 %1799 }
 0x936   : > { %v1804_v25 = vsub.f32 %v1788_v11, %v1800_v24  ;;  %3451 = vpow2.f32 %v1809_v22 }
 0x937   : > { %3453 = vpow2.f32 %v1805_v23 }
 0x938   : > { %v1811_v27 = vmul.f32 1.442695, %v1804_v25 }
 0x93a   : > { %3455 = vpow2.f32 %v1811_v27 }
 0x93b   : > { %3457 = vpow2.f32 %v1807_v26 }
 0x943   : > { %v3452_v28 = vpop.eup %3451 }
 0x944   : > { %v1819_v29 = vsel %vm1175_vm5, %v3452_v28, 0.0  ;;  %v3454_v31 = vpop.eup %3453 }
 0x945   : > { %1820 = vadd.xlane.f32.xlu1 %v1819_v29  ;;  %v1813_v40 = vsel %vm1175_vm5, %v3454_v31, 0.0 }
 0x947   : > { %v3456_v33 = vpop.eup %3455 }
 0x948   : > { %v1822_v35 = vsel %vm1175_vm5, %v3456_v33, 0.0  ;;  %v3458_v39 = vpop.eup %3457 }
 0x949   : > { %1823 = vadd.xlane.f32.xlu0 %v1822_v35  ;;  %1814 = vadd.xlane.f32.xlu1 %v1813_v40  ;;  %v1816_v42 = vsel %vm1175_vm5, %v3458_v39, 0.0  ;;  %v1677_v35 = vadd.f32 %v4377_v50, %v4394_v63 }
 0x94d   : > { %1817 = vadd.xlane.f32.xlu0 %v1816_v42  ;;  %v1669_v42 = vadd.f32 %v4379_v54, %v4396_v0 }
 0x95a   : > { %1835 = vrot.lane.b32.xlu1 %v4276_v30, %s3891_s19 }
 0x95e   : > { %1995 = vrot.lane.b32.xlu1 %v4276_v30, %s3892_s24 }
 0x962   : > { %2046 = vrot.lane.b32.xlu1 %v4279_v32, %s3892_s24 }
 0x963   : > { %1882 = vrot.lane.b32.xlu0 %v4279_v32, %s3891_s19 }
 0x966   : > { %2044 = vrot.lane.b32.xlu1 %v4279_v32, %s3893_s1 }
 0x967   : > { %1993 = vrot.lane.b32.xlu0 %v4276_v30, %s3893_s1 }
 0x9ce   : > { %v1821_v44 = vpop.xlane.xlu1 %1820 }
 0x9cf   : > { %3459 = vrcp.f32 %v1821_v44 }
 0x9d2   : > { %v1824_v45 = vpop.xlane.xlu0 %1823  ;;  %v1815_v36 = vpop.xlane.xlu1 %1814 }
 0x9d3   : > { %3461 = vrcp.f32 %v1824_v45  ;;  %v1680_v45 = vadd.f32 %v4384_v56, %v4398_v1 }
 0x9d4   : > { %3463 = vrcp.f32 %v1815_v36 }
 0x9d6   : > { %v1818_v41 = vpop.xlane.xlu0 %1817  ;;  %v1836_v43 = vpop.permute.xlu1 %1835 }
 0x9d7   : > { %3465 = vrcp.f32 %v1818_v41  ;;  %3204 = vmatpush3.bf16.msra.mxu1 %v1836_v43  ;;  %v1672_v43 = vadd.f32 %v4388_v57, %v4400_v2 }
 0x9d8   : > { %3273 = vmatprep.subr.msk.bf16.mxu1 %vm1572_vm6, %v1066_v61 }
 0x9da   : > { %v1883_v34 = vpop.permute.xlu0 %1882  ;;  %v1996_v49 = vpop.permute.xlu1 %1995 }
 0x9db   : > { %3210 = vmatpush3.bf16.msra.mxu0 %v1883_v34  ;;  %v2001_v53 = vsel %vm1073_vm4, %v1996_v49, 0 }
 0x9dc   : > { %3221 = vmatprep.subr.bf16.mxu0 %v3882_v21  ;;  %v3460_v37 = vpop.eup %3459 }
 0x9dd   : > { %v1831_v46 = vmul.f32 %v3460_v37, %v3452_v28 }
 0x9de   : > { %v1994_v60 = vpop.permute.xlu0 %1993  ;;  %v2047_v11 = vpop.permute.xlu1 %2046 }
 0x9df   : > { %v2052_v18 = vsel %vm1073_vm4, %v2047_v11, 0 }
 0x9e0   : > { %v3462_v38 = vpop.eup %3461 }
 0x9e1   : > { %v1832_v47 = vmul.f32 %v3462_v38, %v3456_v33  ;;  %v3464_v48 = vpop.eup %3463 }
 0x9e2   : > { %v1829_v55 = vmul.f32 %v3464_v48, %v3454_v31  ;;  %v2045_v24 = vpop.permute.xlu1 %2044 }
 0x9e3   : > { %v1834_v51 = vpack.c.bf16 %v1832_v47, %v1831_v46 }
 0x9e4   : > { %v3466_v52 = vpop.eup %3465 }
 0x9e5   : > { %3212 = vmatmul.mubr.msk.bf16.vlgmr.msra.gmra.mxu0 %vm1175_vm5, %v1834_v51  ;;  %v1830_v58 = vmul.f32 %v3466_v52, %v3458_v39 }
 0x9e6   : > { %3222 = vmatpush3.bf16.xpose.msra.mxu0 %v2001_v53  ;;  %3223 = vmatprep.mubr.msk.bf16.mxu0 %vm3883_vm3, %v3882_v21 }
 0x9e7   : > { %v1833_v59 = vpack.c.bf16 %v1830_v58, %v1829_v55  ;;  %3233 = vmatprep.subr.bf16.mxu0 %v3882_v21 }
 0x9e9   : > { %3206 = vmatmul.mubr.msk.bf16.vlgmr.msra.gmra.mxu1 %vm1175_vm5, %v1833_v59 }
 0x9ea   : > { %3216 = vmatpush3.bf16.msra.mxu1 %v1938_v62 }
 0x9eb   : > { %3227 = vmatprep.subr.bf16.mxu1 %v3882_v21 }
 0x9ed   : > { %3224 = vmatmul.mubr.msk.bf16.vlgmr.msra.gmra.mxu0 %vm1073_vm4, %v1994_v60 }
 0x9ee   : > { %3235 = vmatprep.mubr.msk.bf16.mxu0 %vm3883_vm3, %v3882_v21 }
 0xaa5   : > { %v1922_v3 = vpop.f32.mrf.mxu0 }
 0xaa7   : > { %v3213_v4 = vpop.f32.mrf.mxu0 }
 0xaa9   : > { %v1875_v5 = vpop.f32.mrf.mxu1  ;;  %v1925_v6 = vpop.f32.mrf.mxu0 }
 0xaaa   : > { %v1930_v14 = vpack.c.bf16 %v1925_v6, %v1922_v3 }
 0xaab   : > { %v3207_v7 = vpop.f32.mrf.mxu1  ;;  %v3214_v8 = vpop.f32.mrf.mxu0 }
 0xaad   : > { %v1878_v9 = vpop.f32.mrf.mxu1  ;;  %v2037_v10 = vpop.f32.mrf.mxu0 }
 0xaae   : > { %v1929_v12 = vpack.c.bf16 %v1878_v9, %v1875_v5  ;;  %v2095_v13 = vmul.f32 0.35355338, %v2037_v10 }
 0xaaf   : > { %v3208_v15 = vpop.f32.mrf.mxu1  ;;  %v3225_v16 = vpop.f32.mrf.mxu0 }
 0xab0   : > { %3217 = vmatprep.mubr.msk.bf16.mxu1 %vm1073_vm4, %v1929_v12  ;;  %v2099_v17 = vsel %vm1175_vm5, %v2095_v13, -inf  ;;  %v1067_v16 = vld [vmem:[%s4241_s6 + $0xc] sm:$0xf] }
 0xab1   : > { %3218 = vmatmul.mubr.msk.bf16.vlgmr.msra.gmra.mxu1 %vm1073_vm4, %v1930_v14  ;;  %2100 = vmax.xlane.f32.xlu0 %v2099_v17  ;;  %v2040_v19 = vpop.f32.mrf.mxu0  ;;  %v2248_v17 = vsel %vm1572_vm6, %v1067_v16, 0 }
 0xab2   : > { %3228 = vmatpush3.bf16.xpose.msra.mxu1 %v2052_v18  ;;  %v2096_v20 = vmul.f32 0.35355338, %v2040_v19  ;;  %3229 = vmatprep.mubr.msk.bf16.mxu1 %vm3883_vm3, %v3882_v21 }
 0xab3   : > { %v3226_v22 = vpop.f32.mrf.mxu0  ;;  %3239 = vmatprep.subr.bf16.mxu1 %v3882_v21 }
 0xab4   : > { %v2102_v23 = vsel %vm1175_vm5, %v2096_v20, -inf }
 0xab5   : > { %2103 = vmax.xlane.f32.xlu1 %v2102_v23 }
 0xab9   : > { %3230 = vmatmul.mubr.msk.bf16.vlgmr.msra.gmra.mxu1 %vm1073_vm4, %v2045_v24 }
 0xaba   : > { %3241 = vmatprep.mubr.msk.bf16.mxu1 %vm3883_vm3, %v3882_v21 }
 0xb3a   : > { %v2101_v25 = vpop.xlane.xlu0 %2100 }
 0xb3b   : > { %v2111_v26 = vsub.f32 %v2095_v13, %v2101_v25 }
 0xb3d   : > { %v2115_v27 = vmul.f32 1.442695, %v2111_v26 }
 0xb3e   : > { %v2104_v31 = vpop.xlane.xlu1 %2103 }
 0xb3f   : > { %3467 = vpow2.f32 %v2115_v27  ;;  %v2112_v33 = vsub.f32 %v2096_v20, %v2104_v31 }
 0xb41   : > { %v2117_v39 = vmul.f32 1.442695, %v2112_v33  ;;  %v3022_v33 = vld [vmem:[%s702_s26] ss:$0 sm:$0xff] }
 0xb43   : > { %3469 = vpow2.f32 %v2117_v39 }
 0xb4c   : > { %v3468_v28 = vpop.eup %3467 }
 0xb4d   : > { %v2123_v29 = vsel %vm1175_vm5, %v3468_v28, 0.0 }
 0xb4e   : > { %2124 = vadd.xlane.f32.xlu1 %v2123_v29 }
 0xb50   : > { %v3470_v48 = vpop.eup %3469 }
 0xb51   : > { %v2126_v57 = vsel %vm1175_vm5, %v3470_v48, 0.0 }
 0xb71   : > { %v3219_v40 = vpop.f32.mrf.mxu1 }
 0xb72   : > { %v4446_v44 = vadd.f32 %v3219_v40, %v1677_v35 }
 0xb73   : > { %v1974_v21 = vpop.f32.mrf.mxu1 }
 0xb74   : > { %v4450_v36 = vadd.f32 %v1974_v21, %v1669_v42 }
 0xb75   : > { %v3220_v41 = vpop.f32.mrf.mxu1 }
 0xb76   : > { %v4454_v34 = vadd.f32 %v3220_v41, %v1680_v45 }
 0xb77   : > { %v1977_v50 = vpop.f32.mrf.mxu1 }
 0xb78   : > { %v4456_v63 = vadd.f32 %v1977_v50, %v1672_v43  ;;  %v3499_v50 = vld [vmem:[#allocation2] sm:$0xff] }
 0xb79   : > { %v2088_v37 = vpop.f32.mrf.mxu1 }
 0xb7a   : > { %v2097_v54 = vmul.f32 0.35355338, %v2088_v37 }
 0xb7b   : > { %v3231_v0 = vpop.f32.mrf.mxu1 }
 0xb7c   : > { %v2105_v38 = vsel %vm1175_vm5, %v2097_v54, -inf }
 0xb7d   : > { %v2091_v46 = vpop.f32.mrf.mxu1  ;;  %2106 = vmax.xlane.f32.xlu0 %v2105_v38 }
 0xb7e   : > { %v2098_v56 = vmul.f32 0.35355338, %v2091_v46 }
 0xb7f   : > { %v3232_v1 = vpop.f32.mrf.mxu1 }
 0xb80   : > { %v2108_v47 = vsel %vm1175_vm5, %v2098_v56, -inf }
 0xb81   : > { %2109 = vmax.xlane.f32.xlu0 %v2108_v47 }
 0xb85   : > { %2127 = vadd.xlane.f32.xlu0 %v2126_v57 }
 0xbd7   : > { %v2125_v3 = vpop.xlane.xlu1 %2124 }
 0xc06   : > { %v2107_v2 = vpop.xlane.xlu0 %2106 }
 0xc07   : > { %v2113_v49 = vsub.f32 %v2097_v54, %v2107_v2 }
 0xc09   : > { %v2119_v51 = vmul.f32 1.442695, %v2113_v49 }
 0xc0a   : > { %v2110_v52 = vpop.xlane.xlu0 %2109 }
 0xc0b   : > { %3471 = vpow2.f32 %v2119_v51  ;;  %v2114_v53 = vsub.f32 %v2098_v56, %v2110_v52  ;;  %v3501_v56 = vld [vmem:[#allocation2 + $0x8] sm:$0xff] }
 0xc0d   : > { %v2121_v55 = vmul.f32 1.442695, %v2114_v53 }
 0xc0e   : > { %v2128_v62 = vpop.xlane.xlu0 %2127 }
 0xc0f   : > { %3473 = vpow2.f32 %v2121_v55 }
 0xc10   : > { %3475 = vrcp.f32 %v2128_v62 }
 0xc11   : > { %3477 = vrcp.f32 %v2125_v3 }
 0xc18   : > { %v3472_v58 = vpop.eup %3471 }
 0xc19   : > { %v2129_v59 = vsel %vm1175_vm5, %v3472_v58, 0.0 }
 0xc1a   : > { %2130 = vadd.xlane.f32.xlu1 %v2129_v59 }
 0xc1c   : > { %v3474_v60 = vpop.eup %3473 }
 0xc1d   : > { %v2132_v61 = vsel %vm1175_vm5, %v3474_v60, 0.0  ;;  %v3476_v4 = vpop.eup %3475 }
 0xc1e   : > { %2133 = vadd.xlane.f32.xlu0 %v2132_v61  ;;  %v3478_v6 = vpop.eup %3477  ;;  %v2140_v7 = vmul.f32 %v3476_v4, %v3470_v48  ;;  %v3502_v48 = vld [vmem:[#allocation2 + $0x18] sm:$0xff] }
 0xc1f   : > { %v2139_v10 = vmul.f32 %v3478_v6, %v3468_v28 }
 0xc21   : > { %v2143_v11 = vpack.c.bf16 %v2140_v7, %v2139_v10 }
 0xc2b   : > { %2145 = vrot.lane.b32.xlu1 %v4276_v30, %s3894_s20 }
 0xc34   : > { %2192 = vrot.lane.b32.xlu0 %v4279_v32, %s3894_s20 }
 0xca3   : > { %v2131_v5 = vpop.xlane.xlu1 %2130 }
 0xca4   : > { %3479 = vrcp.f32 %v2131_v5 }
 0xca7   : > { %v2134_v8 = vpop.xlane.xlu0 %2133  ;;  %v2146_v9 = vpop.permute.xlu1 %2145 }
 0xca8   : > { %3481 = vrcp.f32 %v2134_v8  ;;  %3234 = vmatpush3.bf16.msra.mxu0 %v2146_v9 }
 0xca9   : > { %3274 = vmatprep.subr.msk.bf16.mxu0 %vm1572_vm6, %v1067_v16 }
 0xcab   : > { %v2193_v12 = vpop.permute.xlu0 %2192  ;;  %3236 = vmatmul.mubr.msk.bf16.vlgmr.msra.gmra.mxu0 %vm1175_vm5, %v2143_v11  ;;  %v3413_v11 = vld [vmem:[%s4251_s17 + $0x8] sm:$0xff]  }
 0xcac   : > { %3240 = vmatpush3.bf16.msra.mxu1 %v2193_v12  ;;  %3246 = vmatpush3.bf16.msra.mxu0 %v2248_v17  ;;  %v3414_v12 = vld [vmem:[%s4251_s17] sm:$0xff]  }
 0xcad   : > { %3251 = vmatprep.subr.bf16.mxu1 %v3413_v11 }
 0xcb1   : > { %v3480_v30 = vpop.eup %3479 }
 0xcb2   : > { %v2141_v13 = vmul.f32 %v3480_v30, %v3472_v58  ;;  %v3415_v30 = vld [vmem:[%s4246_s11 + $0x18] sm:$0xff]  }
 0xcb3   : > { %3259 = vmatprep.subr.bf16.mxu0 %v3415_v30 }
 0xcb5   : > { %v3482_v32 = vpop.eup %3481 }
 0xcb6   : > { %v2142_v14 = vmul.f32 %v3482_v32, %v3474_v60 }
 0xcb8   : > { %v2144_v15 = vpack.c.bf16 %v2142_v14, %v2141_v13 }
 0xcba   : > { %3242 = vmatmul.mubr.msk.bf16.vlgmr.msra.gmra.mxu1 %vm1175_vm5, %v2144_v15 }
 0xcbb   : > { %3252 = vmatpush3.bf16.msra.mxu1 %v3413_v11 }
 0xcbc   : > { %3253 = vmatprep.subr.bf16.mxu1 %v3414_v12 }
 0xcbf   : > { %3254 = vmatpush3.bf16.msra.mxu1 %v3414_v12 }
 0xd6b   : > { %v2185_v18 = vpop.f32.mrf.mxu0 }
 0xd6d   : > { %v3237_v19 = vpop.f32.mrf.mxu0 }
 0xd6f   : > { %v2188_v20 = vpop.f32.mrf.mxu0 }
 0xd70   : > { %v2239_v22 = vpack.c.bf16 %v2188_v20, %v2185_v18 }
 0xd71   : > { %v3238_v23 = vpop.f32.mrf.mxu0 }
 0xd72   : > { %3247 = vmatprep.mubr.msk.bf16.mxu0 %vm1073_vm4, %v2239_v22 }
 0xd7a   : > { %v2232_v24 = vpop.f32.mrf.mxu1 }
 0xd7c   : > { %v3243_v25 = vpop.f32.mrf.mxu1 }
 0xd7e   : > { %v2235_v26 = vpop.f32.mrf.mxu1 }
 0xd7f   : > { %v2240_v27 = vpack.c.bf16 %v2235_v26, %v2232_v24 }
 0xd80   : > { %v3244_v28 = vpop.f32.mrf.mxu1 }
 0xd81   : > { %3248 = vmatmul.mubr.msk.bf16.vlgmr.msra.gmra.mxu0 %vm1073_vm4, %v2240_v27  ;;  %v3023_v27 = vld [vmem:[%s710_s18] ss:$0 sm:$0xff] }
 0xd82   : > { %3260 = vmatpush3.bf16.msra.mxu0 %v3415_v30 }
 0xe41   : > { %v3249_v29 = vpop.f32.mrf.mxu0 }
 0xe42   : > { %v2301_v31 = vadd.f32 %v3249_v29, %v4446_v44  ;;  %v3500_v44 = vld [vmem:[#allocation2 + $0x10] sm:$0xff] }
 0xe43   : > { %v2284_v35 = vpop.f32.mrf.mxu0 }
 0xe44   : > { %v2299_v39 = vadd.f32 %v2284_v35, %v4450_v36  ;;  %v2312_v42 = vadd.f32 %v3022_v33, %v2301_v31 }
 0xe45   : > { %v3250_v40 = vpop.f32.mrf.mxu0 }
 0xe46   : > { %v2310_v21 = vadd.f32 %v3022_v33, %v2299_v39  ;;  %v2302_v45 = vadd.f32 %v3250_v40, %v4454_v34  ;;  %v2316_v46 = vadd.f32 %v3500_v44, %v2312_v42  ;;  %v3024_v39 = vld [vmem:[%s718_s16] ss:$0 sm:$0xff]  ;;  %v3416_v44 = vld [vmem:[%s4246_s11 + $0x10] sm:$0xff]  }
 0xe47   : > { %v2287_v41 = vpop.f32.mrf.mxu0  ;;  %3261 = vmatprep.subr.bf16.mxu0 %v3416_v44 }
 0xe48   : > { %v2300_v43 = vadd.f32 %v2287_v41, %v4456_v63  ;;  %v2314_v37 = vadd.f32 %v3499_v50, %v2310_v21  ;;  %v2313_v54 = vadd.f32 %v3022_v33, %v2302_v45  ;;  %v2324_v47 = vsel %vm1008_vm2, %v2316_v46, 0.0  ;;  %3262 = vmatpush3.bf16.msra.mxu0 %v3416_v44 }
 0xe4a   : > { %v2311_v0 = vadd.f32 %v3022_v33, %v2300_v43  ;;  %v2318_v38 = vsel %vm1008_vm2, %v2314_v37, 0.0  ;;  %v2317_v34 = vadd.f32 %v3502_v48, %v2313_v54 }
 0xe4b   : > { %2319 = vadd.xlane.f32.xlu1 %v2318_v38 }
 0xe4c   : > { %v2315_v1 = vadd.f32 %v3501_v56, %v2311_v0  ;;  %v2327_v63 = vsel %vm1008_vm2, %v2317_v34, 0.0  ;;  %v3418_v56 = vld [vmem:[%s4246_s11] sm:$0xff]  }
 0xe4e   : > { %v2321_v36 = vsel %vm1008_vm2, %v2315_v1, 0.0 }
 0xe4f   : > { %2322 = vadd.xlane.f32.xlu0 %v2321_v36  ;;  %2325 = vadd.xlane.f32.xlu1 %v2324_v47  ;;  %v3025_v47 = vld [vmem:[%s735_s25] ss:$0 sm:$0xff] }
 0xe53   : > { %2328 = vadd.xlane.f32.xlu0 %v2327_v63 }
 0xed4   : > { %v2320_v57 = vpop.xlane.xlu1 %2319 }
 0xed5   : > { %v2331_v2 = vmul.f32 0.03125, %v2320_v57 }
 0xed7   : > { %v2335_v49 = vsub.f32 %v2314_v37, %v2331_v2 }
 0xed8   : > { %v2323_v51 = vpop.xlane.xlu0 %2322  ;;  %v2326_v52 = vpop.xlane.xlu1 %2325 }
 0xed9   : > { %v2332_v53 = vmul.f32 0.03125, %v2323_v51  ;;  %v2333_v55 = vmul.f32 0.03125, %v2326_v52  ;;  %v2339_v58 = vmul.f32 %v2335_v49, %v2335_v49 }
 0xedb   : > { %v2336_v59 = vsub.f32 %v2315_v1, %v2332_v53  ;;  %v2337_v60 = vsub.f32 %v2316_v46, %v2333_v55  ;;  %v2343_v61 = vsel %vm1008_vm2, %v2339_v58, 0.0  ;;  %v3417_v46 = vld [vmem:[%s4246_s11 + $0x8] sm:$0xff]   ;;  %s4622_s11 = sld [smem:[#allocation34_spill]] (!%p3039_p3) }
 0xedc   : > { %v2329_v62 = vpop.xlane.xlu0 %2328  ;;  %2344 = vadd.xlane.f32.xlu1 %v2343_v61  ;;  %3263 = vmatprep.subr.bf16.mxu0 %v3417_v46  ;;  %v3030_v61 = vld [vmem:[%s743_s5] ss:$0 sm:$0xff] }
 0xedd   : > { %v2334_v3 = vmul.f32 0.03125, %v2329_v62  ;;  %v2340_v4 = vmul.f32 %v2336_v59, %v2336_v59  ;;  %v2341_v5 = vmul.f32 %v2337_v60, %v2337_v60  ;;  %3264 = vmatpush3.bf16.msra.mxu0 %v3417_v46 }
 0xede   : > { %3265 = vmatprep.subr.bf16.mxu0 %v3418_v56 }
 0xedf   : > { %v2338_v6 = vsub.f32 %v2317_v34, %v2334_v3  ;;  %v2346_v7 = vsel %vm1008_vm2, %v2340_v4, 0.0  ;;  %v2349_v8 = vsel %vm1008_vm2, %v2341_v5, 0.0 }
 0xee0   : > { %2347 = vadd.xlane.f32.xlu0 %v2346_v7  ;;  %2350 = vadd.xlane.f32.xlu1 %v2349_v8 }
 0xee1   : > { %v2342_v9 = vmul.f32 %v2338_v6, %v2338_v6  ;;  %3266 = vmatpush3.bf16.msra.mxu0 %v3418_v56 }
 0xee3   : > { %v2352_v10 = vsel %vm1008_vm2, %v2342_v9, 0.0 }
 0xee4   : > { %2353 = vadd.xlane.f32.xlu0 %v2352_v10 }
 0xf65   : > { %v2345_v32 = vpop.xlane.xlu1 %2344 }
 0xf66   : > { %v2355_v13 = vmul.f32 0.03125, %v2345_v32 }
 0xf68   : > { %v2359_v14 = vadd.f32 1e-05, %v2355_v13 }
 0xf69   : > { %v2348_v15 = vpop.xlane.xlu0 %2347  ;;  %v2351_v16 = vpop.xlane.xlu1 %2350 }
 0xf6a   : > { %3483 = vrsqrt.f32 %v2359_v14  ;;  %v2356_v17 = vmul.f32 0.03125, %v2348_v15  ;;  %v2357_v18 = vmul.f32 0.03125, %v2351_v16 }
 0xf6c   : > { %v2360_v19 = vadd.f32 1e-05, %v2356_v17  ;;  %v2361_v20 = vadd.f32 1e-05, %v2357_v18 }
 0xf6d   : > { %v2354_v22 = vpop.xlane.xlu0 %2353 }
 0xf6e   : > { %3485 = vrsqrt.f32 %v2360_v19  ;;  %v2358_v23 = vmul.f32 0.03125, %v2354_v22 }
 0xf6f   : > { %3487 = vrsqrt.f32 %v2361_v20 }
 0xf70   : > { %v2362_v24 = vadd.f32 1e-05, %v2358_v23 }
 0xf72   : > { %3489 = vrsqrt.f32 %v2362_v24 }
 0xf77   : > { %v3484_v25 = vpop.eup %3483 }
 0xf78   : > { %v2367_v26 = vmul.f32 %v3484_v25, %v2335_v49 }
 0xf7a   : > { %v2378_v33 = vmul.f32 %v3023_v27, %v2367_v26 }
 0xf7b   : > { %v3486_v28 = vpop.eup %3485 }
 0xf7c   : > { %v3488_v29 = vpop.eup %3487  ;;  %v2368_v31 = vmul.f32 %v3486_v28, %v2336_v59  ;;  %v2389_v45 = vadd.f32 %v3024_v39, %v2378_v33 }
 0xf7d   : > { %v2369_v35 = vmul.f32 %v3488_v29, %v2337_v60 }
 0xf7e   : > { %v2379_v40 = vmul.f32 %v3023_v27, %v2368_v31 }
 0xf7f   : > { %v3490_v42 = vpop.eup %3489  ;;  %v2380_v43 = vmul.f32 %v3023_v27, %v2369_v35 }
 0xf80   : > { %v2370_v21 = vmul.f32 %v3490_v42, %v2338_v6  ;;  %v2390_v41 = vadd.f32 %v3024_v39, %v2379_v40 }
 0xf81   : > { %v2391_v54 = vadd.f32 %v3024_v39, %v2380_v43 }
 0xf82   : > { %v2393_v50 = vpack.c.bf16 %v2390_v41, %v2389_v45  ;;  %v2381_v37 = vmul.f32 %v3023_v27, %v2370_v21 }
 0xf84   : > { %3255 = vmatprep.mubr.msk.bf16.mxu1 %vm1008_vm2, %v2393_v50  ;;  %v2392_v0 = vadd.f32 %v3024_v39, %v2381_v37 }
 0xf86   : > { %v2394_v38 = vpack.c.bf16 %v2392_v0, %v2391_v54 }
 0xf88   : > { %3256 = vmatmul.mubr.msk.bf16.vlgmr.msra.gmra.mxu1 %vm1008_vm2, %v2394_v38 }
0x1048   : > { %v3257_v1 = vpop.f32.mrf.mxu1 }
0x1049   : > { %v2467_v57 = vadd.f32 %v3257_v1, %v3025_v47 }
0x104a   : > { %v2458_v36 = vpop.f32.mrf.mxu1 }
0x104b   : > { %v2459_v34 = vadd.f32 %v3025_v47, %v2458_v36  ;;  %v2475_v55 = vmax.f32 %v2467_v57, 0.0  ;;  %v3037_v36 = vld [vmem:[%s751_s7] ss:$0 sm:$0xff] }
0x104c   : > { %v3258_v48 = vpop.f32.mrf.mxu1 }
0x104d   : > { %v2470_v63 = vadd.f32 %v3258_v48, %v3025_v47  ;;  %v2473_v52 = vmax.f32 %v2459_v34, 0.0  ;;  %v3038_v48 = vld [vmem:[%s759_s3] ss:$0 sm:$0xff] }
0x104e   : > { %v2461_v2 = vpop.f32.mrf.mxu1 }
0x104f   : > { %v2462_v49 = vadd.f32 %v3025_v47, %v2461_v2  ;;  %v2476_v51 = vmax.f32 %v2470_v63, 0.0 }
0x1051   : > { %v2474_v53 = vmax.f32 %v2462_v49, 0.0  ;;  %v2478_v59 = vpack.c.bf16 %v2476_v51, %v2475_v55 }
0x1053   : > { %v2477_v58 = vpack.c.bf16 %v2474_v53, %v2473_v52 }
0x1055   : > { %3267 = vmatprep.mubr.msk.bf16.mxu0 %vm2518_vm7, %v2477_v58 }
0x1056   : > { %3268 = vmatmul.mubr.msk.bf16.vlgmr.msra.gmra.mxu0 %vm2518_vm7, %v2478_v59 }
0x1116   : > { %v3269_v60 = vpop.f32.mrf.mxu0 }
0x1117   : > { %v2568_v3 = vadd.f32 %v3269_v60, %v3030_v61 }
0x1118   : > { %v2559_v62 = vpop.f32.mrf.mxu0 }
0x1119   : > { %v2560_v4 = vadd.f32 %v3030_v61, %v2559_v62  ;;  %v2576_v11 = vadd.f32 %v2568_v3, %v2391_v54 }
0x111a   : > { %v3270_v5 = vpop.f32.mrf.mxu0 }
0x111b   : > { %v2574_v6 = vadd.f32 %v2560_v4, %v2389_v45  ;;  %v2571_v8 = vadd.f32 %v3270_v5, %v3030_v61  ;;  %v2584_v32 = vsel %vm1008_vm2, %v2576_v11, 0.0 }
0x111c   : > { %v2562_v7 = vpop.f32.mrf.mxu0 }
0x111d   : > { %v2563_v9 = vadd.f32 %v3030_v61, %v2562_v7  ;;  %v2578_v10 = vsel %vm1008_vm2, %v2574_v6, 0.0  ;;  %v2577_v13 = vadd.f32 %v2571_v8, %v2392_v0 }
0x111e   : > { %2579 = vadd.xlane.f32.xlu1 %v2578_v10 }
0x111f   : > { %v2575_v12 = vadd.f32 %v2563_v9, %v2390_v41  ;;  %v2587_v14 = vsel %vm1008_vm2, %v2577_v13, 0.0 }
0x1121   : > { %v2581_v30 = vsel %vm1008_vm2, %v2575_v12, 0.0 }
0x1122   : > { %2582 = vadd.xlane.f32.xlu0 %v2581_v30  ;;  %2585 = vadd.xlane.f32.xlu1 %v2584_v32 }
0x1126   : > { %2588 = vadd.xlane.f32.xlu0 %v2587_v14 }
0x11a7   : > { %v2580_v15 = vpop.xlane.xlu1 %2579 }
0x11a8   : > { %v2590_v16 = vmul.f32 0.03125, %v2580_v15 }
0x11aa   : > { %v2594_v17 = vsub.f32 %v2574_v6, %v2590_v16 }
0x11ab   : > { %v2583_v18 = vpop.xlane.xlu0 %2582  ;;  %v2586_v19 = vpop.xlane.xlu1 %2585 }
0x11ac   : > { %v2591_v20 = vmul.f32 0.03125, %v2583_v18  ;;  %v2592_v22 = vmul.f32 0.03125, %v2586_v19  ;;  %v2598_v23 = vmul.f32 %v2594_v17, %v2594_v17 }
0x11ae   : > { %v2595_v24 = vsub.f32 %v2575_v12, %v2591_v20  ;;  %v2596_v25 = vsub.f32 %v2576_v11, %v2592_v22  ;;  %v2602_v26 = vsel %vm1008_vm2, %v2598_v23, 0.0 }
0x11af   : > { %v2589_v27 = vpop.xlane.xlu0 %2588  ;;  %2603 = vadd.xlane.f32.xlu1 %v2602_v26 }
0x11b0   : > { %v2593_v28 = vmul.f32 0.03125, %v2589_v27  ;;  %v2599_v29 = vmul.f32 %v2595_v24, %v2595_v24  ;;  %v2600_v31 = vmul.f32 %v2596_v25, %v2596_v25 }
0x11b2   : > { %v2597_v33 = vsub.f32 %v2577_v13, %v2593_v28  ;;  %v2605_v35 = vsel %vm1008_vm2, %v2599_v29, 0.0  ;;  %v2608_v39 = vsel %vm1008_vm2, %v2600_v31, 0.0 }
0x11b3   : > { %2606 = vadd.xlane.f32.xlu0 %v2605_v35  ;;  %2609 = vadd.xlane.f32.xlu1 %v2608_v39 }
0x11b4   : > { %v2601_v40 = vmul.f32 %v2597_v33, %v2597_v33 }
0x11b6   : > { %v2611_v42 = vsel %vm1008_vm2, %v2601_v40, 0.0 }
0x11b7   : > { %2612 = vadd.xlane.f32.xlu0 %v2611_v42 }
0x1238   : > { %v2604_v21 = vpop.xlane.xlu1 %2603 }
0x1239   : > { %v2614_v45 = vmul.f32 0.03125, %v2604_v21 }
0x123b   : > { %v2618_v41 = vadd.f32 1e-05, %v2614_v45 }
0x123c   : > { %v2607_v43 = vpop.xlane.xlu0 %2606  ;;  %v2610_v50 = vpop.xlane.xlu1 %2609 }
0x123d   : > { %3491 = vrsqrt.f32 %v2618_v41  ;;  %v2615_v37 = vmul.f32 0.03125, %v2607_v43  ;;  %v2616_v54 = vmul.f32 0.03125, %v2610_v50 }
0x123f   : > { %v2619_v0 = vadd.f32 1e-05, %v2615_v37  ;;  %v2620_v38 = vadd.f32 1e-05, %v2616_v54 }
0x1240   : > { %v2613_v44 = vpop.xlane.xlu0 %2612 }
0x1241   : > { %3493 = vrsqrt.f32 %v2619_v0  ;;  %v2617_v46 = vmul.f32 0.03125, %v2613_v44 }
0x1242   : > { %3495 = vrsqrt.f32 %v2620_v38 }
0x1243   : > { %v2621_v56 = vadd.f32 1e-05, %v2617_v46 }
0x1245   : > { %3497 = vrsqrt.f32 %v2621_v56 }
0x124a   : > { %v3492_v1 = vpop.eup %3491 }
0x124b   : > { %v2626_v47 = vmul.f32 %v3492_v1, %v2594_v17 }
0x124d   : > { %v2637_v34 = vmul.f32 %v3037_v36, %v2626_v47 }
0x124e   : > { %v3494_v63 = vpop.eup %3493 }
0x124f   : > { %v3496_v57 = vpop.eup %3495  ;;  %v2648_v2 = vadd.f32 %v3038_v48, %v2637_v34  ;;  %v2627_v49 = vmul.f32 %v3494_v63, %v2595_v24 }
0x1250   : > { %v2628_v51 = vmul.f32 %v3496_v57, %v2596_v25 }
0x1251   : > { %2652 = vst.msk [vmem:[#allocation2] sm:$0xff] %vm1008_vm2, %v2648_v2  ;;  %v2638_v52 = vmul.f32 %v3037_v36, %v2627_v49 }
0x1252   : > { %v3498_v53 = vpop.eup %3497  ;;  %v2639_v55 = vmul.f32 %v3037_v36, %v2628_v51 }
0x1253   : > { %v2649_v58 = vadd.f32 %v3038_v48, %v2638_v52  ;;  %v2629_v59 = vmul.f32 %v3498_v53, %v2597_v33 }
0x1254   : > { %v2650_v60 = vadd.f32 %v3038_v48, %v2639_v55 }
0x1255   : > { %2653 = vst.msk [vmem:[#allocation2 + $0x8] sm:$0xff] %vm1008_vm2, %v2649_v58  ;;  %v2640_v61 = vmul.f32 %v3037_v36, %v2629_v59  ;;  %2659 = sbr.rel (%p3039_p3) target bundleno = 4702 (0x125e), region = 132 }
0x1256   : > { %2654 = vst.msk [vmem:[#allocation2 + $0x10] sm:$0xff] %vm1008_vm2, %v2650_v60 }
0x1257   : > { %v2651_v62 = vadd.f32 %v3038_v48, %v2640_v61 }
0x1259   : > { %2655 = vst.msk [vmem:[#allocation2 + $0x18] sm:$0xff] %vm1008_vm2, %v2651_v62 }
0x125a   : > { %v3052_v3 = vpack.c.bf16 %v2648_v2, %v2648_v2  ;;  %vm2676_vm8 = vcmask 257024   ;;  %v3053_v4 = vpack.c.bf16 %v2649_v58, %v2649_v58  ;;  %v3054_v5 = vpack.c.bf16 %v2650_v60, %v2650_v60 }
0x125b   : > { %v3055_v6 = vpack.c.bf16 %v2651_v62, %v2651_v62 }
0x125c   : > { %2677 = vst.msk [vmem:[%s4622_s11] sm:$0xf] %vm2676_vm8, %v3052_v3  ;;  %2678 = vst.msk [vmem:[%s4622_s11 + $0x4] sm:$0xf] %vm2676_vm8, %v3053_v4 }
0x125d   : > { %2679 = vst.msk [vmem:[%s4622_s11 + $0x8] sm:$0xf] %vm2676_vm8, %v3054_v5  ;;  %2680 = vst.msk [vmem:[%s4622_s11 + $0xc] sm:$0xf] %vm2676_vm8, %v3055_v6 }
0x125e PF: > { %s27_s23 = sadd.s32 1, %s3865_s23   ;;  %s4623_s18 = sld [smem:[#allocation19_spill]] }
0x125f   : > { %p24_p4 = scmp.ge.s32.totalorder %s27_s23, 4   ;;  %s4624_s19 = sld [smem:[#allocation20_spill]] }
0x1260   : > { %s4625_s20 = sld [smem:[#allocation24_spill]]  ;;  %s4627_s21 = smov %s3861_s22 }
0x1261   : > { %s4626_s3 = sld [smem:[#allocation22_spill]] }
0x1263   :  { %26 = sbr.rel (!%p24_p4) target bundleno = 15 (0xf), region = 235 }
0x1267   : > { %s4628_s22 = smov %s4626_s3 }
0x1268   :  { %2703 = vsyncpa [#allocation4], 1 }
0x1269   :  { %2705 = vsyncpa [#allocation4 + $0x1], 1 }
0x126a   :  { %2706 = vsyncpa [#allocation6], 1 }

// kernel: transformer_forward.3
= control target key start
LH: loop header
LB: loop body
LE: loop exit
PB: predicated region body
PF: predicated region fallthrough
CT: control target
= control target key end

     0   :  { %10 = vsyncpa [#allocation3], 0  ;;  %s3576_s0 = inlined_call_operand.vmem [shape: bf16[2,512], index: 0, kind: input, shape index: {}]   ;;  %s3577_s1 = inlined_call_operand.hbm [shape: bf16[512,1024], index: 1, kind: input, shape index: {}]   ;;  %s3578_s2 = inlined_call_operand.hbm [shape: f32[1,1024], index: 2, kind: input, shape index: {}]   ;;  %s3579_s3 = inlined_call_operand.vmem [shape: bf16[1024,128], index: 3, kind: input, shape index: {}]   ;;  %s3580_s4 = inlined_call_operand.hbm [shape: f32[1,128], index: 4, kind: input, shape index: {}]   ;;  %s3581_s5 = inlined_call_operand.hbm [shape: f32[2,128], index: 5, kind: output, shape index: {}]  }
   0x1   :  { %11 = vsyncpa [#allocation6], 0 }
   0x2   :  { %12 = vsyncpa [#allocation4], 0  ;;  %s3274_s18 = smov [#allocation5]   ;;  %s3275_s20 = smov [#allocation2]  }
   0x3   :  { %s33_s19 = sshll.u32 %s3274_s18, 4  ;;  %s20_s21 = sshll.u32 %s3275_s20, 4  ;;  %s34_s19 = int_to_ptr.vmem [resolvable:$true] %s33_s19  ;;  %s21_s21 = int_to_ptr.vmem [resolvable:$true] %s20_s21 }
   0x4   :  { %s3196_s22 = scalar_lea.vmem %s34_s19, 128  ;;  %p3201_p1 = scmp.lt.s32.totalorder %s34_s19, %s34_s19 }
   0x5   :  { %p3197_p0 = scmp.ne.s32.totalorder %s34_s19, %s3196_s22  ;;  %p3202_p2 = scmp.lt.s32.totalorder %s3196_s22, %s3196_s22 }
   0x7   :  { %p3203_p3 = por %p3202_p2, %p3201_p1 }
   0x9   :  { %p3204_p4 = pnand %p3203_p3, %p3197_p0 }
   0xb   :  { %3207 = shalt.err (!%p3204_p4)
}
   0xc   :  { %36 = dma.hbm_to_vmem [thread:$0]  %s3578_s2, 128, %s34_s19, [#allocation6]  }
   0xd   :  { %s3216_s25 = scalar_lea.vmem %s21_s21, 32768  ;;  %p3221_p6 = scmp.lt.s32.totalorder %s21_s21, %s21_s21 }
   0xe   :  { %p3217_p5 = scmp.ne.s32.totalorder %s21_s21, %s3216_s25  ;;  %p3222_p7 = scmp.lt.s32.totalorder %s3216_s25, %s3216_s25 }
  0x10   :  { %p3223_p8 = por %p3222_p7, %p3221_p6 }
  0x12   :  { %p3224_p9 = pnand %p3223_p8, %p3217_p5 }
  0x14   :  { %3227 = shalt.err (!%p3224_p9)
}
  0x15   :  { %s3276_s26 = smov 512   ;;  %s3277_s27 = smov 32  }
  0x16   :  { %26 = dma.hbm_to_vmem [thread:$0]  %s3577_s1, 32768, %s21_s21, [#allocation3], %s3276_s26, %s3276_s26, %s3277_s27  }
  0x17   :  { %s3278_s30 = smov [#allocation7]  }
  0x18   :  { %s45_s6 = sshll.u32 %s3278_s30, 4  ;;  %s46_s6 = int_to_ptr.vmem [resolvable:$true] %s45_s6 }
  0x19   :  { %s3236_s7 = scalar_lea.vmem %s46_s6, 16  ;;  %s3240_s8 = scalar_lea.vmem %s46_s6, 32 }
  0x1a   :  { %p3237_p10 = scmp.ne.s32.totalorder %s46_s6, %s3236_s7  ;;  %p3241_p11 = scmp.lt.s32.totalorder %s46_s6, %s46_s6 }
  0x1b   :  { %p3242_p12 = scmp.lt.s32.totalorder %s3240_s8, %s3236_s7 }
  0x1d   :  { %p3243_p13 = por %p3242_p12, %p3241_p11 }
  0x1f   :  { %p3244_p0 = pnand %p3243_p13, %p3237_p10 }
  0x21   :  { %3247 = shalt.err (!%p3244_p0)
}
  0x22   :  { %48 = dma.hbm_to_vmem [thread:$0]  %s3580_s4, 16, %s46_s6, [#allocation6]  }
  0x23   :  { %3268 = dma.done.wait [#allocation3], 32768  }
  0x24   :  { %3269 = vsyncadd [#allocation3], 4294934528 }
  0x25   :  { %3270 = dma.done.wait [#allocation6], 144  }
  0x26   :  { %3271 = vsyncadd [#allocation6], 4294967152  ;;  %v116_v0 = vld [vmem:[#allocation2 + $0x1c0] sm:$0xff]  ;;  %v318_v35 = vlaneseq  ;;  %v3279_v36 = vmov 1966171168  }
  0x27   :  { %v120_v1 = vld [vmem:[#allocation2 + $0x1e0] sm:$0xff]  ;;  %v368_v37 = vunpack.c.l.s4 %v3279_v36 }
  0x28   :  { %v244_v2 = vld [vmem:[#allocation2 + $0x5c0] sm:$0xff]  ;;  %v2765_v3 = vcombine.high %v116_v0, %v120_v1  ;;  %v2764_v5 = vcombine.low %v116_v0, %v120_v1  ;;  %v3320_v46 = vshrl.u32 %v318_v35, 7 }
  0x29   :  { %v248_v4 = vld [vmem:[#allocation2 + $0x5e0] sm:$0xff]  ;;  %v369_v47 = vunpack.c.0.s8 %v368_v37 }
  0x2a   :  { %v108_v6 = vld [vmem:[#allocation2 + $0x180] sm:$0xff]  ;;  %v2893_v8 = vcombine.high %v244_v2, %v248_v4  ;;  %v2892_v9 = vcombine.low %v244_v2, %v248_v4  ;;  %1667 = vmatprep.subr.bf16.mxu0 %v2765_v3 }
  0x2b   :  { %v112_v7 = vld [vmem:[#allocation2 + $0x1a0] sm:$0xff]  ;;  %1668 = vmatpush1.bf16.msra.mxu0 %v2764_v5  ;;  %v3323_v56 = vsub.s32 %v369_v47, %v3320_v46 }
  0x2c   :  { %v2757_v10 = vcombine.high %v108_v6, %v112_v7  ;;  %v236_v11 = vld [vmem:[#allocation2 + $0x580] sm:$0xff]  ;;  %1708 = vmatprep.subr.bf16.mxu1 %v2893_v8  ;;  %v2756_v18 = vcombine.low %v108_v6, %v112_v7 }
  0x2d   :  { %v240_v12 = vld [vmem:[#allocation2 + $0x5a0] sm:$0xff]  ;;  %1709 = vmatpush1.bf16.msra.mxu1 %v2892_v9 }
  0x2e   :  { %v100_v13 = vld [vmem:[#allocation2 + $0x140] sm:$0xff]  ;;  %v2885_v14 = vcombine.high %v236_v11, %v240_v12  ;;  %1669 = vmatprep.subr.bf16.mxu0 %v2757_v10  ;;  %v2884_v19 = vcombine.low %v236_v11, %v240_v12 }
  0x2f   :  { %v104_v15 = vld [vmem:[#allocation2 + $0x160] sm:$0xff]  ;;  %1670 = vmatpush1.bf16.msra.mxu0 %v2756_v18 }
  0x30   :  { %v228_v16 = vld [vmem:[#allocation2 + $0x540] sm:$0xff]  ;;  %v2749_v20 = vcombine.high %v100_v13, %v104_v15  ;;  %1710 = vmatprep.subr.bf16.mxu1 %v2885_v14  ;;  %v2748_v26 = vcombine.low %v100_v13, %v104_v15 }
  0x31   :  { %v232_v17 = vld [vmem:[#allocation2 + $0x560] sm:$0xff]  ;;  %1711 = vmatpush1.bf16.msra.mxu1 %v2884_v19 }
  0x32   :  { %v2877_v21 = vcombine.high %v228_v16, %v232_v17  ;;  %v92_v22 = vld [vmem:[#allocation2 + $0x100] sm:$0xff]  ;;  %1671 = vmatprep.subr.bf16.mxu0 %v2749_v20  ;;  %v2876_v27 = vcombine.low %v228_v16, %v232_v17 }
  0x33   :  { %v96_v23 = vld [vmem:[#allocation2 + $0x120] sm:$0xff]  ;;  %1672 = vmatpush1.bf16.msra.mxu0 %v2748_v26 }
  0x34   :  { %v220_v24 = vld [vmem:[#allocation2 + $0x500] sm:$0xff]  ;;  %v2741_v28 = vcombine.high %v92_v22, %v96_v23  ;;  %1712 = vmatprep.subr.bf16.mxu1 %v2877_v21  ;;  %v2740_v34 = vcombine.low %v92_v22, %v96_v23 }
  0x35   :  { %v224_v25 = vld [vmem:[#allocation2 + $0x520] sm:$0xff]  ;;  %1713 = vmatpush1.bf16.msra.mxu1 %v2876_v27 }
  0x36   :  { %v2869_v29 = vcombine.high %v220_v24, %v224_v25  ;;  %v84_v30 = vld [vmem:[#allocation2 + $0xc0] sm:$0xff]  ;;  %1673 = vmatprep.subr.bf16.mxu0 %v2741_v28  ;;  %v2868_v38 = vcombine.low %v220_v24, %v224_v25 }
  0x37   :  { %v88_v31 = vld [vmem:[#allocation2 + $0xe0] sm:$0xff]  ;;  %1674 = vmatpush1.bf16.msra.mxu0 %v2740_v34 }
  0x38   :  { %v212_v32 = vld [vmem:[#allocation2 + $0x4c0] sm:$0xff]  ;;  %v2733_v39 = vcombine.high %v84_v30, %v88_v31  ;;  %1714 = vmatprep.subr.bf16.mxu1 %v2869_v29  ;;  %v2732_v45 = vcombine.low %v84_v30, %v88_v31 }
  0x39   :  { %v216_v33 = vld [vmem:[#allocation2 + $0x4e0] sm:$0xff]  ;;  %1715 = vmatpush1.bf16.msra.mxu1 %v2868_v38 }
  0x3a   :  { %v2861_v40 = vcombine.high %v212_v32, %v216_v33  ;;  %v76_v41 = vld [vmem:[#allocation2 + $0x80] sm:$0xff]  ;;  %1675 = vmatprep.subr.bf16.mxu0 %v2733_v39  ;;  %v2860_v48 = vcombine.low %v212_v32, %v216_v33 }
  0x3b   :  { %v80_v42 = vld [vmem:[#allocation2 + $0xa0] sm:$0xff]  ;;  %1676 = vmatpush1.bf16.msra.mxu0 %v2732_v45 }
  0x3c   :  { %v204_v43 = vld [vmem:[#allocation2 + $0x480] sm:$0xff]  ;;  %v2725_v49 = vcombine.high %v76_v41, %v80_v42  ;;  %1716 = vmatprep.subr.bf16.mxu1 %v2861_v40  ;;  %v2724_v55 = vcombine.low %v76_v41, %v80_v42 }
  0x3d   :  { %v208_v44 = vld [vmem:[#allocation2 + $0x4a0] sm:$0xff]  ;;  %1717 = vmatpush1.bf16.msra.mxu1 %v2860_v48 }
  0x3e   :  { %v2853_v50 = vcombine.high %v204_v43, %v208_v44  ;;  %v68_v51 = vld [vmem:[#allocation2 + $0x40] sm:$0xff]  ;;  %1677 = vmatprep.subr.bf16.mxu0 %v2725_v49  ;;  %v2852_v57 = vcombine.low %v204_v43, %v208_v44 }
  0x3f   :  { %v72_v52 = vld [vmem:[#allocation2 + $0x60] sm:$0xff]  ;;  %1678 = vmatpush1.bf16.msra.mxu0 %v2724_v55 }
  0x40   :  { %v196_v53 = vld [vmem:[#allocation2 + $0x440] sm:$0xff]  ;;  %v2717_v58 = vcombine.high %v68_v51, %v72_v52  ;;  %1718 = vmatprep.subr.bf16.mxu1 %v2853_v50  ;;  %v2716_v2 = vcombine.low %v68_v51, %v72_v52 }
  0x41   :  { %v200_v54 = vld [vmem:[#allocation2 + $0x460] sm:$0xff]  ;;  %1719 = vmatpush1.bf16.msra.mxu1 %v2852_v57 }
  0x42   :  { %v3328_v59 = vld.sshfl [vmem:[%s3576_s0] sm:$0x33 pattern:$0x75316420]  ;;  %v2845_v60 = vcombine.high %v196_v53, %v200_v54  ;;  %1679 = vmatprep.subr.bf16.mxu0 %v2717_v58  ;;  %v2844_v4 = vcombine.low %v196_v53, %v200_v54 }
  0x43   :  { %v60_v61 = vld [vmem:[#allocation2] sm:$0xff]  ;;  %v366_v63 = vcombine.high %v3328_v59, %v3328_v59  ;;  %1680 = vmatpush1.bf16.msra.mxu0 %v2716_v2 }
  0x44   :  { %v64_v62 = vld [vmem:[#allocation2 + $0x20] sm:$0xff]  ;;  %1720 = vmatprep.subr.bf16.mxu1 %v2845_v60 }
  0x45   :  { %v188_v0 = vld [vmem:[#allocation2 + $0x400] sm:$0xff]  ;;  %v3333_v3 = vrot.slane %v366_v63, %v3323_v56  ;;  %v2709_v5 = vcombine.high %v60_v61, %v64_v62  ;;  %v2708_v12 = vcombine.low %v60_v61, %v64_v62  ;;  %1721 = vmatpush1.bf16.msra.mxu1 %v2844_v4 }
  0x46   :  { %v192_v1 = vld [vmem:[#allocation2 + $0x420] sm:$0xff] }
  0x47   :  { %v2837_v6 = vcombine.high %v188_v0, %v192_v1  ;;  %v180_v7 = vld [vmem:[#allocation2 + $0x3c0] sm:$0xff]  ;;  %1699 = vmatprep.mubr.bf16.mxu0 %v3333_v3  ;;  %v3338_v9 = vcombine.high %v3333_v3, %v3333_v3  ;;  %1681 = vmatprep.subr.bf16.mxu0 %v2709_v5  ;;  %v2836_v13 = vcombine.low %v188_v0, %v192_v1 }
  0x48   :  { %v184_v8 = vld [vmem:[#allocation2 + $0x3e0] sm:$0xff]  ;;  %1682 = vmatpush1.bf16.msra.mxu0 %v2708_v12 }
  0x49   :  { %v308_v10 = vld [vmem:[#allocation2 + $0x7c0] sm:$0xff]  ;;  %1740 = vmatprep.mubr.bf16.mxu1 %v3338_v9  ;;  %v2829_v14 = vcombine.high %v180_v7, %v184_v8  ;;  %1722 = vmatprep.subr.bf16.mxu1 %v2837_v6  ;;  %v2828_v20 = vcombine.low %v180_v7, %v184_v8 }
  0x4a   :  { %v312_v11 = vld [vmem:[#allocation2 + $0x7e0] sm:$0xff]  ;;  %1723 = vmatpush1.bf16.msra.mxu1 %v2836_v13  ;;  %v117_v13 = vld [vmem:[#allocation2 + $0x1c8] sm:$0xff] }
  0x4b   :  { %v2957_v15 = vcombine.high %v308_v10, %v312_v11  ;;  %v172_v16 = vld [vmem:[#allocation2 + $0x380] sm:$0xff]  ;;  %1683 = vmatprep.subr.bf16.mxu0 %v2829_v14  ;;  %v2956_v21 = vcombine.low %v308_v10, %v312_v11  ;;  %v121_v14 = vld [vmem:[#allocation2 + $0x1e8] sm:$0xff] }
  0x4c   :  { %v176_v17 = vld [vmem:[#allocation2 + $0x3a0] sm:$0xff]  ;;  %1684 = vmatpush2.bf16.msra.mxu0 %v2828_v20  ;;  %v2767_v20 = vcombine.high %v117_v13, %v121_v14 }
  0x4d   :  { %v300_v18 = vld [vmem:[#allocation2 + $0x780] sm:$0xff]  ;;  %v2821_v22 = vcombine.high %v172_v16, %v176_v17  ;;  %1724 = vmatprep.subr.bf16.mxu1 %v2957_v15  ;;  %v2820_v28 = vcombine.low %v172_v16, %v176_v17  ;;  %v245_v15 = vld [vmem:[#allocation2 + $0x5c8] sm:$0xff] }
  0x4e   :  { %v304_v19 = vld [vmem:[#allocation2 + $0x7a0] sm:$0xff]  ;;  %1725 = vmatpush2.bf16.msra.mxu1 %v2956_v21  ;;  %v249_v16 = vld [vmem:[#allocation2 + $0x5e8] sm:$0xff] }
  0x4f   :  { %v2949_v23 = vcombine.high %v300_v18, %v304_v19  ;;  %v164_v24 = vld [vmem:[#allocation2 + $0x340] sm:$0xff]  ;;  %1685 = vmatprep.subr.bf16.mxu0 %v2821_v22  ;;  %v2948_v29 = vcombine.low %v300_v18, %v304_v19  ;;  %v3343_v18 = vrot.slane %v3328_v59, %v3323_v56  ;;  %v2895_v21 = vcombine.high %v245_v15, %v249_v16  ;;  %v109_v22 = vld [vmem:[#allocation2 + $0x188] sm:$0xff] }
  0x50   :  { %v168_v25 = vld [vmem:[#allocation2 + $0x360] sm:$0xff]  ;;  %1686 = vmatpush2.bf16.msra.mxu0 %v2820_v28  ;;  %v2894_v56 = vcombine.low %v245_v15, %v249_v16  ;;  %v101_v28 = vld [vmem:[#allocation2 + $0x148] sm:$0xff] }
  0x51   :  { %v292_v26 = vld [vmem:[#allocation2 + $0x740] sm:$0xff]  ;;  %v2813_v30 = vcombine.high %v164_v24, %v168_v25  ;;  %1726 = vmatprep.subr.bf16.mxu1 %v2949_v23  ;;  %v2812_v36 = vcombine.low %v164_v24, %v168_v25  ;;  %v113_v23 = vld [vmem:[#allocation2 + $0x1a8] sm:$0xff] }
  0x52   :  { %v296_v27 = vld [vmem:[#allocation2 + $0x760] sm:$0xff]  ;;  %1727 = vmatpush2.bf16.msra.mxu1 %v2948_v29  ;;  %v237_v24 = vld [vmem:[#allocation2 + $0x588] sm:$0xff]  ;;  %v2759_v59 = vcombine.high %v109_v22, %v113_v23 }
  0x53   :  { %v2941_v31 = vcombine.high %v292_v26, %v296_v27  ;;  %v156_v32 = vld [vmem:[#allocation2 + $0x300] sm:$0xff]  ;;  %1687 = vmatprep.subr.bf16.mxu0 %v2813_v30  ;;  %v2940_v37 = vcombine.low %v292_v26, %v296_v27  ;;  %v241_v25 = vld [vmem:[#allocation2 + $0x5a8] sm:$0xff]  ;;  %v3347_v26 = vcombine.high %v3343_v18, %v3343_v18  ;;  %v2766_v27 = vcombine.low %v117_v13, %v121_v14 }
  0x54   :  { %v160_v33 = vld [vmem:[#allocation2 + $0x320] sm:$0xff]  ;;  %1688 = vmatpush2.bf16.msra.mxu0 %v2812_v36  ;;  %v105_v29 = vld [vmem:[#allocation2 + $0x168] sm:$0xff] }
  0x55   :  { %v284_v34 = vld [vmem:[#allocation2 + $0x700] sm:$0xff]  ;;  %v2805_v38 = vcombine.high %v156_v32, %v160_v33  ;;  %1728 = vmatprep.subr.bf16.mxu1 %v2941_v31  ;;  %v2804_v44 = vcombine.low %v156_v32, %v160_v33  ;;  %v229_v30 = vld [vmem:[#allocation2 + $0x548] sm:$0xff]  ;;  %v2887_v31 = vcombine.high %v237_v24, %v241_v25  ;;  %v2758_v33 = vcombine.low %v109_v22, %v113_v23 }
  0x56   :  { %v288_v35 = vld [vmem:[#allocation2 + $0x720] sm:$0xff]  ;;  %1729 = vmatpush2.bf16.msra.mxu1 %v2940_v37  ;;  %v233_v32 = vld [vmem:[#allocation2 + $0x568] sm:$0xff] }
  0x57   :  { %v2933_v39 = vcombine.high %v284_v34, %v288_v35  ;;  %v148_v40 = vld [vmem:[#allocation2 + $0x2c0] sm:$0xff]  ;;  %1689 = vmatprep.subr.bf16.mxu0 %v2805_v38  ;;  %v2932_v45 = vcombine.low %v284_v34, %v288_v35  ;;  %v2886_v34 = vcombine.low %v237_v24, %v241_v25  ;;  %v2751_v35 = vcombine.high %v101_v28, %v105_v29  ;;  %v93_v36 = vld [vmem:[#allocation2 + $0x108] sm:$0xff] }
  0x58   :  { %v152_v41 = vld [vmem:[#allocation2 + $0x2e0] sm:$0xff]  ;;  %1690 = vmatpush2.bf16.msra.mxu0 %v2804_v44  ;;  %v97_v37 = vld [vmem:[#allocation2 + $0x128] sm:$0xff] }
  0x59   :  { %v276_v42 = vld [vmem:[#allocation2 + $0x6c0] sm:$0xff]  ;;  %v2797_v47 = vcombine.high %v148_v40, %v152_v41  ;;  %1730 = vmatprep.subr.bf16.mxu1 %v2933_v39  ;;  %v2796_v53 = vcombine.low %v148_v40, %v152_v41  ;;  %v221_v38 = vld [vmem:[#allocation2 + $0x508] sm:$0xff]  ;;  %v2879_v39 = vcombine.high %v229_v30, %v233_v32  ;;  %v2750_v41 = vcombine.low %v101_v28, %v105_v29 }
  0x5a   :  { %v280_v43 = vld [vmem:[#allocation2 + $0x6e0] sm:$0xff]  ;;  %1731 = vmatpush2.bf16.msra.mxu1 %v2932_v45  ;;  %v225_v40 = vld [vmem:[#allocation2 + $0x528] sm:$0xff] }
  0x5b   :  { %v2925_v48 = vcombine.high %v276_v42, %v280_v43  ;;  %v140_v49 = vld [vmem:[#allocation2 + $0x280] sm:$0xff]  ;;  %1691 = vmatprep.subr.bf16.mxu0 %v2797_v47  ;;  %v2924_v54 = vcombine.low %v276_v42, %v280_v43  ;;  %v2878_v42 = vcombine.low %v229_v30, %v233_v32  ;;  %v2743_v43 = vcombine.high %v93_v36, %v97_v37  ;;  %v85_v44 = vld [vmem:[#allocation2 + $0xc8] sm:$0xff] }
  0x5c   :  { %v144_v50 = vld [vmem:[#allocation2 + $0x2a0] sm:$0xff]  ;;  %1692 = vmatpush2.bf16.msra.mxu0 %v2796_v53  ;;  %v89_v45 = vld [vmem:[#allocation2 + $0xe8] sm:$0xff] }
  0x5d   :  { %v268_v51 = vld [vmem:[#allocation2 + $0x680] sm:$0xff]  ;;  %v2789_v55 = vcombine.high %v140_v49, %v144_v50  ;;  %1732 = vmatprep.subr.bf16.mxu1 %v2925_v48  ;;  %v2788_v63 = vcombine.low %v140_v49, %v144_v50  ;;  %v213_v47 = vld [vmem:[#allocation2 + $0x4c8] sm:$0xff]  ;;  %v2871_v48 = vcombine.high %v221_v38, %v225_v40  ;;  %v2742_v50 = vcombine.low %v93_v36, %v97_v37 }
  0x5e   :  { %v272_v52 = vld [vmem:[#allocation2 + $0x6a0] sm:$0xff]  ;;  %1733 = vmatpush2.bf16.msra.mxu1 %v2924_v54  ;;  %v217_v49 = vld [vmem:[#allocation2 + $0x4e8] sm:$0xff] }
  0x5f   :  { %v2917_v57 = vcombine.high %v268_v51, %v272_v52  ;;  %v132_v58 = vld [vmem:[#allocation2 + $0x240] sm:$0xff]  ;;  %1693 = vmatprep.subr.bf16.mxu0 %v2789_v55  ;;  %v2916_v0 = vcombine.low %v268_v51, %v272_v52  ;;  %v2870_v51 = vcombine.low %v221_v38, %v225_v40  ;;  %v2735_v52 = vcombine.high %v85_v44, %v89_v45  ;;  %v77_v53 = vld [vmem:[#allocation2 + $0x88] sm:$0xff] }
  0x60   :  { %v136_v60 = vld [vmem:[#allocation2 + $0x260] sm:$0xff]  ;;  %1694 = vmatpush2.bf16.msra.mxu0 %v2788_v63  ;;  %v81_v54 = vld [vmem:[#allocation2 + $0xa8] sm:$0xff] }
  0x61   :  { %v260_v61 = vld [vmem:[#allocation2 + $0x640] sm:$0xff]  ;;  %v2781_v1 = vcombine.high %v132_v58, %v136_v60  ;;  %1734 = vmatprep.subr.bf16.mxu1 %v2917_v57  ;;  %v2780_v8 = vcombine.low %v132_v58, %v136_v60  ;;  %v205_v55 = vld [vmem:[#allocation2 + $0x488] sm:$0xff]  ;;  %v2863_v57 = vcombine.high %v213_v47, %v217_v49  ;;  %v2734_v60 = vcombine.low %v85_v44, %v89_v45 }
  0x62   :  { %v264_v62 = vld [vmem:[#allocation2 + $0x660] sm:$0xff]  ;;  %1735 = vmatpush2.bf16.msra.mxu1 %v2916_v0  ;;  %v209_v58 = vld [vmem:[#allocation2 + $0x4a8] sm:$0xff] }
  0x63   :  { %v2909_v2 = vcombine.high %v260_v61, %v264_v62  ;;  %v124_v4 = vld [vmem:[#allocation2 + $0x200] sm:$0xff]  ;;  %1695 = vmatprep.subr.bf16.mxu0 %v2781_v1  ;;  %v2908_v10 = vcombine.low %v260_v61, %v264_v62  ;;  %v2862_v61 = vcombine.low %v213_v47, %v217_v49  ;;  %v2727_v62 = vcombine.high %v77_v53, %v81_v54  ;;  %v69_v63 = vld [vmem:[#allocation2 + $0x48] sm:$0xff] }
  0x64   :  { %v128_v5 = vld [vmem:[#allocation2 + $0x220] sm:$0xff]  ;;  %1696 = vmatpush2.bf16.msra.mxu0 %v2780_v8  ;;  %v73_v0 = vld [vmem:[#allocation2 + $0x68] sm:$0xff] }
  0x65   :  { %v252_v6 = vld [vmem:[#allocation2 + $0x600] sm:$0xff]  ;;  %v2773_v11 = vcombine.high %v124_v4, %v128_v5  ;;  %1736 = vmatprep.subr.bf16.mxu1 %v2909_v2  ;;  %v2772_v17 = vcombine.low %v124_v4, %v128_v5  ;;  %v197_v1 = vld [vmem:[#allocation2 + $0x448] sm:$0xff]  ;;  %v2855_v2 = vcombine.high %v205_v55, %v209_v58  ;;  %v2726_v5 = vcombine.low %v77_v53, %v81_v54 }
  0x66   :  { %v256_v7 = vld [vmem:[#allocation2 + $0x620] sm:$0xff]  ;;  %1737 = vmatpush2.bf16.msra.mxu1 %v2908_v10  ;;  %v201_v4 = vld [vmem:[#allocation2 + $0x468] sm:$0xff]  ;;  %v2718_v14 = vcombine.low %v69_v63, %v73_v0 }
  0x67   :  { %v2901_v12 = vcombine.high %v252_v6, %v256_v7  ;;  %1697 = vmatprep.subr.bf16.mxu0 %v2773_v11  ;;  %v2900_v19 = vcombine.low %v252_v6, %v256_v7  ;;  %v2854_v6 = vcombine.low %v205_v55, %v209_v58  ;;  %v2719_v7 = vcombine.high %v69_v63, %v73_v0  ;;  %v61_v8 = vld [vmem:[#allocation2 + $0x8] sm:$0xff] }
  0x68   :  { %1698 = vmatpush2.bf16.msra.mxu0 %v2772_v17  ;;  %v65_v10 = vld [vmem:[#allocation2 + $0x28] sm:$0xff]  ;;  %v2846_v15 = vcombine.low %v197_v1, %v201_v4 }
  0x69   :  { %1738 = vmatprep.subr.bf16.mxu1 %v2901_v12  ;;  %1749 = vmatprep.subr.bf16.mxu0 %v2767_v20  ;;  %v189_v11 = vld [vmem:[#allocation2 + $0x408] sm:$0xff]  ;;  %v2847_v12 = vcombine.high %v197_v1, %v201_v4  ;;  %v2711_v16 = vcombine.high %v61_v8, %v65_v10  ;;  %v2710_v23 = vcombine.low %v61_v8, %v65_v10 }
  0x6a   :  { %1739 = vmatpush2.bf16.msra.mxu1 %v2900_v19  ;;  %v193_v13 = vld [vmem:[#allocation2 + $0x428] sm:$0xff] }
  0x6b   :  { %1790 = vmatprep.subr.bf16.mxu1 %v2895_v21  ;;  %1700 = vmatmul.mubr.bf16.vlgmr.msra.gmra.mxu0 %v3343_v18  ;;  %v181_v17 = vld [vmem:[#allocation2 + $0x3c8] sm:$0xff]  ;;  %v2839_v21 = vcombine.high %v189_v11, %v193_v13  ;;  %v2838_v24 = vcombine.low %v189_v11, %v193_v13 }
  0x6c   :  { %1750 = vmatpush1.bf16.msra.mxu0 %v2766_v27  ;;  %1781 = vmatprep.mubr.bf16.mxu0 %v3333_v3  ;;  %v185_v19 = vld [vmem:[#allocation2 + $0x3e8] sm:$0xff] }
  0x6d   :  { %1741 = vmatmul.mubr.bf16.vlgmr.msra.gmra.mxu1 %v3347_v26  ;;  %1751 = vmatprep.subr.bf16.mxu0 %v2759_v59  ;;  %v309_v20 = vld [vmem:[#allocation2 + $0x7c8] sm:$0xff]  ;;  %v2831_v25 = vcombine.high %v181_v17, %v185_v19  ;;  %v2830_v30 = vcombine.low %v181_v17, %v185_v19 }
  0x6e   :  { %1791 = vmatpush1.bf16.msra.mxu1 %v2894_v56  ;;  %1822 = vmatprep.mubr.bf16.mxu1 %v3338_v9  ;;  %v313_v22 = vld [vmem:[#allocation2 + $0x7e8] sm:$0xff] }
  0x6f   :  { %1792 = vmatprep.subr.bf16.mxu1 %v2887_v31  ;;  %v173_v27 = vld [vmem:[#allocation2 + $0x388] sm:$0xff]  ;;  %v2959_v28 = vcombine.high %v309_v20, %v313_v22  ;;  %v2958_v31 = vcombine.low %v309_v20, %v313_v22 }
  0x70   :  { %1752 = vmatpush1.bf16.msra.mxu0 %v2758_v33  ;;  %v177_v56 = vld [vmem:[#allocation2 + $0x3a8] sm:$0xff] }
  0x71   :  { %1753 = vmatprep.subr.bf16.mxu0 %v2751_v35  ;;  %v301_v59 = vld [vmem:[#allocation2 + $0x788] sm:$0xff]  ;;  %v2823_v32 = vcombine.high %v173_v27, %v177_v56  ;;  %v2822_v38 = vcombine.low %v173_v27, %v177_v56  ;;  %v250_v56 = vld [vmem:[#allocation2 + $0x5f0] sm:$0xff] }
  0x72   :  { %1793 = vmatpush1.bf16.msra.mxu1 %v2886_v34  ;;  %v305_v29 = vld [vmem:[#allocation2 + $0x7a8] sm:$0xff] }
  0x73   :  { %1794 = vmatprep.subr.bf16.mxu1 %v2879_v39  ;;  %v165_v33 = vld [vmem:[#allocation2 + $0x348] sm:$0xff]  ;;  %v2951_v36 = vcombine.high %v301_v59, %v305_v29  ;;  %v2950_v39 = vcombine.low %v301_v59, %v305_v29 }
  0x74   :  { %1754 = vmatpush1.bf16.msra.mxu0 %v2750_v41  ;;  %v169_v34 = vld [vmem:[#allocation2 + $0x368] sm:$0xff] }
  0x75   :  { %1755 = vmatprep.subr.bf16.mxu0 %v2743_v43  ;;  %v293_v35 = vld [vmem:[#allocation2 + $0x748] sm:$0xff]  ;;  %v2815_v40 = vcombine.high %v165_v33, %v169_v34  ;;  %v2814_v47 = vcombine.low %v165_v33, %v169_v34  ;;  %v242_v34 = vld [vmem:[#allocation2 + $0x5b0] sm:$0xff] }
  0x76   :  { %1795 = vmatpush1.bf16.msra.mxu1 %v2878_v42  ;;  %v297_v37 = vld [vmem:[#allocation2 + $0x768] sm:$0xff] }
  0x77   :  { %1796 = vmatprep.subr.bf16.mxu1 %v2871_v48  ;;  %v157_v41 = vld [vmem:[#allocation2 + $0x308] sm:$0xff]  ;;  %v2943_v44 = vcombine.high %v293_v35, %v297_v37  ;;  %v2942_v48 = vcombine.low %v293_v35, %v297_v37 }
  0x78   :  { %1756 = vmatpush1.bf16.msra.mxu0 %v2742_v50  ;;  %v161_v42 = vld [vmem:[#allocation2 + $0x328] sm:$0xff] }
  0x79   :  { %1757 = vmatprep.subr.bf16.mxu0 %v2735_v52  ;;  %v285_v43 = vld [vmem:[#allocation2 + $0x708] sm:$0xff]  ;;  %v2807_v49 = vcombine.high %v157_v41, %v161_v42  ;;  %v2806_v55 = vcombine.low %v157_v41, %v161_v42  ;;  %v230_v41 = vld [vmem:[#allocation2 + $0x550] sm:$0xff] }
  0x7a   :  { %1797 = vmatpush1.bf16.msra.mxu1 %v2870_v51  ;;  %v289_v45 = vld [vmem:[#allocation2 + $0x728] sm:$0xff]  ;;  %v234_v42 = vld [vmem:[#allocation2 + $0x570] sm:$0xff] }
  0x7b   :  { %1798 = vmatprep.subr.bf16.mxu1 %v2863_v57  ;;  %v149_v50 = vld [vmem:[#allocation2 + $0x2c8] sm:$0xff]  ;;  %v2935_v53 = vcombine.high %v285_v43, %v289_v45  ;;  %v2934_v57 = vcombine.low %v285_v43, %v289_v45 }
  0x7c   :  { %1758 = vmatpush1.bf16.msra.mxu0 %v2734_v60  ;;  %v153_v51 = vld [vmem:[#allocation2 + $0x2e8] sm:$0xff] }
  0x7d   :  { %1759 = vmatprep.subr.bf16.mxu0 %v2727_v62  ;;  %v277_v52 = vld [vmem:[#allocation2 + $0x6c8] sm:$0xff]  ;;  %v2799_v58 = vcombine.high %v149_v50, %v153_v51  ;;  %v2798_v1 = vcombine.low %v149_v50, %v153_v51  ;;  %v222_v50 = vld [vmem:[#allocation2 + $0x510] sm:$0xff] }
  0x7e   :  { %1799 = vmatpush1.bf16.msra.mxu1 %v2862_v61  ;;  %v281_v54 = vld [vmem:[#allocation2 + $0x6e8] sm:$0xff]  ;;  %v226_v51 = vld [vmem:[#allocation2 + $0x530] sm:$0xff] }
  0x7f   :  { %1800 = vmatprep.subr.bf16.mxu1 %v2855_v2  ;;  %v141_v60 = vld [vmem:[#allocation2 + $0x288] sm:$0xff]  ;;  %v2927_v63 = vcombine.high %v277_v52, %v281_v54  ;;  %v2926_v2 = vcombine.low %v277_v52, %v281_v54 }
  0x80   :  { %1760 = vmatpush1.bf16.msra.mxu0 %v2726_v5  ;;  %v145_v61 = vld [vmem:[#allocation2 + $0x2a8] sm:$0xff] }
  0x81   :  { %1761 = vmatprep.subr.bf16.mxu0 %v2719_v7  ;;  %v269_v62 = vld [vmem:[#allocation2 + $0x688] sm:$0xff]  ;;  %v2791_v4 = vcombine.high %v141_v60, %v145_v61  ;;  %v2790_v11 = vcombine.low %v141_v60, %v145_v61  ;;  %v214_v60 = vld [vmem:[#allocation2 + $0x4d0] sm:$0xff] }
  0x82   :  { %1801 = vmatpush1.bf16.msra.mxu1 %v2854_v6  ;;  %v273_v0 = vld [vmem:[#allocation2 + $0x6a8] sm:$0xff]  ;;  %v218_v61 = vld [vmem:[#allocation2 + $0x4f0] sm:$0xff] }
  0x83   :  { %1802 = vmatprep.subr.bf16.mxu1 %v2847_v12  ;;  %v133_v5 = vld [vmem:[#allocation2 + $0x248] sm:$0xff]  ;;  %v2919_v8 = vcombine.high %v269_v62, %v273_v0  ;;  %v2918_v12 = vcombine.low %v269_v62, %v273_v0 }
  0x84   :  { %1762 = vmatpush1.bf16.msra.mxu0 %v2718_v14  ;;  %v137_v6 = vld [vmem:[#allocation2 + $0x268] sm:$0xff] }
  0x85   :  { %1763 = vmatprep.subr.bf16.mxu0 %v2711_v16  ;;  %v261_v7 = vld [vmem:[#allocation2 + $0x648] sm:$0xff]  ;;  %v2783_v13 = vcombine.high %v133_v5, %v137_v6  ;;  %v2782_v20 = vcombine.low %v133_v5, %v137_v6  ;;  %v206_v5 = vld [vmem:[#allocation2 + $0x490] sm:$0xff] }
  0x86   :  { %1803 = vmatpush1.bf16.msra.mxu1 %v2846_v15  ;;  %v265_v10 = vld [vmem:[#allocation2 + $0x668] sm:$0xff]  ;;  %v210_v6 = vld [vmem:[#allocation2 + $0x4b0] sm:$0xff] }
  0x87   :  { %1804 = vmatprep.subr.bf16.mxu1 %v2839_v21  ;;  %v125_v14 = vld [vmem:[#allocation2 + $0x208] sm:$0xff]  ;;  %v2911_v17 = vcombine.high %v261_v7, %v265_v10  ;;  %v2910_v21 = vcombine.low %v261_v7, %v265_v10 }
  0x88   :  { %1764 = vmatpush1.bf16.msra.mxu0 %v2710_v23  ;;  %v129_v15 = vld [vmem:[#allocation2 + $0x228] sm:$0xff]  ;;  %v118_v23 = vld [vmem:[#allocation2 + $0x1d0] sm:$0xff] }
  0x89   :  { %1765 = vmatprep.subr.bf16.mxu0 %v2831_v25  ;;  %v253_v16 = vld [vmem:[#allocation2 + $0x608] sm:$0xff]  ;;  %v2775_v22 = vcombine.high %v125_v14, %v129_v15  ;;  %v246_v25 = vld [vmem:[#allocation2 + $0x5d0] sm:$0xff]  ;;  %v2774_v59 = vcombine.low %v125_v14, %v129_v15 }
  0x8a   :  { %1805 = vmatpush1.bf16.msra.mxu1 %v2838_v24  ;;  %v257_v19 = vld [vmem:[#allocation2 + $0x628] sm:$0xff]  ;;  %v122_v24 = vld [vmem:[#allocation2 + $0x1f0] sm:$0xff]  ;;  %v2897_v33 = vcombine.high %v246_v25, %v250_v56 }
  0x8b   :  { %1806 = vmatprep.subr.bf16.mxu1 %v2959_v28  ;;  %v2903_v27 = vcombine.high %v253_v16, %v257_v19  ;;  %v2902_v28 = vcombine.low %v253_v16, %v257_v19  ;;  %v2769_v29 = vcombine.high %v118_v23, %v122_v24  ;;  %v2768_v35 = vcombine.low %v118_v23, %v122_v24  ;;  %v198_v14 = vld [vmem:[#allocation2 + $0x450] sm:$0xff] }
  0x8c   :  { %1766 = vmatpush2.bf16.msra.mxu0 %v2830_v30  ;;  %v110_v30 = vld [vmem:[#allocation2 + $0x190] sm:$0xff] }
  0x8d   :  { %1767 = vmatprep.subr.bf16.mxu0 %v2823_v32  ;;  %v238_v32 = vld [vmem:[#allocation2 + $0x590] sm:$0xff] }
  0x8e   :  { %1807 = vmatpush2.bf16.msra.mxu1 %v2958_v31  ;;  %v114_v31 = vld [vmem:[#allocation2 + $0x1b0] sm:$0xff] }
  0x8f   :  { %1808 = vmatprep.subr.bf16.mxu1 %v2951_v36  ;;  %v2896_v36 = vcombine.low %v246_v25, %v250_v56  ;;  %v2761_v37 = vcombine.high %v110_v30, %v114_v31  ;;  %v2760_v43 = vcombine.low %v110_v30, %v114_v31  ;;  %v202_v15 = vld [vmem:[#allocation2 + $0x470] sm:$0xff] }
  0x90   :  { %1768 = vmatpush2.bf16.msra.mxu0 %v2822_v38  ;;  %v2889_v38 = vcombine.high %v238_v32, %v242_v34  ;;  %v190_v23 = vld [vmem:[#allocation2 + $0x410] sm:$0xff] }
  0x91   :  { %1769 = vmatprep.subr.bf16.mxu0 %v2815_v40  ;;  %v106_v40 = vld [vmem:[#allocation2 + $0x170] sm:$0xff] }
  0x92   :  { %1809 = vmatpush2.bf16.msra.mxu1 %v2950_v39  ;;  %v102_v39 = vld [vmem:[#allocation2 + $0x150] sm:$0xff] }
  0x93   :  { %1810 = vmatprep.subr.bf16.mxu1 %v2943_v44  ;;  %v2888_v44 = vcombine.low %v238_v32, %v242_v34  ;;  %v2753_v45 = vcombine.high %v102_v39, %v106_v40  ;;  %v2752_v52 = vcombine.low %v102_v39, %v106_v40  ;;  %v194_v24 = vld [vmem:[#allocation2 + $0x430] sm:$0xff] }
  0x94   :  { %1770 = vmatpush2.bf16.msra.mxu0 %v2814_v47  ;;  %v2881_v47 = vcombine.high %v230_v41, %v234_v42  ;;  %v310_v30 = vld [vmem:[#allocation2 + $0x7d0] sm:$0xff] }
  0x95   :  { %1771 = vmatprep.subr.bf16.mxu0 %v2807_v49  ;;  %v98_v49 = vld [vmem:[#allocation2 + $0x130] sm:$0xff] }
  0x96   :  { %1811 = vmatpush2.bf16.msra.mxu1 %v2942_v48  ;;  %v94_v48 = vld [vmem:[#allocation2 + $0x110] sm:$0xff] }
  0x97   :  { %1812 = vmatprep.subr.bf16.mxu1 %v2935_v53  ;;  %v2880_v53 = vcombine.low %v230_v41, %v234_v42  ;;  %v2745_v54 = vcombine.high %v94_v48, %v98_v49  ;;  %v2744_v62 = vcombine.low %v94_v48, %v98_v49  ;;  %v314_v31 = vld [vmem:[#allocation2 + $0x7f0] sm:$0xff] }
  0x98   :  { %1772 = vmatpush2.bf16.msra.mxu0 %v2806_v55  ;;  %v2873_v55 = vcombine.high %v222_v50, %v226_v51  ;;  %v306_v39 = vld [vmem:[#allocation2 + $0x7b0] sm:$0xff]  ;;  %v2960_v41 = vcombine.low %v310_v30, %v314_v31 }
  0x99   :  { %1773 = vmatprep.subr.bf16.mxu0 %v2799_v58  ;;  %v90_v58 = vld [vmem:[#allocation2 + $0xf0] sm:$0xff] }
  0x9a   :  { %1813 = vmatpush2.bf16.msra.mxu1 %v2934_v57  ;;  %v86_v57 = vld [vmem:[#allocation2 + $0xd0] sm:$0xff] }
  0x9b   :  { %1814 = vmatprep.subr.bf16.mxu1 %v2927_v63  ;;  %v2872_v63 = vcombine.low %v222_v50, %v226_v51  ;;  %v2737_v0 = vcombine.high %v86_v57, %v90_v58  ;;  %v2736_v7 = vcombine.low %v86_v57, %v90_v58  ;;  %v298_v48 = vld [vmem:[#allocation2 + $0x770] sm:$0xff] }
  0x9c   :  { %1774 = vmatpush2.bf16.msra.mxu0 %v2798_v1  ;;  %v2865_v1 = vcombine.high %v214_v60, %v218_v61  ;;  %v290_v57 = vld [vmem:[#allocation2 + $0x730] sm:$0xff] }
  0x9d   :  { %1775 = vmatprep.subr.bf16.mxu0 %v2791_v4  ;;  %v82_v4 = vld [vmem:[#allocation2 + $0xb0] sm:$0xff] }
  0x9e   :  { %1815 = vmatpush2.bf16.msra.mxu1 %v2926_v2  ;;  %v78_v2 = vld [vmem:[#allocation2 + $0x90] sm:$0xff] }
  0x9f   :  { %1816 = vmatprep.subr.bf16.mxu1 %v2919_v8  ;;  %v2864_v8 = vcombine.low %v214_v60, %v218_v61  ;;  %v2729_v10 = vcombine.high %v78_v2, %v82_v4  ;;  %v2728_v16 = vcombine.low %v78_v2, %v82_v4  ;;  %v282_v2 = vld [vmem:[#allocation2 + $0x6f0] sm:$0xff] }
  0xa0   :  { %1776 = vmatpush2.bf16.msra.mxu0 %v2790_v11  ;;  %v2857_v11 = vcombine.high %v206_v5, %v210_v6 }
  0xa1   :  { %1777 = vmatprep.subr.bf16.mxu0 %v2783_v13  ;;  %v74_v13 = vld [vmem:[#allocation2 + $0x70] sm:$0xff] }
  0xa2   :  { %1817 = vmatpush2.bf16.msra.mxu1 %v2918_v12  ;;  %v70_v12 = vld [vmem:[#allocation2 + $0x50] sm:$0xff] }
  0xa3   :  { %1818 = vmatprep.subr.bf16.mxu1 %v2911_v17  ;;  %v2856_v17 = vcombine.low %v206_v5, %v210_v6  ;;  %v2721_v19 = vcombine.high %v70_v12, %v74_v13  ;;  %v2720_v25 = vcombine.low %v70_v12, %v74_v13  ;;  %v274_v12 = vld [vmem:[#allocation2 + $0x6b0] sm:$0xff] }
  0xa4   :  { %1778 = vmatpush2.bf16.msra.mxu0 %v2782_v20  ;;  %v2849_v20 = vcombine.high %v198_v14, %v202_v15 }
  0xa5   :  { %1779 = vmatprep.subr.bf16.mxu0 %v2775_v22  ;;  %v66_v22 = vld [vmem:[#allocation2 + $0x30] sm:$0xff] }
  0xa6   :  { %1819 = vmatpush2.bf16.msra.mxu1 %v2910_v21  ;;  %v62_v21 = vld [vmem:[#allocation2 + $0x10] sm:$0xff] }
  0xa7   :  { %1820 = vmatprep.subr.bf16.mxu1 %v2903_v27  ;;  %v2848_v27 = vcombine.low %v198_v14, %v202_v15  ;;  %v2713_v56 = vcombine.high %v62_v21, %v66_v22  ;;  %v2712_v32 = vcombine.low %v62_v21, %v66_v22  ;;  %v266_v21 = vld [vmem:[#allocation2 + $0x670] sm:$0xff] }
  0xa8   :  { %1780 = vmatpush2.bf16.msra.mxu0 %v2774_v59  ;;  %v2841_v59 = vcombine.high %v190_v23, %v194_v24 }
  0xa9   :  { %1831 = vmatprep.subr.bf16.mxu0 %v2769_v29  ;;  %v186_v29 = vld [vmem:[#allocation2 + $0x3f0] sm:$0xff] }
  0xaa   :  { %1821 = vmatpush2.bf16.msra.mxu1 %v2902_v28  ;;  %v182_v28 = vld [vmem:[#allocation2 + $0x3d0] sm:$0xff] }
  0xab   :  { %1872 = vmatprep.subr.bf16.mxu1 %v2897_v33  ;;  %1782 = vmatmul.mubr.bf16.vlgmr.msra.gmra.mxu0 %v3343_v18  ;;  %v2840_v33 = vcombine.low %v190_v23, %v194_v24  ;;  %v2833_v34 = vcombine.high %v182_v28, %v186_v29  ;;  %v2832_v40 = vcombine.low %v182_v28, %v186_v29  ;;  %v258_v28 = vld [vmem:[#allocation2 + $0x630] sm:$0xff] }
  0xac   :  { %1832 = vmatpush1.bf16.msra.mxu0 %v2768_v35  ;;  %1863 = vmatprep.mubr.bf16.mxu0 %v3333_v3  ;;  %v2961_v35 = vcombine.high %v310_v30, %v314_v31 }
  0xad   :  { %1823 = vmatmul.mubr.bf16.vlgmr.msra.gmra.mxu1 %v3347_v26  ;;  %1833 = vmatprep.subr.bf16.mxu0 %v2761_v37  ;;  %v178_v37 = vld [vmem:[#allocation2 + $0x3b0] sm:$0xff] }
  0xae   :  { %1873 = vmatpush1.bf16.msra.mxu1 %v2896_v36  ;;  %1904 = vmatprep.mubr.bf16.mxu1 %v3338_v9  ;;  %v174_v36 = vld [vmem:[#allocation2 + $0x390] sm:$0xff] }
  0xaf   :  { %1874 = vmatprep.subr.bf16.mxu1 %v2889_v38  ;;  %v302_v38 = vld [vmem:[#allocation2 + $0x790] sm:$0xff]  ;;  %v2825_v42 = vcombine.high %v174_v36, %v178_v37  ;;  %v2824_v49 = vcombine.low %v174_v36, %v178_v37  ;;  %v251_v36 = vld [vmem:[#allocation2 + $0x5f8] sm:$0xff] }
  0xb0   :  { %1834 = vmatpush1.bf16.msra.mxu0 %v2760_v43  ;;  %v2953_v43 = vcombine.high %v302_v38, %v306_v39  ;;  %v2952_v50 = vcombine.low %v302_v38, %v306_v39 }
  0xb1   :  { %1835 = vmatprep.subr.bf16.mxu0 %v2753_v45  ;;  %v170_v45 = vld [vmem:[#allocation2 + $0x370] sm:$0xff] }
  0xb2   :  { %1875 = vmatpush1.bf16.msra.mxu1 %v2888_v44  ;;  %v166_v44 = vld [vmem:[#allocation2 + $0x350] sm:$0xff] }
  0xb3   :  { %1876 = vmatprep.subr.bf16.mxu1 %v2881_v47  ;;  %v294_v47 = vld [vmem:[#allocation2 + $0x750] sm:$0xff]  ;;  %v2817_v51 = vcombine.high %v166_v44, %v170_v45  ;;  %v2816_v58 = vcombine.low %v166_v44, %v170_v45  ;;  %v243_v44 = vld [vmem:[#allocation2 + $0x5b8] sm:$0xff] }
  0xb4   :  { %1836 = vmatpush1.bf16.msra.mxu0 %v2752_v52  ;;  %v2945_v52 = vcombine.high %v294_v47, %v298_v48  ;;  %v2944_v60 = vcombine.low %v294_v47, %v298_v48 }
  0xb5   :  { %1837 = vmatprep.subr.bf16.mxu0 %v2745_v54  ;;  %v162_v54 = vld [vmem:[#allocation2 + $0x330] sm:$0xff] }
  0xb6   :  { %1877 = vmatpush1.bf16.msra.mxu1 %v2880_v53  ;;  %v158_v53 = vld [vmem:[#allocation2 + $0x310] sm:$0xff] }
  0xb7   :  { %1878 = vmatprep.subr.bf16.mxu1 %v2873_v55  ;;  %v286_v55 = vld [vmem:[#allocation2 + $0x710] sm:$0xff]  ;;  %v2809_v61 = vcombine.high %v158_v53, %v162_v54  ;;  %v2808_v4 = vcombine.low %v158_v53, %v162_v54  ;;  %v235_v53 = vld [vmem:[#allocation2 + $0x578] sm:$0xff] }
  0xb8   :  { %1838 = vmatpush1.bf16.msra.mxu0 %v2744_v62  ;;  %v2937_v62 = vcombine.high %v286_v55, %v290_v57  ;;  %v2936_v5 = vcombine.low %v286_v55, %v290_v57 }
  0xb9   :  { %1839 = vmatprep.subr.bf16.mxu0 %v2737_v0  ;;  %v154_v0 = vld [vmem:[#allocation2 + $0x2f0] sm:$0xff] }
  0xba   :  { %1879 = vmatpush1.bf16.msra.mxu1 %v2872_v63  ;;  %v150_v63 = vld [vmem:[#allocation2 + $0x2d0] sm:$0xff] }
  0xbb   :  { %1880 = vmatprep.subr.bf16.mxu1 %v2865_v1  ;;  %v278_v1 = vld [vmem:[#allocation2 + $0x6d0] sm:$0xff]  ;;  %v2801_v6 = vcombine.high %v150_v63, %v154_v0  ;;  %v2800_v13 = vcombine.low %v150_v63, %v154_v0  ;;  %v227_v63 = vld [vmem:[#allocation2 + $0x538] sm:$0xff] }
  0xbc   :  { %1840 = vmatpush1.bf16.msra.mxu0 %v2736_v7  ;;  %v2929_v7 = vcombine.high %v278_v1, %v282_v2  ;;  %v2928_v14 = vcombine.low %v278_v1, %v282_v2 }
  0xbd   :  { %1841 = vmatprep.subr.bf16.mxu0 %v2729_v10  ;;  %v146_v10 = vld [vmem:[#allocation2 + $0x2b0] sm:$0xff] }
  0xbe   :  { %1881 = vmatpush1.bf16.msra.mxu1 %v2864_v8  ;;  %v142_v8 = vld [vmem:[#allocation2 + $0x290] sm:$0xff] }
  0xbf   :  { %1882 = vmatprep.subr.bf16.mxu1 %v2857_v11  ;;  %v270_v11 = vld [vmem:[#allocation2 + $0x690] sm:$0xff]  ;;  %v2793_v15 = vcombine.high %v142_v8, %v146_v10  ;;  %v2792_v22 = vcombine.low %v142_v8, %v146_v10  ;;  %v219_v8 = vld [vmem:[#allocation2 + $0x4f8] sm:$0xff] }
  0xc0   :  { %1842 = vmatpush1.bf16.msra.mxu0 %v2728_v16  ;;  %v2921_v16 = vcombine.high %v270_v11, %v274_v12  ;;  %v2920_v23 = vcombine.low %v270_v11, %v274_v12  ;;  %v79_v12 = vld [vmem:[#allocation2 + $0x98] sm:$0xff] }
  0xc1   :  { %1843 = vmatprep.subr.bf16.mxu0 %v2721_v19  ;;  %v138_v19 = vld [vmem:[#allocation2 + $0x270] sm:$0xff] }
  0xc2   :  { %1883 = vmatpush1.bf16.msra.mxu1 %v2856_v17  ;;  %v134_v17 = vld [vmem:[#allocation2 + $0x250] sm:$0xff] }
  0xc3   :  { %1884 = vmatprep.subr.bf16.mxu1 %v2849_v20  ;;  %v262_v20 = vld [vmem:[#allocation2 + $0x650] sm:$0xff]  ;;  %v2785_v24 = vcombine.high %v134_v17, %v138_v19  ;;  %v2784_v29 = vcombine.low %v134_v17, %v138_v19 }
  0xc4   :  { %1844 = vmatpush1.bf16.msra.mxu0 %v2720_v25  ;;  %v2913_v25 = vcombine.high %v262_v20, %v266_v21  ;;  %v2912_v30 = vcombine.low %v262_v20, %v266_v21  ;;  %v71_v21 = vld [vmem:[#allocation2 + $0x58] sm:$0xff] }
  0xc5   :  { %1845 = vmatprep.subr.bf16.mxu0 %v2713_v56  ;;  %v130_v56 = vld [vmem:[#allocation2 + $0x230] sm:$0xff] }
  0xc6   :  { %1885 = vmatpush1.bf16.msra.mxu1 %v2848_v27  ;;  %v126_v27 = vld [vmem:[#allocation2 + $0x210] sm:$0xff] }
  0xc7   :  { %1886 = vmatprep.subr.bf16.mxu1 %v2841_v59  ;;  %v254_v59 = vld [vmem:[#allocation2 + $0x610] sm:$0xff]  ;;  %v2777_v31 = vcombine.high %v126_v27, %v130_v56  ;;  %v2776_v37 = vcombine.low %v126_v27, %v130_v56 }
  0xc8   :  { %1846 = vmatpush1.bf16.msra.mxu0 %v2712_v32  ;;  %v2905_v32 = vcombine.high %v254_v59, %v258_v28  ;;  %v2904_v38 = vcombine.low %v254_v59, %v258_v28  ;;  %v63_v28 = vld [vmem:[#allocation2 + $0x18] sm:$0xff] }
  0xc9   :  { %1847 = vmatprep.subr.bf16.mxu0 %v2833_v34  ;;  %v123_v34 = vld [vmem:[#allocation2 + $0x1f8] sm:$0xff] }
  0xca   :  { %1887 = vmatpush1.bf16.msra.mxu1 %v2840_v33  ;;  %v119_v33 = vld [vmem:[#allocation2 + $0x1d8] sm:$0xff] }
  0xcb   :  { %1888 = vmatprep.subr.bf16.mxu1 %v2961_v35  ;;  %v247_v35 = vld [vmem:[#allocation2 + $0x5d8] sm:$0xff]  ;;  %v2771_v39 = vcombine.high %v119_v33, %v123_v34  ;;  %v2770_v45 = vcombine.low %v119_v33, %v123_v34 }
  0xcc   :  { %1848 = vmatpush2.bf16.msra.mxu0 %v2832_v40  ;;  %v2899_v40 = vcombine.high %v247_v35, %v251_v36  ;;  %v2898_v47 = vcombine.low %v247_v35, %v251_v36  ;;  %v183_v36 = vld [vmem:[#allocation2 + $0x3d8] sm:$0xff] }
  0xcd   :  { %1849 = vmatprep.subr.bf16.mxu0 %v2825_v42  ;;  %v115_v42 = vld [vmem:[#allocation2 + $0x1b8] sm:$0xff] }
  0xce   :  { %1889 = vmatpush2.bf16.msra.mxu1 %v2960_v41  ;;  %v111_v41 = vld [vmem:[#allocation2 + $0x198] sm:$0xff] }
  0xcf   :  { %1890 = vmatprep.subr.bf16.mxu1 %v2953_v43  ;;  %v239_v43 = vld [vmem:[#allocation2 + $0x598] sm:$0xff]  ;;  %v2763_v48 = vcombine.high %v111_v41, %v115_v42  ;;  %v2762_v54 = vcombine.low %v111_v41, %v115_v42 }
  0xd0   :  { %1850 = vmatpush2.bf16.msra.mxu0 %v2824_v49  ;;  %v2891_v49 = vcombine.high %v239_v43, %v243_v44  ;;  %v2890_v55 = vcombine.low %v239_v43, %v243_v44  ;;  %v175_v44 = vld [vmem:[#allocation2 + $0x398] sm:$0xff] }
  0xd1   :  { %1851 = vmatprep.subr.bf16.mxu0 %v2817_v51  ;;  %v107_v51 = vld [vmem:[#allocation2 + $0x178] sm:$0xff] }
  0xd2   :  { %1891 = vmatpush2.bf16.msra.mxu1 %v2952_v50  ;;  %v103_v50 = vld [vmem:[#allocation2 + $0x158] sm:$0xff] }
  0xd3   :  { %1892 = vmatprep.subr.bf16.mxu1 %v2945_v52  ;;  %v231_v52 = vld [vmem:[#allocation2 + $0x558] sm:$0xff]  ;;  %v2755_v57 = vcombine.high %v103_v50, %v107_v51  ;;  %v2754_v0 = vcombine.low %v103_v50, %v107_v51 }
  0xd4   :  { %1852 = vmatpush2.bf16.msra.mxu0 %v2816_v58  ;;  %v2883_v58 = vcombine.high %v231_v52, %v235_v53  ;;  %v2882_v1 = vcombine.low %v231_v52, %v235_v53  ;;  %v167_v53 = vld [vmem:[#allocation2 + $0x358] sm:$0xff] }
  0xd5   :  { %1853 = vmatprep.subr.bf16.mxu0 %v2809_v61  ;;  %v99_v61 = vld [vmem:[#allocation2 + $0x138] sm:$0xff] }
  0xd6   :  { %1893 = vmatpush2.bf16.msra.mxu1 %v2944_v60  ;;  %v95_v60 = vld [vmem:[#allocation2 + $0x118] sm:$0xff] }
  0xd7   :  { %1894 = vmatprep.subr.bf16.mxu1 %v2937_v62  ;;  %v223_v62 = vld [vmem:[#allocation2 + $0x518] sm:$0xff]  ;;  %v2747_v2 = vcombine.high %v95_v60, %v99_v61  ;;  %v2746_v10 = vcombine.low %v95_v60, %v99_v61 }
  0xd8   :  { %1854 = vmatpush2.bf16.msra.mxu0 %v2808_v4  ;;  %v2875_v4 = vcombine.high %v223_v62, %v227_v63 }
  0xd9   :  { %1855 = vmatprep.subr.bf16.mxu0 %v2801_v6  ;;  %v91_v6 = vld [vmem:[#allocation2 + $0xf8] sm:$0xff] }
  0xda   :  { %1895 = vmatpush2.bf16.msra.mxu1 %v2936_v5  ;;  %v87_v5 = vld [vmem:[#allocation2 + $0xd8] sm:$0xff] }
  0xdb   :  { %1896 = vmatprep.subr.bf16.mxu1 %v2929_v7  ;;  %v215_v7 = vld [vmem:[#allocation2 + $0x4d8] sm:$0xff]  ;;  %v2739_v11 = vcombine.high %v87_v5, %v91_v6 }
  0xdc   :  { %1856 = vmatpush2.bf16.msra.mxu0 %v2800_v13  ;;  %v83_v13 = vld [vmem:[#allocation2 + $0xb8] sm:$0xff]  ;;  %v2866_v17 = vcombine.low %v215_v7, %v219_v8 }
  0xdd   :  { %1857 = vmatprep.subr.bf16.mxu0 %v2793_v15  ;;  %v211_v15 = vld [vmem:[#allocation2 + $0x4b8] sm:$0xff]  ;;  %v2731_v19 = vcombine.high %v79_v12, %v83_v13 }
  0xde   :  { %1897 = vmatpush2.bf16.msra.mxu1 %v2928_v14  ;;  %v207_v14 = vld [vmem:[#allocation2 + $0x498] sm:$0xff] }
  0xdf   :  { %1898 = vmatprep.subr.bf16.mxu1 %v2921_v16  ;;  %v2738_v16 = vcombine.low %v87_v5, %v91_v6  ;;  %v2859_v20 = vcombine.high %v207_v14, %v211_v15  ;;  %v2858_v27 = vcombine.low %v207_v14, %v211_v15  ;;  %v143_v15 = vld [vmem:[#allocation2 + $0x298] sm:$0xff] }
  0xe0   :  { %1858 = vmatpush2.bf16.msra.mxu0 %v2792_v22  ;;  %v75_v22 = vld [vmem:[#allocation2 + $0x78] sm:$0xff] }
  0xe1   :  { %1859 = vmatprep.subr.bf16.mxu0 %v2785_v24  ;;  %v203_v24 = vld [vmem:[#allocation2 + $0x478] sm:$0xff]  ;;  %v2723_v56 = vcombine.high %v71_v21, %v75_v22 }
  0xe2   :  { %1899 = vmatpush2.bf16.msra.mxu1 %v2920_v23  ;;  %v199_v23 = vld [vmem:[#allocation2 + $0x458] sm:$0xff] }
  0xe3   :  { %1900 = vmatprep.subr.bf16.mxu1 %v2913_v25  ;;  %v2730_v25 = vcombine.low %v79_v12, %v83_v13  ;;  %v2851_v59 = vcombine.high %v199_v23, %v203_v24  ;;  %v2850_v33 = vcombine.low %v199_v23, %v203_v24  ;;  %v135_v24 = vld [vmem:[#allocation2 + $0x258] sm:$0xff] }
  0xe4   :  { %1860 = vmatpush2.bf16.msra.mxu0 %v2784_v29  ;;  %v67_v29 = vld [vmem:[#allocation2 + $0x38] sm:$0xff] }
  0xe5   :  { %1861 = vmatprep.subr.bf16.mxu0 %v2777_v31  ;;  %v195_v31 = vld [vmem:[#allocation2 + $0x438] sm:$0xff]  ;;  %v2715_v34 = vcombine.high %v63_v28, %v67_v29 }
  0xe6   :  { %1901 = vmatpush2.bf16.msra.mxu1 %v2912_v30  ;;  %v191_v30 = vld [vmem:[#allocation2 + $0x418] sm:$0xff] }
  0xe7   :  { %1902 = vmatprep.subr.bf16.mxu1 %v2905_v32  ;;  %v2722_v32 = vcombine.low %v71_v21, %v75_v22  ;;  %v2843_v35 = vcombine.high %v191_v30, %v195_v31  ;;  %v2842_v41 = vcombine.low %v191_v30, %v195_v31  ;;  %v127_v31 = vld [vmem:[#allocation2 + $0x218] sm:$0xff] }
  0xe8   :  { %1862 = vmatpush2.bf16.msra.mxu0 %v2776_v37  ;;  %v187_v37 = vld [vmem:[#allocation2 + $0x3f8] sm:$0xff] }
  0xe9   :  { %1913 = vmatprep.subr.bf16.mxu0 %v2771_v39  ;;  %v315_v39 = vld [vmem:[#allocation2 + $0x7f8] sm:$0xff]  ;;  %v2835_v42 = vcombine.high %v183_v36, %v187_v37 }
  0xea   :  { %1903 = vmatpush2.bf16.msra.mxu1 %v2904_v38  ;;  %v311_v38 = vld [vmem:[#allocation2 + $0x7d8] sm:$0xff] }
  0xeb   :  { %1954 = vmatprep.subr.bf16.mxu1 %v2899_v40  ;;  %1864 = vmatmul.mubr.bf16.vlgmr.msra.gmra.mxu0 %v3343_v18  ;;  %v2714_v40 = vcombine.low %v63_v28, %v67_v29  ;;  %v2963_v43 = vcombine.high %v311_v38, %v315_v39  ;;  %v2962_v50 = vcombine.low %v311_v38, %v315_v39 }
  0xec   :  { %1914 = vmatpush1.bf16.msra.mxu0 %v2770_v45  ;;  %1945 = vmatprep.mubr.bf16.mxu0 %v3333_v3  ;;  %v2874_v3 = vcombine.low %v223_v62, %v227_v63  ;;  %v179_v45 = vld [vmem:[#allocation2 + $0x3b8] sm:$0xff] }
  0xed   :  { %1905 = vmatmul.mubr.bf16.vlgmr.msra.gmra.mxu1 %v3347_v26  ;;  %1915 = vmatprep.subr.bf16.mxu0 %v2763_v48  ;;  %v307_v48 = vld [vmem:[#allocation2 + $0x7b8] sm:$0xff]  ;;  %v2827_v51 = vcombine.high %v175_v44, %v179_v45 }
  0xee   :  { %1955 = vmatpush1.bf16.msra.mxu1 %v2898_v47  ;;  %1986 = vmatprep.mubr.bf16.mxu1 %v3338_v9  ;;  %v2867_v9 = vcombine.high %v215_v7, %v219_v8  ;;  %v303_v47 = vld [vmem:[#allocation2 + $0x798] sm:$0xff] }
  0xef   :  { %1956 = vmatprep.subr.bf16.mxu1 %v2891_v49  ;;  %v2834_v49 = vcombine.low %v183_v36, %v187_v37  ;;  %v2955_v52 = vcombine.high %v303_v47, %v307_v48  ;;  %v2954_v60 = vcombine.low %v303_v47, %v307_v48  ;;  %v159_v63 = vld [vmem:[#allocation2 + $0x318] sm:$0xff]  ;;  %v3126_v47 = vld [vmem:[%s3579_s3 + $0x70] sm:$0xff]  }
  0xf0   :  { %1916 = vmatpush1.bf16.msra.mxu0 %v2762_v54  ;;  %v171_v54 = vld [vmem:[#allocation2 + $0x378] sm:$0xff] }
  0xf1   :  { %1917 = vmatprep.subr.bf16.mxu0 %v2755_v57  ;;  %v299_v57 = vld [vmem:[#allocation2 + $0x778] sm:$0xff]  ;;  %v2819_v61 = vcombine.high %v167_v53, %v171_v54 }
  0xf2   :  { %1957 = vmatpush1.bf16.msra.mxu1 %v2890_v55  ;;  %v295_v55 = vld [vmem:[#allocation2 + $0x758] sm:$0xff] }
  0xf3   :  { %1958 = vmatprep.subr.bf16.mxu1 %v2883_v58  ;;  %v2826_v58 = vcombine.low %v175_v44, %v179_v45  ;;  %v2947_v62 = vcombine.high %v295_v55, %v299_v57  ;;  %v2946_v5 = vcombine.low %v295_v55, %v299_v57  ;;  %v151_v8 = vld [vmem:[#allocation2 + $0x2d8] sm:$0xff]  ;;  %v3368_v44 = vld [vmem:[#allocation5] sm:$0xff]  ;;  %v3128_v55 = vld [vmem:[%s3579_s3 + $0x68] sm:$0xff]  }
  0xf4   :  { %1918 = vmatpush1.bf16.msra.mxu0 %v2754_v0  ;;  %v163_v0 = vld [vmem:[#allocation2 + $0x338] sm:$0xff]  ;;  %v3143_v57 = vld [vmem:[%s3579_s3 + $0xb0] sm:$0xff]  }
  0xf5   :  { %1919 = vmatprep.subr.bf16.mxu0 %v2747_v2  ;;  %v291_v2 = vld [vmem:[#allocation2 + $0x738] sm:$0xff]  ;;  %v2811_v6 = vcombine.high %v159_v63, %v163_v0 }
  0xf6   :  { %1959 = vmatpush1.bf16.msra.mxu1 %v2882_v1  ;;  %v287_v1 = vld [vmem:[#allocation2 + $0x718] sm:$0xff] }
  0xf7   :  { %1960 = vmatprep.subr.bf16.mxu1 %v2875_v4  ;;  %v2818_v4 = vcombine.low %v167_v53, %v171_v54  ;;  %v2939_v7 = vcombine.high %v287_v1, %v291_v2  ;;  %v2938_v12 = vcombine.low %v287_v1, %v291_v2  ;;  %v3125_v45 = vld [vmem:[%s3579_s3 + $0x38] sm:$0xff]   ;;  %v3127_v53 = vld [vmem:[%s3579_s3 + $0x30] sm:$0xff]   ;;  %v3130_v1 = vld [vmem:[%s3579_s3 + $0x60] sm:$0xff]  }
  0xf8   :  { %1920 = vmatpush1.bf16.msra.mxu0 %v2746_v10  ;;  %v155_v10 = vld [vmem:[#allocation2 + $0x2f8] sm:$0xff]  ;;  %v3145_v2 = vld [vmem:[%s3579_s3 + $0xa8] sm:$0xff]  }
  0xf9   :  { %1921 = vmatprep.subr.bf16.mxu0 %v2739_v11  ;;  %v283_v11 = vld [vmem:[#allocation2 + $0x6f8] sm:$0xff]  ;;  %v2803_v13 = vcombine.high %v151_v8, %v155_v10 }
  0xfa   :  { %1961 = vmatpush1.bf16.msra.mxu1 %v2874_v3  ;;  %v279_v3 = vld [vmem:[#allocation2 + $0x6d8] sm:$0xff] }
  0xfb   :  { %1962 = vmatprep.subr.bf16.mxu1 %v2867_v9  ;;  %v2810_v9 = vcombine.low %v159_v63, %v163_v0  ;;  %v2931_v14 = vcombine.high %v279_v3, %v283_v11  ;;  %v2930_v21 = vcombine.low %v279_v3, %v283_v11  ;;  %v3141_v48 = vld [vmem:[%s3579_s3 + $0xb8] sm:$0xff]   ;;  %v3129_v63 = vld [vmem:[%s3579_s3 + $0x28] sm:$0xff]   ;;  %v3147_v11 = vld [vmem:[%s3579_s3 + $0xa0] sm:$0xff]  }
  0xfc   :  { %1922 = vmatpush1.bf16.msra.mxu0 %v2738_v16  ;;  %v147_v16 = vld [vmem:[#allocation2 + $0x2b8] sm:$0xff] }
  0xfd   :  { %1923 = vmatprep.subr.bf16.mxu0 %v2731_v19  ;;  %v275_v19 = vld [vmem:[#allocation2 + $0x6b8] sm:$0xff]  ;;  %v2795_v22 = vcombine.high %v143_v15, %v147_v16 }
  0xfe   :  { %1963 = vmatpush1.bf16.msra.mxu1 %v2866_v17  ;;  %v271_v17 = vld [vmem:[#allocation2 + $0x698] sm:$0xff] }
  0xff   :  { %1964 = vmatprep.subr.bf16.mxu1 %v2859_v20  ;;  %v2802_v20 = vcombine.low %v151_v8, %v155_v10  ;;  %v2923_v23 = vcombine.high %v271_v17, %v275_v19  ;;  %v2922_v28 = vcombine.low %v271_v17, %v275_v19  ;;  %v3131_v8 = vld [vmem:[%s3579_s3 + $0x20] sm:$0xff]   ;;  %v320_v10 = vsub.s32 0, %v3320_v46  ;;  %v3132_v3 = vld [vmem:[%s3579_s3 + $0x58] sm:$0xff]   ;;  %v3135_v17 = vld [vmem:[%s3579_s3 + $0x10] sm:$0xff]  }
 0x100   :  { %1924 = vmatpush1.bf16.msra.mxu0 %v2730_v25  ;;  %v139_v25 = vld [vmem:[#allocation2 + $0x278] sm:$0xff] }
 0x101   :  { %1925 = vmatprep.subr.bf16.mxu0 %v2723_v56  ;;  %v267_v56 = vld [vmem:[#allocation2 + $0x678] sm:$0xff]  ;;  %v2787_v29 = vcombine.high %v135_v24, %v139_v25 }
 0x102   :  { %1965 = vmatpush1.bf16.msra.mxu1 %v2858_v27  ;;  %v263_v27 = vld [vmem:[#allocation2 + $0x658] sm:$0xff] }
 0x103   :  { %1966 = vmatprep.subr.bf16.mxu1 %v2851_v59  ;;  %v2794_v59 = vcombine.low %v143_v15, %v147_v16  ;;  %v2915_v30 = vcombine.high %v263_v27, %v267_v56  ;;  %v2914_v36 = vcombine.low %v263_v27, %v267_v56  ;;  %v3149_v15 = vld [vmem:[%s3579_s3 + $0x98] sm:$0xff]   ;;  %v3150_v16 = vld [vmem:[%s3579_s3 + $0xd0] sm:$0xff]   ;;  %v3153_v27 = vld [vmem:[%s3579_s3 + $0x88] sm:$0xff]  }
 0x104   :  { %1926 = vmatpush1.bf16.msra.mxu0 %v2722_v32  ;;  %v131_v32 = vld [vmem:[#allocation2 + $0x238] sm:$0xff]  ;;  %v3154_v56 = vld [vmem:[%s3579_s3 + $0xc0] sm:$0xff]  }
 0x105   :  { %1927 = vmatprep.subr.bf16.mxu0 %v2715_v34  ;;  %v259_v34 = vld [vmem:[#allocation2 + $0x638] sm:$0xff]  ;;  %v2779_v37 = vcombine.high %v127_v31, %v131_v32  ;;  %v2778_v39 = vcombine.low %v127_v31, %v131_v32 }
 0x106   :  { %1967 = vmatpush1.bf16.msra.mxu1 %v2850_v33  ;;  %v255_v33 = vld [vmem:[#allocation2 + $0x618] sm:$0xff] }
 0x107   :  { %1968 = vmatprep.subr.bf16.mxu1 %v2843_v35  ;;  %v2786_v35 = vcombine.low %v135_v24, %v139_v25  ;;  %v2907_v38 = vcombine.high %v255_v33, %v259_v34  ;;  %v3138_v25 = vld [vmem:[%s3579_s3 + $0x40] sm:$0xff]   ;;  %v3172_v31 = vld [vmem:[%s3579_s3 + $0x1f8] sm:$0xff]  }
 0x108   :  { %1928 = vmatpush1.bf16.msra.mxu0 %v2714_v40  ;;  %v2906_v40 = vcombine.low %v255_v33, %v259_v34  ;;  %v3157_v32 = vld [vmem:[%s3579_s3 + $0x138] sm:$0xff]   ;;  %v3158_v34 = vld [vmem:[%s3579_s3 + $0x170] sm:$0xff]  }
 0x109   :  { %1929 = vmatprep.subr.bf16.mxu0 %v2835_v42  ;;  %v324_v42 = vsub.s32 1, %v3320_v46 }
 0x10a   :  { %1969 = vmatpush1.bf16.msra.mxu1 %v2842_v41  ;;  %v3124_v41 = vld [vmem:[%s3579_s3 + $0x78] sm:$0xff]  }
 0x10b   :  { %1970 = vmatprep.subr.bf16.mxu1 %v2963_v43  ;;  %v3140_v43 = vld [vmem:[%s3579_s3 + $0xf8] sm:$0xff]  }
 0x10c   :  { %1930 = vmatpush2.bf16.msra.mxu0 %v2834_v49  ;;  %v325_v49 = vrot.slane %v3368_v44, %v324_v42  ;;  %v3166_v42 = vld [vmem:[%s3579_s3 + $0x150] sm:$0xff]  }
 0x10d   :  { %1931 = vmatprep.subr.bf16.mxu0 %v2827_v51 }
 0x10e   :  { %1971 = vmatpush2.bf16.msra.mxu1 %v2962_v50  ;;  %v3142_v50 = vld [vmem:[%s3579_s3 + $0xf0] sm:$0xff]  }
 0x10f   :  { %1972 = vmatprep.subr.bf16.mxu1 %v2955_v52 }
 0x110   :  { %1932 = vmatpush2.bf16.msra.mxu0 %v2826_v58 }
 0x111   :  { %1933 = vmatprep.subr.bf16.mxu0 %v2819_v61 }
 0x112   :  { %1973 = vmatpush2.bf16.msra.mxu1 %v2954_v60 }
 0x113   :  { %1974 = vmatprep.subr.bf16.mxu1 %v2947_v62 }
 0x114   :  { %1934 = vmatpush2.bf16.msra.mxu0 %v2818_v4 }
 0x115   :  { %1935 = vmatprep.subr.bf16.mxu0 %v2811_v6  ;;  %v3146_v6 = vld [vmem:[%s3579_s3 + $0xe0] sm:$0xff]  }
 0x116   :  { %1975 = vmatpush2.bf16.msra.mxu1 %v2946_v5 }
 0x117   :  { %1976 = vmatprep.subr.bf16.mxu1 %v2939_v7 }
 0x118   :  { %1936 = vmatpush2.bf16.msra.mxu0 %v2810_v9  ;;  %v3148_v9 = vld [vmem:[%s3579_s3 + $0xd8] sm:$0xff]  }
 0x119   :  { %1937 = vmatprep.subr.bf16.mxu0 %v2803_v13  ;;  %v321_v13 = vrot.slane %v3368_v44, %v320_v10  ;;  %v3175_v10 = vld [vmem:[%s3579_s3 + $0x1b0] sm:$0xff]  }
 0x11a   :  { %1977 = vmatpush2.bf16.msra.mxu1 %v2938_v12  ;;  %v3133_v12 = vld [vmem:[%s3579_s3 + $0x18] sm:$0xff]  }
 0x11b   :  { %1978 = vmatprep.subr.bf16.mxu1 %v2931_v14  ;;  %v3134_v14 = vld [vmem:[%s3579_s3 + $0x50] sm:$0xff]  }
 0x11c   :  { %1938 = vmatpush2.bf16.msra.mxu0 %v2802_v20  ;;  %v3136_v20 = vld [vmem:[%s3579_s3 + $0x48] sm:$0xff]  }
 0x11d   :  { %1939 = vmatprep.subr.bf16.mxu0 %v2795_v22  ;;  %v3152_v22 = vld [vmem:[%s3579_s3 + $0xc8] sm:$0xff]  }
 0x11e   :  { %1979 = vmatpush2.bf16.msra.mxu1 %v2930_v21  ;;  %v3151_v21 = vld [vmem:[%s3579_s3 + $0x90] sm:$0xff]  }
 0x11f   :  { %1980 = vmatprep.subr.bf16.mxu1 %v2923_v23  ;;  %v3137_v23 = vld [vmem:[%s3579_s3 + $0x8] sm:$0xff]  }
 0x120   :  { %1940 = vmatpush2.bf16.msra.mxu0 %v2794_v59  ;;  %v3139_v59 = vld [vmem:[%s3579_s3] sm:$0xff]  }
 0x121   :  { %1941 = vmatprep.subr.bf16.mxu0 %v2787_v29  ;;  %v3155_v29 = vld [vmem:[%s3579_s3 + $0x80] sm:$0xff]  }
 0x122   :  { %1981 = vmatpush2.bf16.msra.mxu1 %v2922_v28 }
 0x123   :  { %1982 = vmatprep.subr.bf16.mxu1 %v2915_v30  ;;  %v3156_v30 = vld [vmem:[%s3579_s3 + $0x178] sm:$0xff]  }
 0x124   :  { %1942 = vmatpush2.bf16.msra.mxu0 %v2786_v35  ;;  %v3159_v35 = vld [vmem:[%s3579_s3 + $0x130] sm:$0xff]  }
 0x125   :  { %1943 = vmatprep.subr.bf16.mxu0 %v2779_v37  ;;  %v3161_v37 = vld [vmem:[%s3579_s3 + $0x128] sm:$0xff]  }
 0x126   :  { %1983 = vmatpush2.bf16.msra.mxu1 %v2914_v36  ;;  %v3160_v36 = vld [vmem:[%s3579_s3 + $0x168] sm:$0xff]  }
 0x127   :  { %1984 = vmatprep.subr.bf16.mxu1 %v2907_v38  ;;  %v3162_v38 = vld [vmem:[%s3579_s3 + $0x160] sm:$0xff]  }
 0x128   :  { %1944 = vmatpush2.bf16.msra.mxu0 %v2778_v39  ;;  %v3163_v39 = vld [vmem:[%s3579_s3 + $0x120] sm:$0xff]  }
 0x129   :  { %3029 = vmatprep.subr.bf16.mxu0 %v3124_v41  ;;  %v3165_v41 = vld [vmem:[%s3579_s3 + $0x118] sm:$0xff]  }
 0x12a   :  { %1985 = vmatpush2.bf16.msra.mxu1 %v2906_v40  ;;  %v3164_v40 = vld [vmem:[%s3579_s3 + $0x158] sm:$0xff]  }
 0x12b   :  { %3051 = vmatprep.subr.bf16.mxu1 %v3140_v43  ;;  %v1701_v51 = vpop.f32.mrf.mxu0  ;;  %1946 = vmatmul.mubr.bf16.vlgmr.msra.gmra.mxu0 %v3343_v18  ;;  %v3167_v43 = vld [vmem:[%s3579_s3 + $0x110] sm:$0xff]  }
 0x12c   :  { %3030 = vmatpush3.bf16.msra.mxu0 %v3125_v45  ;;  %v1702_v19 = vadd.f32 %v1701_v51, %v321_v13  ;;  %v3168_v45 = vld [vmem:[%s3579_s3 + $0x148] sm:$0xff]   ;;  %v332_v51 = vsub.s32 3, %v3320_v46  ;;  %v3180_v13 = vld [vmem:[%s3579_s3 + $0x1d8] sm:$0xff]  }
 0x12d   :  { %v1742_v52 = vpop.f32.mrf.mxu1  ;;  %1987 = vmatmul.mubr.bf16.vlgmr.msra.gmra.mxu1 %v3347_v26  ;;  %v1703_v54 = vpop.f32.mrf.mxu0  ;;  %3031 = vmatprep.subr.bf16.mxu0 %v3126_v47  ;;  %v3144_v26 = vld [vmem:[%s3579_s3 + $0xe8] sm:$0xff]  }
 0x12e   :  { %3052 = vmatpush3.bf16.msra.mxu1 %v3141_v48  ;;  %v1704_v18 = vadd.f32 %v1703_v54, %v325_v49  ;;  %v1743_v24 = vadd.f32 %v1742_v52, %v1702_v19  ;;  %v3169_v47 = vld [vmem:[%s3579_s3 + $0x108] sm:$0xff]   ;;  %v3170_v48 = vld [vmem:[%s3579_s3 + $0x140] sm:$0xff]   ;;  %v328_v49 = vsub.s32 2, %v3320_v46 }
 0x12f   :  { %v1744_v58 = vpop.f32.mrf.mxu1  ;;  %3053 = vmatprep.subr.bf16.mxu1 %v3142_v50  ;;  %v1705_v60 = vpop.f32.mrf.mxu0  ;;  %v3171_v50 = vld [vmem:[%s3579_s3 + $0x100] sm:$0xff]   ;;  %v3185_v19 = vld [vmem:[%s3579_s3 + $0x188] sm:$0xff]  }
 0x130   :  { %v1745_v61 = vadd.f32 %v1744_v58, %v1704_v18  ;;  %3032 = vmatpush3.bf16.msra.mxu0 %v3127_v53  ;;  %v1995_v28 = vmax.f32 %v1743_v24, 0.0  ;;  %v329_v52 = vrot.slane %v3368_v44, %v328_v49  ;;  %v333_v53 = vrot.slane %v3368_v44, %v332_v51 }
 0x131   :  { %v1746_v62 = vpop.f32.mrf.mxu1  ;;  %v1706_v0 = vpop.f32.mrf.mxu0  ;;  %3033 = vmatprep.subr.bf16.mxu0 %v3128_v55 }
 0x132   :  { %3054 = vmatpush3.bf16.msra.mxu1 %v3143_v57  ;;  %v1996_v4 = vmax.f32 %v1745_v61, 0.0  ;;  %v2003_v33 = vpack.c.bf16 %v1995_v28, %v1995_v28 }
 0x133   :  { %v1747_v5 = vpop.f32.mrf.mxu1  ;;  %3055 = vmatprep.subr.bf16.mxu1 %v3144_v26 }
 0x134   :  { %v2004_v7 = vpack.c.bf16 %v1996_v4, %v1996_v4  ;;  %3034 = vmatpush3.bf16.msra.mxu0 %v3129_v63 }
 0x135   :  { %3035 = vmatprep.subr.bf16.mxu0 %v3130_v1 }
 0x136   :  { %3056 = vmatpush3.bf16.msra.mxu1 %v3145_v2  ;;  %2562 = vmatprep.mubr.bf16.mxu0 %v2004_v7 }
 0x137   :  { %3057 = vmatprep.subr.bf16.mxu1 %v3146_v6  ;;  %v3173_v6 = vld [vmem:[%s3579_s3 + $0x1b8] sm:$0xff]  }
 0x138   :  { %3036 = vmatpush3.bf16.msra.mxu0 %v3131_v8  ;;  %v3174_v8 = vld [vmem:[%s3579_s3 + $0x1f0] sm:$0xff]  }
 0x139   :  { %3037 = vmatprep.subr.bf16.mxu0 %v3132_v3  ;;  %v3176_v3 = vld [vmem:[%s3579_s3 + $0x1e8] sm:$0xff]  }
 0x13a   :  { %3058 = vmatpush3.bf16.msra.mxu1 %v3147_v11  ;;  %v3177_v11 = vld [vmem:[%s3579_s3 + $0x1a8] sm:$0xff]  }
 0x13b   :  { %3059 = vmatprep.subr.bf16.mxu1 %v3148_v9  ;;  %v3178_v9 = vld [vmem:[%s3579_s3 + $0x1e0] sm:$0xff]  }
 0x13c   :  { %3038 = vmatpush3.bf16.msra.mxu0 %v3133_v12  ;;  %v3179_v12 = vld [vmem:[%s3579_s3 + $0x1a0] sm:$0xff]  }
 0x13d   :  { %3039 = vmatprep.subr.bf16.mxu0 %v3134_v14  ;;  %v3181_v14 = vld [vmem:[%s3579_s3 + $0x198] sm:$0xff]  }
 0x13e   :  { %3060 = vmatpush3.bf16.msra.mxu1 %v3149_v15  ;;  %v3182_v15 = vld [vmem:[%s3579_s3 + $0x1d0] sm:$0xff]  }
 0x13f   :  { %3061 = vmatprep.subr.bf16.mxu1 %v3150_v16  ;;  %v3183_v16 = vld [vmem:[%s3579_s3 + $0x190] sm:$0xff]  }
 0x140   :  { %3040 = vmatpush3.bf16.msra.mxu0 %v3135_v17  ;;  %v3184_v17 = vld [vmem:[%s3579_s3 + $0x1c8] sm:$0xff]  }
 0x141   :  { %3041 = vmatprep.subr.bf16.mxu0 %v3136_v20  ;;  %v3186_v20 = vld [vmem:[%s3579_s3 + $0x1c0] sm:$0xff]  }
 0x142   :  { %3062 = vmatpush3.bf16.msra.mxu1 %v3151_v21  ;;  %v3187_v21 = vld [vmem:[%s3579_s3 + $0x180] sm:$0xff]   ;;  %s3280_s3 = smov [#allocation8]  }
 0x143   :  { %3063 = vmatprep.subr.bf16.mxu1 %v3152_v22  ;;  %v336_v22 = vsub.s32 4, %v3320_v46  ;;  %s2697_s21 = sshll.u32 %s3280_s3, 4  ;;  %s2698_s21 = int_to_ptr.vmem [resolvable:$true] %s2697_s21 }
 0x144   :  { %3042 = vmatpush3.bf16.msra.mxu0 %v3137_v23  ;;  %v340_v23 = vsub.s32 5, %v3320_v46  ;;  %s3248_s22 = scalar_lea.vmem %s2698_s21, 32  ;;  %p3253_p2 = scmp.lt.s32.totalorder %s2698_s21, %s2698_s21 }
 0x145   :  { %3043 = vmatprep.subr.bf16.mxu0 %v3138_v25  ;;  %v337_v24 = vrot.slane %v3368_v44, %v336_v22  ;;  %p3249_p1 = scmp.ne.s32.totalorder %s2698_s21, %s3248_s22  ;;  %p3254_p3 = scmp.lt.s32.totalorder %s3248_s22, %s3248_s22 }
 0x146   :  { %3064 = vmatpush3.bf16.msra.mxu1 %v3153_v27  ;;  %v341_v25 = vrot.slane %v3368_v44, %v340_v23 }
 0x147   :  { %3065 = vmatprep.subr.bf16.mxu1 %v3154_v56  ;;  %p3255_p4 = por %p3254_p3, %p3253_p2 }
 0x148   :  { %3044 = vmatpush3.bf16.msra.mxu0 %v3139_v59 }
 0x149   :  { %3073 = vmatprep.subr.bf16.mxu0 %v3156_v30  ;;  %p3256_p5 = pnand %p3255_p4, %p3249_p1 }
 0x14a   :  { %3066 = vmatpush3.bf16.msra.mxu1 %v3155_v29 }
 0x14b   :  { %3095 = vmatprep.subr.bf16.mxu1 %v3172_v31  ;;  %2563 = vmatmul.mubr.bf16.vlgmr.msra.gmra.mxu0 %v2003_v33 }
 0x14c   :  { %3074 = vmatpush3.bf16.msra.mxu0 %v3157_v32 }
 0x14d   :  { %3075 = vmatprep.subr.bf16.mxu0 %v3158_v34 }
 0x150   :  { %3076 = vmatpush3.bf16.msra.mxu0 %v3159_v35 }
 0x151   :  { %3077 = vmatprep.subr.bf16.mxu0 %v3160_v36 }
 0x154   :  { %3078 = vmatpush3.bf16.msra.mxu0 %v3161_v37 }
 0x155   :  { %3079 = vmatprep.subr.bf16.mxu0 %v3162_v38 }
 0x158   :  { %3080 = vmatpush3.bf16.msra.mxu0 %v3163_v39 }
 0x159   :  { %3081 = vmatprep.subr.bf16.mxu0 %v3164_v40 }
 0x15c   :  { %3082 = vmatpush3.bf16.msra.mxu0 %v3165_v41  ;;  %v344_v41 = vsub.s32 6, %v3320_v46 }
 0x15d   :  { %3083 = vmatprep.subr.bf16.mxu0 %v3166_v42  ;;  %v348_v42 = vsub.s32 7, %v3320_v46 }
 0x160   :  { %3084 = vmatpush3.bf16.msra.mxu0 %v3167_v43  ;;  %v345_v43 = vrot.slane %v3368_v44, %v344_v41 }
 0x161   :  { %3085 = vmatprep.subr.bf16.mxu0 %v3168_v45  ;;  %v349_v45 = vrot.slane %v3368_v44, %v348_v42 }
 0x164   :  { %3086 = vmatpush3.bf16.msra.mxu0 %v3169_v47 }
 0x165   :  { %3087 = vmatprep.subr.bf16.mxu0 %v3170_v48 }
 0x168   :  { %3088 = vmatpush3.bf16.msra.mxu0 %v3171_v50 }
 0x16b   :  { %v1783_v54 = vpop.f32.mrf.mxu0 }
 0x16c   :  { %v1784_v55 = vadd.f32 %v1783_v54, %v329_v52 }
 0x16d   :  { %v1824_v57 = vpop.f32.mrf.mxu1  ;;  %v1785_v18 = vpop.f32.mrf.mxu0 }
 0x16e   :  { %v1825_v58 = vadd.f32 %v1824_v57, %v1784_v55  ;;  %v1786_v26 = vadd.f32 %v1785_v18, %v333_v53 }
 0x16f   :  { %v1826_v60 = vpop.f32.mrf.mxu1  ;;  %v1787_v61 = vpop.f32.mrf.mxu0 }
 0x170   :  { %v1827_v62 = vadd.f32 %v1826_v60, %v1786_v26  ;;  %v1997_v0 = vmax.f32 %v1825_v58, 0.0 }
 0x171   :  { %v1828_v63 = vpop.f32.mrf.mxu1  ;;  %v1788_v1 = vpop.f32.mrf.mxu0 }
 0x172   :  { %v1998_v2 = vmax.f32 %v1827_v62, 0.0  ;;  %v2005_v7 = vpack.c.bf16 %v1997_v0, %v1997_v0 }
 0x173   :  { %v1829_v4 = vpop.f32.mrf.mxu1 }
 0x174   :  { %v2006_v5 = vpack.c.bf16 %v1998_v2, %v1998_v2  ;;  %v2964_v2 = vld [vmem:[#allocation7] ss:$0 sm:$0xff] }
 0x176   :  { %2602 = vmatprep.mubr.bf16.mxu1 %v2006_v5 }
 0x177   :  { %2603 = vmatmul.mubr.bf16.vlgmr.msra.gmra.mxu1 %v2005_v7 }
 0x178   :  { %3096 = vmatpush3.bf16.msra.mxu1 %v3173_v6 }
 0x179   :  { %3097 = vmatprep.subr.bf16.mxu1 %v3174_v8 }
 0x17c   :  { %3098 = vmatpush3.bf16.msra.mxu1 %v3175_v10 }
 0x17d   :  { %3099 = vmatprep.subr.bf16.mxu1 %v3176_v3 }
 0x180   :  { %3100 = vmatpush3.bf16.msra.mxu1 %v3177_v11 }
 0x181   :  { %3101 = vmatprep.subr.bf16.mxu1 %v3178_v9 }
 0x184   :  { %3102 = vmatpush3.bf16.msra.mxu1 %v3179_v12 }
 0x185   :  { %3103 = vmatprep.subr.bf16.mxu1 %v3180_v13 }
 0x188   :  { %3104 = vmatpush3.bf16.msra.mxu1 %v3181_v14 }
 0x189   :  { %3105 = vmatprep.subr.bf16.mxu1 %v3182_v15 }
 0x18c   :  { %3106 = vmatpush3.bf16.msra.mxu1 %v3183_v16 }
 0x18d   :  { %3107 = vmatprep.subr.bf16.mxu1 %v3184_v17 }
 0x190   :  { %3108 = vmatpush3.bf16.msra.mxu1 %v3185_v19 }
 0x191   :  { %3109 = vmatprep.subr.bf16.mxu1 %v3186_v20 }
 0x194   :  { %3110 = vmatpush3.bf16.msra.mxu1 %v3187_v21 }
 0x1ab   :  { %v1865_v27 = vpop.f32.mrf.mxu0 }
 0x1ac   :  { %v1866_v56 = vadd.f32 %v1865_v27, %v337_v24 }
 0x1ad   :  { %v1906_v59 = vpop.f32.mrf.mxu1  ;;  %v1867_v28 = vpop.f32.mrf.mxu0 }
 0x1ae   :  { %v1907_v29 = vadd.f32 %v1906_v59, %v1866_v56  ;;  %v1868_v30 = vadd.f32 %v1867_v28, %v341_v25 }
 0x1af   :  { %v1908_v31 = vpop.f32.mrf.mxu1  ;;  %v1869_v32 = vpop.f32.mrf.mxu0 }
 0x1b0   :  { %v1909_v33 = vadd.f32 %v1908_v31, %v1868_v30  ;;  %v1999_v35 = vmax.f32 %v1907_v29, 0.0 }
 0x1b1   :  { %v1910_v34 = vpop.f32.mrf.mxu1  ;;  %v1870_v36 = vpop.f32.mrf.mxu0 }
 0x1b2   :  { %v2000_v37 = vmax.f32 %v1909_v33, 0.0  ;;  %v2007_v40 = vpack.c.bf16 %v1999_v35, %v1999_v35 }
 0x1b3   :  { %v1911_v38 = vpop.f32.mrf.mxu1 }
 0x1b4   :  { %v2008_v39 = vpack.c.bf16 %v2000_v37, %v2000_v37 }
 0x1b6   :  { %2642 = vmatprep.mubr.bf16.mxu0 %v2008_v39 }
 0x1b7   :  { %2643 = vmatmul.mubr.bf16.vlgmr.msra.gmra.mxu0 %v2007_v40 }
 0x1eb   :  { %v1947_v47 = vpop.f32.mrf.mxu0 }
 0x1ec   :  { %v1948_v48 = vadd.f32 %v1947_v47, %v345_v43 }
 0x1ed   :  { %v1988_v49 = vpop.f32.mrf.mxu1  ;;  %v1949_v50 = vpop.f32.mrf.mxu0 }
 0x1ee   :  { %v1989_v51 = vadd.f32 %v1988_v49, %v1948_v48  ;;  %v1950_v52 = vadd.f32 %v1949_v50, %v349_v45 }
 0x1ef   :  { %v1990_v53 = vpop.f32.mrf.mxu1  ;;  %v1951_v54 = vpop.f32.mrf.mxu0 }
 0x1f0   :  { %v1991_v55 = vadd.f32 %v1990_v53, %v1950_v52  ;;  %v2001_v18 = vmax.f32 %v1989_v51, 0.0 }
 0x1f1   :  { %v1992_v57 = vpop.f32.mrf.mxu1  ;;  %v1952_v58 = vpop.f32.mrf.mxu0 }
 0x1f2   :  { %v2002_v26 = vmax.f32 %v1991_v55, 0.0  ;;  %v2009_v46 = vpack.c.bf16 %v2001_v18, %v2001_v18 }
 0x1f3   :  { %v1993_v60 = vpop.f32.mrf.mxu1 }
 0x1f4   :  { %v2010_v61 = vpack.c.bf16 %v2002_v26, %v2002_v26 }
 0x1f6   :  { %2682 = vmatprep.mubr.bf16.mxu1 %v2010_v61 }
 0x1f7   :  { %2683 = vmatmul.mubr.bf16.vlgmr.msra.gmra.mxu1 %v2009_v46 }
 0x20b   :  { %v3045_v62 = vpop.f32.mrf.mxu0 }
 0x20d   :  { %v3046_v44 = vpop.f32.mrf.mxu0 }
 0x20e   :  { %v3047_v63 = vadd.f32 %v3046_v44, %v3045_v62 }
 0x20f   :  { %v3048_v0 = vpop.f32.mrf.mxu0 }
 0x210   :  { %v2565_v6 = vadd.f32 %v3047_v63, %v2964_v2 }
 0x211   :  { %v3049_v1 = vpop.f32.mrf.mxu0 }
 0x237   :  { %v3067_v4 = vpop.f32.mrf.mxu1 }
 0x239   :  { %v3068_v5 = vpop.f32.mrf.mxu1 }
 0x23a   :  { %v3069_v7 = vadd.f32 %v3068_v5, %v3067_v4 }
 0x23b   :  { %v3070_v8 = vpop.f32.mrf.mxu1 }
 0x23c   :  { %v2605_v10 = vadd.f32 %v3069_v7, %v2565_v6 }
 0x23d   :  { %v3071_v3 = vpop.f32.mrf.mxu1 }
 0x277   :  { %v3089_v11 = vpop.f32.mrf.mxu0 }
 0x279   :  { %v3090_v9 = vpop.f32.mrf.mxu0 }
 0x27a   :  { %v3091_v12 = vadd.f32 %v3090_v9, %v3089_v11 }
 0x27b   :  { %v3092_v13 = vpop.f32.mrf.mxu0 }
 0x27c   :  { %v2645_v14 = vadd.f32 %v3091_v12, %v2605_v10 }
 0x27d   :  { %v3093_v15 = vpop.f32.mrf.mxu0 }
 0x2b7   :  { %v3111_v16 = vpop.f32.mrf.mxu1 }
 0x2b9   :  { %v3112_v17 = vpop.f32.mrf.mxu1 }
 0x2ba   :  { %v3113_v19 = vadd.f32 %v3112_v17, %v3111_v16 }
 0x2bb   :  { %v3114_v20 = vpop.f32.mrf.mxu1 }
 0x2bc   :  { %v2685_v21 = vadd.f32 %v3113_v19, %v2645_v14 }
 0x2bd   :  { %v3115_v22 = vpop.f32.mrf.mxu1 }
 0x2be   :  { %2690 = vst [vmem:[#allocation8] sm:$0x3] %v2685_v21 }
 0x2bf   :  { %3259 = shalt.err (!%p3256_p5)
}
 0x2c0   :  { %2700 = dma.vmem_to_hbm [thread:$0]  %s2698_s21, 32, %s3581_s5, [#allocation4]  }
 0x2c1   :  { %3272 = dma.done.wait [#allocation4], 32  }
 0x2c2   :  { %3273 = vsyncadd [#allocation4], 4294967264 }
 0x2c3   :  { %2704 = vsyncpa [#allocation3], 1 }
 0x2c4   :  { %2705 = vsyncpa [#allocation6], 1 }
 0x2c5   :  { %2706 = vsyncpa [#allocation4], 1 }

</bundles_post_ra>
